<compile_context>
chip_gen: v6e
topology: v6e:2x2x1
jax: 0.10.0
libtpu: 0.0.40
codegen_flags: <defaults>
</compile_context>

<pallas_src>
from functools import partial

import jax
import jax.numpy as jnp
from jax.experimental import pallas as pl
from jax.experimental.pallas import tpu as pltpu

NEG_INF = -1e9  # additive mask value


# ---------------------------------------------------------------------------
# in-kernel helpers (operate on loaded VMEM values)
# ---------------------------------------------------------------------------
def _custom_layernorm(x, g, b, eps=1e-6):
    # codebase LayerNorm: unbiased std (N-1), eps added to the std (not var).
    # exact reciprocal (review: no approx recip inside LayerNorm).
    d = x.shape[-1]
    mu = jnp.mean(x, axis=-1, keepdims=True)
    var = jnp.sum((x - mu) ** 2, axis=-1, keepdims=True) * (1.0 / (d - 1))
    inv = 1.0 / (jnp.sqrt(var) + eps)
    return g * (x - mu) * inv + b


def _torch_layernorm(x, g, b, eps=1e-5):
    # torch.nn.LayerNorm: biased variance, eps inside the sqrt.
    mu = jnp.mean(x, axis=-1, keepdims=True)
    var = jnp.mean((x - mu) ** 2, axis=-1, keepdims=True)
    return (x - mu) * jax.lax.rsqrt(var + eps) * g + b


def _mha_out(q, k, v, add_mask, wo, num_heads, scale):
    # merged-head q/k/v [T*, H] (f32), additive mask [1 or Tq, Tk], wo [H, H] bf16.
    # Per-head SDPA; the head outputs are folded straight into the output
    # projection (ctx_h @ wo[rows_h]) -> NO lane-axis concat of per-head ctx.
    hid = q.shape[-1]
    dh = hid // num_heads
    qs = q * scale
    out = None
    for h in range(num_heads):
        sl = slice(h * dh, (h + 1) * dh)
        logits = jax.lax.dot_general(
            qs[:, sl].astype(jnp.bfloat16), k[:, sl].astype(jnp.bfloat16),
            (((1,), (1,)), ((), ())), preferred_element_type=jnp.float32) + add_mask
        m = jnp.max(logits, axis=-1, keepdims=True)
        e = jnp.exp(logits - m)
        p = e * pl.reciprocal(jnp.sum(e, axis=-1, keepdims=True), approx=True)
        ctx = jnp.dot(p.astype(jnp.bfloat16), v[:, sl].astype(jnp.bfloat16),
                      preferred_element_type=jnp.float32)
        contrib = jnp.dot(ctx.astype(jnp.bfloat16), wo[sl, :],
                          preferred_element_type=jnp.float32)
        out = contrib if out is None else out + contrib
    return out


def _shift_down(x):  # row t <- x[t-1]; zero at row 0
    zero = jnp.zeros((1, x.shape[-1]), x.dtype)
    return jnp.concatenate([zero, x[:-1, :]], axis=0)


def _shift_up(x):    # row t <- x[t+1]; zero at last row
    zero = jnp.zeros((1, x.shape[-1]), x.dtype)
    return jnp.concatenate([x[1:, :], zero], axis=0)


def _conv3(x, w, b):
    # kernel-size-3 conv with padding='both' as THREE tap matmuls (no lane-axis
    # [T,3C] slab concat).  w is [3C, Cout] bf16; rows [0:C] hit x[t-1],
    # [C:2C] hit x[t], [2C:3C] hit x[t+1]; shifts are sublane-axis only.
    # TODO(synk): pltpu.roll(axis=0)+mask would put the shift on the XLU slot;
    #             sublane concat kept for guaranteed lowering at S not 8-aligned.
    c = x.shape[-1]
    y = jnp.dot(_shift_down(x).astype(jnp.bfloat16), w[0:c, :],
                preferred_element_type=jnp.float32)
    y = y + jnp.dot(x.astype(jnp.bfloat16), w[c:2 * c, :],
                    preferred_element_type=jnp.float32)
    y = y + jnp.dot(_shift_up(x).astype(jnp.bfloat16), w[2 * c:, :],
                    preferred_element_type=jnp.float32)
    return y + b


# ---------------------------------------------------------------------------
# kernel 1: all experts + MoE combine + torch LayerNorm  (grid = (B, E))
# ---------------------------------------------------------------------------
def _experts_combine_kernel(ap_ref, inp_ref, enc_ref, mask_ref, lng_ref, lnb_ref,
                            win_ref, wq_ref, wkv_ref, wo_ref, w1_ref, b1_ref,
                            w2_ref, vec_ref, so_ref, son_ref, acc_ref, *,
                            num_heads, scale):
    b = pl.program_id(0)
    e = pl.program_id(1)
    last_e = pl.num_programs(1) - 1

    vec = vec_ref[...]                    # [5, H] f32: ln1_g, ln1_b, ln2_g, ln2_b, b2
    enc = enc_ref[...]                    # [S, H] f32
    mask = mask_ref[...]                  # [1, S] additive f32

    # ---- ExpertEncoder: input proj -> pre-LN cross MHA -> pre-LN FFN ----
    x = jnp.dot(inp_ref[...].astype(jnp.bfloat16), win_ref[...],
                preferred_element_type=jnp.float32)                     # [T, H]

    xn = _custom_layernorm(x, vec[0:1], vec[1:2])
    q = jnp.dot(xn.astype(jnp.bfloat16), wq_ref[...],
                preferred_element_type=jnp.float32)                     # [T, H]
    kv = jnp.dot(enc.astype(jnp.bfloat16), wkv_ref[...],
                 preferred_element_type=jnp.float32)                    # [S, 2H]
    hid = x.shape[-1]
    k, v = kv[:, :hid], kv[:, hid:]
    x = x + _mha_out(q, k, v, mask, wo_ref[...], num_heads, scale)

    xn = _custom_layernorm(x, vec[2:3], vec[3:4])
    h = jnp.maximum(
        jnp.dot(xn.astype(jnp.bfloat16), w1_ref[...],
                preferred_element_type=jnp.float32) + b1_ref[...], 0.0)
    x = x + jnp.dot(h.astype(jnp.bfloat16), w2_ref[...],
                    preferred_element_type=jnp.float32) + vec[4:5]

    mean = jnp.mean(x, axis=0, keepdims=True)                           # [1, H]

    # ---- MoE combine accumulated across the expert grid axis ----
    @pl.when(e == 0)
    def _():
        acc_ref[...] = jnp.zeros_like(acc_ref)

    acc_ref[...] += ap_ref[b, e] * mean

    @pl.when(e == last_e)
    def _():
        so = enc + acc_ref[...]                                         # [S, H]
        so_ref[...] = so.astype(so_ref.dtype)
        son_ref[...] = _torch_layernorm(so, lng_ref[...], lnb_ref[...]
                                        ).astype(son_ref.dtype)


# ---------------------------------------------------------------------------
# kernel 2: the whole EncLayer stack + final LayerNorm  (grid = (B, hop))
# ---------------------------------------------------------------------------
def _enc_stack_kernel(x0_ref, mask_ref, wqkv_ref, wo_ref, w1_ref, b1_ref, w2_ref,
                      vec_ref, o_ref, x_sc, *, num_heads, scale):
    layer = pl.program_id(1)
    last_layer = pl.num_programs(1) - 1

    vec = vec_ref[...]          # [7, H]: lnm_g, lnm_b, lnf_g, lnf_b, conv2_b, fin_g, fin_b
    hid = vec.shape[-1]
    mask = mask_ref[...]        # [1, S] additive f32

    @pl.when(layer == 0)
    def _():
        x_sc[...] = x0_ref[...]

    x = x_sc[...]               # [S, H] activation carried in VMEM across layers

    # self attention (fused QKV projection)
    xn = _custom_layernorm(x, vec[0:1], vec[1:2])
    qkv = jnp.dot(xn.astype(jnp.bfloat16), wqkv_ref[...],
                  preferred_element_type=jnp.float32)                   # [S, 3H]
    q, k, v = qkv[:, :hid], qkv[:, hid:2 * hid], qkv[:, 2 * hid:]
    x = x + _mha_out(q, k, v, mask, wo_ref[...], num_heads, scale)

    # conv feed forward: two k=3 convs, each as three tap matmuls
    xn = _custom_layernorm(x, vec[2:3], vec[3:4])
    h = jnp.maximum(_conv3(xn, w1_ref[...], b1_ref[...]), 0.0)
    x = x + _conv3(h, w2_ref[...], vec[4:5])

    x_sc[...] = x

    @pl.when(layer == last_layer)   # module-level torch LayerNorm fused into last layer
    def _():
        o_ref[...] = _torch_layernorm(x, vec[5:6], vec[6:7]).astype(o_ref.dtype)


# ---------------------------------------------------------------------------
# wrappers
# ---------------------------------------------------------------------------
def experts_and_combine(ep, ap, inputs, encoder_outputs, cross_mask_add,
                        ln_g, ln_b, num_heads):
    E, Din, H = ep["w_in"].shape
    B, T, _ = inputs.shape
    S = encoder_outputs.shape[1]
    F = ep["w1"].shape[2]
    vec = jnp.stack([ep["ln1_g"], ep["ln1_b"], ep["ln2_g"], ep["ln2_b"], ep["b2"]],
                    axis=1)                                              # [E, 5, H] f32
    scale = float(H // num_heads) ** -0.5
    kernel = partial(_experts_combine_kernel, num_heads=num_heads, scale=scale)

    grid_spec = pltpu.PrefetchScalarGridSpec(
        num_scalar_prefetch=1,                 # ap [B, E] lives in SMEM
        grid=(B, E),                           # batch parallel (even megacore split),
        in_specs=[                             # experts = accumulation axis (last)
            pl.BlockSpec((None, T, Din), lambda b, e, ap: (b, 0, 0)),
            pl.BlockSpec((None, S, H), lambda b, e, ap: (b, 0, 0)),
            pl.BlockSpec((None, 1, S), lambda b, e, ap: (b, 0, 0)),
            pl.BlockSpec((1, H), lambda b, e, ap: (0, 0)),
            pl.BlockSpec((1, H), lambda b, e, ap: (0, 0)),
            pl.BlockSpec((None, Din, H), lambda b, e, ap: (e, 0, 0)),
            pl.BlockSpec((None, H, H), lambda b, e, ap: (e, 0, 0)),
            pl.BlockSpec((None, H, 2 * H), lambda b, e, ap: (e, 0, 0)),
            pl.BlockSpec((None, H, H), lambda b, e, ap: (e, 0, 0)),
            pl.BlockSpec((None, H, F), lambda b, e, ap: (e, 0, 0)),
            pl.BlockSpec((None, 1, F), lambda b, e, ap: (e, 0, 0)),
            pl.BlockSpec((None, F, H), lambda b, e, ap: (e, 0, 0)),
            pl.BlockSpec((None, 5, H), lambda b, e, ap: (e, 0, 0)),
        ],
        out_specs=[
            pl.BlockSpec((None, S, H), lambda b, e, ap: (b, 0, 0)),
            pl.BlockSpec((None, S, H), lambda b, e, ap: (b, 0, 0)),
        ],
        scratch_shapes=[pltpu.VMEM((1, H), jnp.float32)],
    )

    so, son = pl.pallas_call(
        kernel,
        grid_spec=grid_spec,
        out_shape=[jax.ShapeDtypeStruct((B, S, H), jnp.float32),
                   jax.ShapeDtypeStruct((B, S, H), jnp.float32)],
        compiler_params=pltpu.CompilerParams(
            dimension_semantics=("parallel", "arbitrary")),
    )(ap, inputs, encoder_outputs, cross_mask_add,
      ln_g.reshape(1, H), ln_b.reshape(1, H),
      ep["w_in"], ep["wq"], ep["wkv"], ep["wo"],
      ep["w1"], ep["b1"].reshape(E, 1, F), ep["w2"], vec)
    return so, son


def enc_stack(sp, x0, self_mask_add, fin_g, fin_b, num_heads):
    L, H, _ = sp["wqkv"].shape
    B, S, _ = x0.shape
    F = sp["conv1_w"].shape[2]
    vec = jnp.stack([sp["lnm_g"], sp["lnm_b"], sp["lnf_g"], sp["lnf_b"],
                     sp["conv2_b"],
                     jnp.broadcast_to(fin_g, (L, H)),
                     jnp.broadcast_to(fin_b, (L, H))], axis=1)           # [L, 7, H]
    scale = float(H // num_heads) ** -0.5
    kernel = partial(_enc_stack_kernel, num_heads=num_heads, scale=scale)

    return pl.pallas_call(
        kernel,
        grid=(B, L),                           # batch parallel, layers carried serially
        in_specs=[
            pl.BlockSpec((None, S, H), lambda b, l: (b, 0, 0)),
            pl.BlockSpec((None, 1, S), lambda b, l: (b, 0, 0)),
            pl.BlockSpec((None, H, 3 * H), lambda b, l: (l, 0, 0)),
            pl.BlockSpec((None, H, H), lambda b, l: (l, 0, 0)),
            pl.BlockSpec((None, 3 * H, F), lambda b, l: (l, 0, 0)),
            pl.BlockSpec((None, 1, F), lambda b, l: (l, 0, 0)),
            pl.BlockSpec((None, 3 * F, H), lambda b, l: (l, 0, 0)),
            pl.BlockSpec((None, 7, H), lambda b, l: (l, 0, 0)),
        ],
        out_specs=pl.BlockSpec((None, S, H), lambda b, l: (b, 0, 0)),
        out_shape=jax.ShapeDtypeStruct((B, S, H), jnp.float32),
        scratch_shapes=[pltpu.VMEM((S, H), jnp.float32)],
        compiler_params=pltpu.CompilerParams(
            dimension_semantics=("parallel", "arbitrary")),
    )(x0, self_mask_add, sp["wqkv"], sp["wo"], sp["conv1_w"],
      sp["conv1_b"].reshape(L, 1, F), sp["conv2_w"], vec)


def moe_encoder_forward(params, inputs, all_mask, encoder_outputs,
                        attention_parameters_stn, attention_mask, num_heads):
    B = inputs.shape[0]
    S = encoder_outputs.shape[1]

    # additive key masks kept at [B,1,S]; broadcast happens in the logits add
    cross_add = jnp.where(all_mask, jnp.float32(NEG_INF),
                          jnp.float32(0.0)).reshape(B, 1, S)
    self_add = jnp.where(attention_mask, jnp.float32(NEG_INF),
                         jnp.float32(0.0)).reshape(B, 1, S)

    # attention_parameters_stn: [B,E,1,1] --squeeze(-1)--> [B,E,1]
    # --transpose(1,2)--> [B,1,E]; the bmm mixing weight for (b, expert e)
    ap = attention_parameters_stn[:, :, 0, 0]                            # [B, E]

    # call 1: all experts + combine + torch LayerNorm
    sum_output, x = experts_and_combine(params["expert"], ap, inputs,
                                        encoder_outputs, cross_add,
                                        params["ln_g"], params["ln_b"], num_heads)

    # call 2: all EncLayers + final LayerNorm
    y = enc_stack(params["enc"], x, self_add, params["ln_g"], params["ln_b"],
                  num_heads)
    return sum_output, y


# ---------------------------------------------------------------------------
# deterministic parameter construction (weights stored as bf16 for the MXU)
# ---------------------------------------------------------------------------
def init_expert_params(key, expert_num, input_dim, hidden, filter_size):
    ks = jax.random.split(key, 6)

    def w(k, shape):
        return (jax.random.normal(k, shape, jnp.float32) * 0.05).astype(jnp.bfloat16)

    E, Din, H, F = expert_num, input_dim, hidden, filter_size
    return {
        "w_in": w(ks[0], (E, Din, H)),
        "wq": w(ks[1], (E, H, H)),
        "wkv": w(ks[2], (E, H, 2 * H)),      # fused Wk | Wv
        "wo": w(ks[3], (E, H, H)),
        "w1": w(ks[4], (E, H, F)),
        "b1": jnp.zeros((E, F), jnp.float32),
        "w2": w(ks[5], (E, F, H)),
        "b2": jnp.zeros((E, H), jnp.float32),
        "ln1_g": jnp.ones((E, H), jnp.float32),
        "ln1_b": jnp.zeros((E, H), jnp.float32),
        "ln2_g": jnp.ones((E, H), jnp.float32),
        "ln2_b": jnp.zeros((E, H), jnp.float32),
    }


def init_enc_stack_params(key, hop, hidden, filter_size):
    ks = jax.random.split(key, 4)

    def w(k, shape):
        return (jax.random.normal(k, shape, jnp.float32) * 0.05).astype(jnp.bfloat16)

    L, H, F = hop, hidden, filter_size
    return {
        "wqkv": w(ks[0], (L, H, 3 * H)),     # fused Wq | Wk | Wv, layer-stacked
        "wo": w(ks[1], (L, H, H)),
        "conv1_w": w(ks[2], (L, 3 * H, F)),  # k=3 conv taps stacked along rows
        "conv1_b": jnp.zeros((L, F), jnp.float32),
        "conv2_w": w(ks[3], (L, 3 * F, H)),
        "conv2_b": jnp.zeros((L, H), jnp.float32),
        "lnm_g": jnp.ones((L, H), jnp.float32),
        "lnm_b": jnp.zeros((L, H), jnp.float32),
        "lnf_g": jnp.ones((L, H), jnp.float32),
        "lnf_b": jnp.zeros((L, H), jnp.float32),
    }


if __name__ == "__main__":
    # small shapes consistent with the module
    B, T, S = 2, 8, 10
    input_dim = 32
    hidden_size = 32
    filter_size = 64
    num_heads = 4
    topk_stn = 3          # config.topk_stn (number of ExpertEncoders)
    hop = 2               # config.hop (number of EncLayers)

    root = jax.random.PRNGKey(0)
    k_exp, k_enc, k_in, k_eo, k_ap = jax.random.split(root, 5)

    params = {
        "expert": init_expert_params(k_exp, topk_stn, input_dim, hidden_size,
                                     filter_size),
        "enc": init_enc_stack_params(k_enc, hop, hidden_size, filter_size),
        # self.layer_norm = torch.nn.LayerNorm(hidden_size)
        "ln_g": jnp.ones((hidden_size,), jnp.float32),
        "ln_b": jnp.zeros((hidden_size,), jnp.float32),
    }

    inputs = jax.random.normal(k_in, (B, T, input_dim), jnp.float32)
    encoder_outputs = jax.random.normal(k_eo, (B, S, hidden_size), jnp.float32)
    # padding masks over the encoder sequence (True = masked key position)
    all_mask = jnp.zeros((B, 1, S), jnp.bool_).at[:, :, -2:].set(True)
    attention_mask = all_mask
    attention_parameters_stn = jax.nn.softmax(
        jax.random.normal(k_ap, (B, topk_stn), jnp.float32), axis=-1
    )[:, :, None, None]                                        # [B, E, 1, 1]

    fwd = jax.jit(partial(moe_encoder_forward, num_heads=num_heads))
    sum_output, y = fwd(params, inputs, all_mask, encoder_outputs,
                        attention_parameters_stn, attention_mask)
    jax.block_until_ready((sum_output, y))
    assert sum_output.shape == (B, S, hidden_size)
    assert y.shape == (B, S, hidden_size)
    print("KERNEL_OK")
</pallas_src>

<mosaic_0001>
module attributes {stable_mosaic.version = 11 : i64} {
  func.func @_experts_combine_kernel(%arg0: i32, %arg1: i32, %arg2: memref<2x3xf32, #tpu.memory_space<smem>>, %arg3: memref<1x8x32xf32, #tpu.memory_space<vmem>>, %arg4: memref<1x10x32xf32, #tpu.memory_space<vmem>>, %arg5: memref<1x1x10xf32, #tpu.memory_space<vmem>>, %arg6: memref<1x32xf32, #tpu.memory_space<vmem>>, %arg7: memref<1x32xf32, #tpu.memory_space<vmem>>, %arg8: memref<1x32x32xbf16, #tpu.memory_space<vmem>>, %arg9: memref<1x32x32xbf16, #tpu.memory_space<vmem>>, %arg10: memref<1x32x64xbf16, #tpu.memory_space<vmem>>, %arg11: memref<1x32x32xbf16, #tpu.memory_space<vmem>>, %arg12: memref<1x32x64xbf16, #tpu.memory_space<vmem>>, %arg13: memref<1x1x64xf32, #tpu.memory_space<vmem>>, %arg14: memref<1x64x32xbf16, #tpu.memory_space<vmem>>, %arg15: memref<1x5x32xf32, #tpu.memory_space<vmem>>, %arg16: memref<1x10x32xf32, #tpu.memory_space<vmem>>, %arg17: memref<1x10x32xf32, #tpu.memory_space<vmem>>, %arg18: memref<1x32xf32, #tpu.memory_space<vmem>>) attributes {dimension_semantics = [#tpu.dimension_semantics<parallel>, #tpu.dimension_semantics<arbitrary>], iteration_bounds = array<i64: 2, 3>, scalar_prefetch = 1 : i64, scratch_operands = 1 : i64, tpu.core_type = #tpu.core_type<tc>, window_params = [{transform_indices = @transform_0, window_bounds = array<i64: 1, 8, 32>}, {transform_indices = @transform_1, window_bounds = array<i64: 1, 10, 32>}, {transform_indices = @transform_2, window_bounds = array<i64: 1, 1, 10>}, {pipeline_mode = #tpu.pipeline_mode<synchronous>, transform_indices = @transform_3, window_bounds = array<i64: 1, 32>}, {pipeline_mode = #tpu.pipeline_mode<synchronous>, transform_indices = @transform_4, window_bounds = array<i64: 1, 32>}, {transform_indices = @transform_5, window_bounds = array<i64: 1, 32, 32>}, {transform_indices = @transform_6, window_bounds = array<i64: 1, 32, 32>}, {transform_indices = @transform_7, window_bounds = array<i64: 1, 32, 64>}, {transform_indices = @transform_8, window_bounds = array<i64: 1, 32, 32>}, {transform_indices = @transform_9, window_bounds = array<i64: 1, 32, 64>}, {transform_indices = @transform_10, window_bounds = array<i64: 1, 1, 64>}, {transform_indices = @transform_11, window_bounds = array<i64: 1, 64, 32>}, {transform_indices = @transform_12, window_bounds = array<i64: 1, 5, 32>}, {transform_indices = @transform_13, window_bounds = array<i64: 1, 10, 32>}, {transform_indices = @transform_14, window_bounds = array<i64: 1, 10, 32>}]} {
    %c0 = arith.constant 0 : index
    %c0_0 = arith.constant 0 : index
    %c0_1 = arith.constant 0 : index
    %0 = vector.load %arg15[%c0, %c0_0, %c0_1] : memref<1x5x32xf32, #tpu.memory_space<vmem>>, vector<1x5x32xf32>
    %1 = vector.shape_cast %0 : vector<1x5x32xf32> to vector<5x32xf32>
    %c0_2 = arith.constant 0 : index
    %c0_3 = arith.constant 0 : index
    %c0_4 = arith.constant 0 : index
    %2 = vector.load %arg4[%c0_2, %c0_3, %c0_4] : memref<1x10x32xf32, #tpu.memory_space<vmem>>, vector<1x10x32xf32>
    %3 = vector.shape_cast %2 : vector<1x10x32xf32> to vector<10x32xf32>
    %c0_5 = arith.constant 0 : index
    %c0_6 = arith.constant 0 : index
    %c0_7 = arith.constant 0 : index
    %4 = vector.load %arg5[%c0_5, %c0_6, %c0_7] : memref<1x1x10xf32, #tpu.memory_space<vmem>>, vector<1x1x10xf32>
    %5 = vector.shape_cast %4 : vector<1x1x10xf32> to vector<1x10xf32>
    %c0_8 = arith.constant 0 : index
    %c0_9 = arith.constant 0 : index
    %c0_10 = arith.constant 0 : index
    %6 = vector.load %arg3[%c0_8, %c0_9, %c0_10] : memref<1x8x32xf32, #tpu.memory_space<vmem>>, vector<1x8x32xf32>
    %7 = vector.shape_cast %6 : vector<1x8x32xf32> to vector<8x32xf32>
    %8 = arith.truncf %7 : vector<8x32xf32> to vector<8x32xbf16>
    %c0_11 = arith.constant 0 : index
    %c0_12 = arith.constant 0 : index
    %c0_13 = arith.constant 0 : index
    %9 = vector.load %arg8[%c0_11, %c0_12, %c0_13] : memref<1x32x32xbf16, #tpu.memory_space<vmem>>, vector<1x32x32xbf16>
    %10 = vector.shape_cast %9 : vector<1x32x32xbf16> to vector<32x32xbf16>
    %cst = arith.constant dense<0.000000e+00> : vector<8x32xf32>
    %11 = tpu.matmul %8, %10, %cst {dimension_numbers = #tpu.dot_dimension_numbers<[1], [0], [0], [1], [0, 0, 1, 1], [], []>} : vector<8x32xbf16>, vector<32x32xbf16>, vector<8x32xf32> -> vector<8x32xf32>
    %12 = vector.extract_strided_slice %1 {offsets = [0, 0], sizes = [1, 32], strides = [1, 1]} : vector<5x32xf32> to vector<1x32xf32>
    %13 = vector.extract_strided_slice %1 {offsets = [1, 0], sizes = [1, 32], strides = [1, 1]} : vector<5x32xf32> to vector<1x32xf32>
    %cst_14 = arith.constant dense<0.000000e+00> : vector<8xf32>
    %14 = vector.multi_reduction <add>, %11, %cst_14 [1] : vector<8x32xf32> to vector<8xf32>
    %15 = vector.shape_cast %14 : vector<8xf32> to vector<8x1xf32>
    %cst_15 = arith.constant 3.200000e+01 : f32
    %16 = vector.broadcast %cst_15 : f32 to vector<8x1xf32>
    %17 = arith.divf %15, %16 : vector<8x1xf32>
    %18 = vector.broadcast %17 : vector<8x1xf32> to vector<8x32xf32>
    %19 = arith.subf %11, %18 : vector<8x32xf32>
    %20 = arith.mulf %19, %19 : vector<8x32xf32>
    %cst_16 = arith.constant dense<0.000000e+00> : vector<8xf32>
    %21 = vector.multi_reduction <add>, %20, %cst_16 [1] : vector<8x32xf32> to vector<8xf32>
    %22 = vector.shape_cast %21 : vector<8xf32> to vector<8x1xf32>
    %cst_17 = arith.constant 0.0322580636 : f32
    %23 = vector.broadcast %cst_17 : f32 to vector<8x1xf32>
    %24 = arith.mulf %22, %23 : vector<8x1xf32>
    %25 = math.sqrt %24 : vector<8x1xf32>
    %cst_18 = arith.constant 9.99999997E-7 : f32
    %26 = vector.broadcast %cst_18 : f32 to vector<8x1xf32>
    %27 = arith.addf %25, %26 : vector<8x1xf32>
    %cst_19 = arith.constant 1.000000e+00 : f32
    %28 = vector.broadcast %cst_19 : f32 to vector<8x1xf32>
    %29 = arith.divf %28, %27 : vector<8x1xf32>
    %30 = vector.broadcast %17 : vector<8x1xf32> to vector<8x32xf32>
    %31 = arith.subf %11, %30 : vector<8x32xf32>
    %32 = vector.broadcast %12 : vector<1x32xf32> to vector<8x32xf32>
    %33 = arith.mulf %32, %31 : vector<8x32xf32>
    %34 = vector.broadcast %29 : vector<8x1xf32> to vector<8x32xf32>
    %35 = arith.mulf %33, %34 : vector<8x32xf32>
    %36 = vector.broadcast %13 : vector<1x32xf32> to vector<8x32xf32>
    %37 = arith.addf %35, %36 : vector<8x32xf32>
    %38 = arith.truncf %37 : vector<8x32xf32> to vector<8x32xbf16>
    %c0_20 = arith.constant 0 : index
    %c0_21 = arith.constant 0 : index
    %c0_22 = arith.constant 0 : index
    %39 = vector.load %arg9[%c0_20, %c0_21, %c0_22] : memref<1x32x32xbf16, #tpu.memory_space<vmem>>, vector<1x32x32xbf16>
    %40 = vector.shape_cast %39 : vector<1x32x32xbf16> to vector<32x32xbf16>
    %cst_23 = arith.constant dense<0.000000e+00> : vector<8x32xf32>
    %41 = tpu.matmul %38, %40, %cst_23 {dimension_numbers = #tpu.dot_dimension_numbers<[1], [0], [0], [1], [0, 0, 1, 1], [], []>} : vector<8x32xbf16>, vector<32x32xbf16>, vector<8x32xf32> -> vector<8x32xf32>
    %42 = arith.truncf %3 : vector<10x32xf32> to vector<10x32xbf16>
    %c0_24 = arith.constant 0 : index
    %c0_25 = arith.constant 0 : index
    %c0_26 = arith.constant 0 : index
    %43 = vector.load %arg10[%c0_24, %c0_25, %c0_26] : memref<1x32x64xbf16, #tpu.memory_space<vmem>>, vector<1x32x64xbf16>
    %44 = vector.shape_cast %43 : vector<1x32x64xbf16> to vector<32x64xbf16>
    %cst_27 = arith.constant dense<0.000000e+00> : vector<10x64xf32>
    %45 = tpu.matmul %42, %44, %cst_27 {dimension_numbers = #tpu.dot_dimension_numbers<[1], [0], [0], [1], [0, 0, 1, 1], [], []>} : vector<10x32xbf16>, vector<32x64xbf16>, vector<10x64xf32> -> vector<10x64xf32>
    %46 = vector.extract_strided_slice %45 {offsets = [0, 0], sizes = [10, 32], strides = [1, 1]} : vector<10x64xf32> to vector<10x32xf32>
    %47 = vector.extract_strided_slice %45 {offsets = [0, 32], sizes = [10, 32], strides = [1, 1]} : vector<10x64xf32> to vector<10x32xf32>
    %c0_28 = arith.constant 0 : index
    %c0_29 = arith.constant 0 : index
    %c0_30 = arith.constant 0 : index
    %48 = vector.load %arg11[%c0_28, %c0_29, %c0_30] : memref<1x32x32xbf16, #tpu.memory_space<vmem>>, vector<1x32x32xbf16>
    %49 = vector.shape_cast %48 : vector<1x32x32xbf16> to vector<32x32xbf16>
    %cst_31 = arith.constant 0.353553385 : f32
    %50 = vector.broadcast %cst_31 : f32 to vector<8x32xf32>
    %51 = arith.mulf %41, %50 : vector<8x32xf32>
    %52 = vector.extract_strided_slice %51 {offsets = [0, 0], sizes = [8, 8], strides = [1, 1]} : vector<8x32xf32> to vector<8x8xf32>
    %53 = arith.truncf %52 : vector<8x8xf32> to vector<8x8xbf16>
    %54 = vector.extract_strided_slice %46 {offsets = [0, 0], sizes = [10, 8], strides = [1, 1]} : vector<10x32xf32> to vector<10x8xf32>
    %55 = arith.truncf %54 : vector<10x8xf32> to vector<10x8xbf16>
    %cst_32 = arith.constant dense<0.000000e+00> : vector<8x10xf32>
    %56 = tpu.matmul %53, %55, %cst_32 {dimension_numbers = #tpu.dot_dimension_numbers<[1], [1], [0], [0], [0, 0, 1, 0], [], []>} : vector<8x8xbf16>, vector<10x8xbf16>, vector<8x10xf32> -> vector<8x10xf32>
    %57 = vector.broadcast %5 : vector<1x10xf32> to vector<8x10xf32>
    %58 = arith.addf %56, %57 : vector<8x10xf32>
    %cst_33 = arith.constant dense<0xFF800000> : vector<8xf32>
    %59 = vector.multi_reduction <maximumf>, %58, %cst_33 [1] : vector<8x10xf32> to vector<8xf32>
    %60 = vector.shape_cast %59 : vector<8xf32> to vector<8x1xf32>
    %61 = vector.broadcast %60 : vector<8x1xf32> to vector<8x10xf32>
    %62 = arith.subf %58, %61 : vector<8x10xf32>
    %63 = math.exp %62 : vector<8x10xf32>
    %cst_34 = arith.constant dense<0.000000e+00> : vector<8xf32>
    %64 = vector.multi_reduction <add>, %63, %cst_34 [1] : vector<8x10xf32> to vector<8xf32>
    %65 = vector.shape_cast %64 : vector<8xf32> to vector<8x1xf32>
    %66 = tpu.reciprocal %65 {approx = true} : vector<8x1xf32> -> vector<8x1xf32>
    %67 = vector.broadcast %66 : vector<8x1xf32> to vector<8x10xf32>
    %68 = arith.mulf %63, %67 : vector<8x10xf32>
    %69 = arith.truncf %68 : vector<8x10xf32> to vector<8x10xbf16>
    %70 = vector.extract_strided_slice %47 {offsets = [0, 0], sizes = [10, 8], strides = [1, 1]} : vector<10x32xf32> to vector<10x8xf32>
    %71 = arith.truncf %70 : vector<10x8xf32> to vector<10x8xbf16>
    %cst_35 = arith.constant dense<0.000000e+00> : vector<8x8xf32>
    %72 = tpu.matmul %69, %71, %cst_35 {dimension_numbers = #tpu.dot_dimension_numbers<[1], [0], [0], [1], [0, 0, 1, 1], [], []>} : vector<8x10xbf16>, vector<10x8xbf16>, vector<8x8xf32> -> vector<8x8xf32>
    %73 = arith.truncf %72 : vector<8x8xf32> to vector<8x8xbf16>
    %74 = vector.extract_strided_slice %49 {offsets = [0, 0], sizes = [8, 32], strides = [1, 1]} : vector<32x32xbf16> to vector<8x32xbf16>
    %cst_36 = arith.constant dense<0.000000e+00> : vector<8x32xf32>
    %75 = tpu.matmul %73, %74, %cst_36 {dimension_numbers = #tpu.dot_dimension_numbers<[1], [0], [0], [1], [0, 0, 1, 1], [], []>} : vector<8x8xbf16>, vector<8x32xbf16>, vector<8x32xf32> -> vector<8x32xf32>
    %76 = vector.extract_strided_slice %51 {offsets = [0, 8], sizes = [8, 8], strides = [1, 1]} : vector<8x32xf32> to vector<8x8xf32>
    %77 = arith.truncf %76 : vector<8x8xf32> to vector<8x8xbf16>
    %78 = vector.extract_strided_slice %46 {offsets = [0, 8], sizes = [10, 8], strides = [1, 1]} : vector<10x32xf32> to vector<10x8xf32>
    %79 = arith.truncf %78 : vector<10x8xf32> to vector<10x8xbf16>
    %cst_37 = arith.constant dense<0.000000e+00> : vector<8x10xf32>
    %80 = tpu.matmul %77, %79, %cst_37 {dimension_numbers = #tpu.dot_dimension_numbers<[1], [1], [0], [0], [0, 0, 1, 0], [], []>} : vector<8x8xbf16>, vector<10x8xbf16>, vector<8x10xf32> -> vector<8x10xf32>
    %81 = vector.broadcast %5 : vector<1x10xf32> to vector<8x10xf32>
    %82 = arith.addf %80, %81 : vector<8x10xf32>
    %cst_38 = arith.constant dense<0xFF800000> : vector<8xf32>
    %83 = vector.multi_reduction <maximumf>, %82, %cst_38 [1] : vector<8x10xf32> to vector<8xf32>
    %84 = vector.shape_cast %83 : vector<8xf32> to vector<8x1xf32>
    %85 = vector.broadcast %84 : vector<8x1xf32> to vector<8x10xf32>
    %86 = arith.subf %82, %85 : vector<8x10xf32>
    %87 = math.exp %86 : vector<8x10xf32>
    %cst_39 = arith.constant dense<0.000000e+00> : vector<8xf32>
    %88 = vector.multi_reduction <add>, %87, %cst_39 [1] : vector<8x10xf32> to vector<8xf32>
    %89 = vector.shape_cast %88 : vector<8xf32> to vector<8x1xf32>
    %90 = tpu.reciprocal %89 {approx = true} : vector<8x1xf32> -> vector<8x1xf32>
    %91 = vector.broadcast %90 : vector<8x1xf32> to vector<8x10xf32>
    %92 = arith.mulf %87, %91 : vector<8x10xf32>
    %93 = arith.truncf %92 : vector<8x10xf32> to vector<8x10xbf16>
    %94 = vector.extract_strided_slice %47 {offsets = [0, 8], sizes = [10, 8], strides = [1, 1]} : vector<10x32xf32> to vector<10x8xf32>
    %95 = arith.truncf %94 : vector<10x8xf32> to vector<10x8xbf16>
    %cst_40 = arith.constant dense<0.000000e+00> : vector<8x8xf32>
    %96 = tpu.matmul %93, %95, %cst_40 {dimension_numbers = #tpu.dot_dimension_numbers<[1], [0], [0], [1], [0, 0, 1, 1], [], []>} : vector<8x10xbf16>, vector<10x8xbf16>, vector<8x8xf32> -> vector<8x8xf32>
    %97 = arith.truncf %96 : vector<8x8xf32> to vector<8x8xbf16>
    %98 = vector.extract_strided_slice %49 {offsets = [8, 0], sizes = [8, 32], strides = [1, 1]} : vector<32x32xbf16> to vector<8x32xbf16>
    %cst_41 = arith.constant dense<0.000000e+00> : vector<8x32xf32>
    %99 = tpu.matmul %97, %98, %cst_41 {dimension_numbers = #tpu.dot_dimension_numbers<[1], [0], [0], [1], [0, 0, 1, 1], [], []>} : vector<8x8xbf16>, vector<8x32xbf16>, vector<8x32xf32> -> vector<8x32xf32>
    %100 = arith.addf %75, %99 : vector<8x32xf32>
    %101 = vector.extract_strided_slice %51 {offsets = [0, 16], sizes = [8, 8], strides = [1, 1]} : vector<8x32xf32> to vector<8x8xf32>
    %102 = arith.truncf %101 : vector<8x8xf32> to vector<8x8xbf16>
    %103 = vector.extract_strided_slice %46 {offsets = [0, 16], sizes = [10, 8], strides = [1, 1]} : vector<10x32xf32> to vector<10x8xf32>
    %104 = arith.truncf %103 : vector<10x8xf32> to vector<10x8xbf16>
    %cst_42 = arith.constant dense<0.000000e+00> : vector<8x10xf32>
    %105 = tpu.matmul %102, %104, %cst_42 {dimension_numbers = #tpu.dot_dimension_numbers<[1], [1], [0], [0], [0, 0, 1, 0], [], []>} : vector<8x8xbf16>, vector<10x8xbf16>, vector<8x10xf32> -> vector<8x10xf32>
    %106 = vector.broadcast %5 : vector<1x10xf32> to vector<8x10xf32>
    %107 = arith.addf %105, %106 : vector<8x10xf32>
    %cst_43 = arith.constant dense<0xFF800000> : vector<8xf32>
    %108 = vector.multi_reduction <maximumf>, %107, %cst_43 [1] : vector<8x10xf32> to vector<8xf32>
    %109 = vector.shape_cast %108 : vector<8xf32> to vector<8x1xf32>
    %110 = vector.broadcast %109 : vector<8x1xf32> to vector<8x10xf32>
    %111 = arith.subf %107, %110 : vector<8x10xf32>
    %112 = math.exp %111 : vector<8x10xf32>
    %cst_44 = arith.constant dense<0.000000e+00> : vector<8xf32>
    %113 = vector.multi_reduction <add>, %112, %cst_44 [1] : vector<8x10xf32> to vector<8xf32>
    %114 = vector.shape_cast %113 : vector<8xf32> to vector<8x1xf32>
    %115 = tpu.reciprocal %114 {approx = true} : vector<8x1xf32> -> vector<8x1xf32>
    %116 = vector.broadcast %115 : vector<8x1xf32> to vector<8x10xf32>
    %117 = arith.mulf %112, %116 : vector<8x10xf32>
    %118 = arith.truncf %117 : vector<8x10xf32> to vector<8x10xbf16>
    %119 = vector.extract_strided_slice %47 {offsets = [0, 16], sizes = [10, 8], strides = [1, 1]} : vector<10x32xf32> to vector<10x8xf32>
    %120 = arith.truncf %119 : vector<10x8xf32> to vector<10x8xbf16>
    %cst_45 = arith.constant dense<0.000000e+00> : vector<8x8xf32>
    %121 = tpu.matmul %118, %120, %cst_45 {dimension_numbers = #tpu.dot_dimension_numbers<[1], [0], [0], [1], [0, 0, 1, 1], [], []>} : vector<8x10xbf16>, vector<10x8xbf16>, vector<8x8xf32> -> vector<8x8xf32>
    %122 = arith.truncf %121 : vector<8x8xf32> to vector<8x8xbf16>
    %123 = vector.extract_strided_slice %49 {offsets = [16, 0], sizes = [8, 32], strides = [1, 1]} : vector<32x32xbf16> to vector<8x32xbf16>
    %cst_46 = arith.constant dense<0.000000e+00> : vector<8x32xf32>
    %124 = tpu.matmul %122, %123, %cst_46 {dimension_numbers = #tpu.dot_dimension_numbers<[1], [0], [0], [1], [0, 0, 1, 1], [], []>} : vector<8x8xbf16>, vector<8x32xbf16>, vector<8x32xf32> -> vector<8x32xf32>
    %125 = arith.addf %100, %124 : vector<8x32xf32>
    %126 = vector.extract_strided_slice %51 {offsets = [0, 24], sizes = [8, 8], strides = [1, 1]} : vector<8x32xf32> to vector<8x8xf32>
    %127 = arith.truncf %126 : vector<8x8xf32> to vector<8x8xbf16>
    %128 = vector.extract_strided_slice %46 {offsets = [0, 24], sizes = [10, 8], strides = [1, 1]} : vector<10x32xf32> to vector<10x8xf32>
    %129 = arith.truncf %128 : vector<10x8xf32> to vector<10x8xbf16>
    %cst_47 = arith.constant dense<0.000000e+00> : vector<8x10xf32>
    %130 = tpu.matmul %127, %129, %cst_47 {dimension_numbers = #tpu.dot_dimension_numbers<[1], [1], [0], [0], [0, 0, 1, 0], [], []>} : vector<8x8xbf16>, vector<10x8xbf16>, vector<8x10xf32> -> vector<8x10xf32>
    %131 = vector.broadcast %5 : vector<1x10xf32> to vector<8x10xf32>
    %132 = arith.addf %130, %131 : vector<8x10xf32>
    %cst_48 = arith.constant dense<0xFF800000> : vector<8xf32>
    %133 = vector.multi_reduction <maximumf>, %132, %cst_48 [1] : vector<8x10xf32> to vector<8xf32>
    %134 = vector.shape_cast %133 : vector<8xf32> to vector<8x1xf32>
    %135 = vector.broadcast %134 : vector<8x1xf32> to vector<8x10xf32>
    %136 = arith.subf %132, %135 : vector<8x10xf32>
    %137 = math.exp %136 : vector<8x10xf32>
    %cst_49 = arith.constant dense<0.000000e+00> : vector<8xf32>
    %138 = vector.multi_reduction <add>, %137, %cst_49 [1] : vector<8x10xf32> to vector<8xf32>
    %139 = vector.shape_cast %138 : vector<8xf32> to vector<8x1xf32>
    %140 = tpu.reciprocal %139 {approx = true} : vector<8x1xf32> -> vector<8x1xf32>
    %141 = vector.broadcast %140 : vector<8x1xf32> to vector<8x10xf32>
    %142 = arith.mulf %137, %141 : vector<8x10xf32>
    %143 = arith.truncf %142 : vector<8x10xf32> to vector<8x10xbf16>
    %144 = vector.extract_strided_slice %47 {offsets = [0, 24], sizes = [10, 8], strides = [1, 1]} : vector<10x32xf32> to vector<10x8xf32>
    %145 = arith.truncf %144 : vector<10x8xf32> to vector<10x8xbf16>
    %cst_50 = arith.constant dense<0.000000e+00> : vector<8x8xf32>
    %146 = tpu.matmul %143, %145, %cst_50 {dimension_numbers = #tpu.dot_dimension_numbers<[1], [0], [0], [1], [0, 0, 1, 1], [], []>} : vector<8x10xbf16>, vector<10x8xbf16>, vector<8x8xf32> -> vector<8x8xf32>
    %147 = arith.truncf %146 : vector<8x8xf32> to vector<8x8xbf16>
    %148 = vector.extract_strided_slice %49 {offsets = [24, 0], sizes = [8, 32], strides = [1, 1]} : vector<32x32xbf16> to vector<8x32xbf16>
    %cst_51 = arith.constant dense<0.000000e+00> : vector<8x32xf32>
    %149 = tpu.matmul %147, %148, %cst_51 {dimension_numbers = #tpu.dot_dimension_numbers<[1], [0], [0], [1], [0, 0, 1, 1], [], []>} : vector<8x8xbf16>, vector<8x32xbf16>, vector<8x32xf32> -> vector<8x32xf32>
    %150 = arith.addf %125, %149 : vector<8x32xf32>
    %151 = arith.addf %11, %150 : vector<8x32xf32>
    %152 = vector.extract_strided_slice %1 {offsets = [2, 0], sizes = [1, 32], strides = [1, 1]} : vector<5x32xf32> to vector<1x32xf32>
    %153 = vector.extract_strided_slice %1 {offsets = [3, 0], sizes = [1, 32], strides = [1, 1]} : vector<5x32xf32> to vector<1x32xf32>
    %cst_52 = arith.constant dense<0.000000e+00> : vector<8xf32>
    %154 = vector.multi_reduction <add>, %151, %cst_52 [1] : vector<8x32xf32> to vector<8xf32>
    %155 = vector.shape_cast %154 : vector<8xf32> to vector<8x1xf32>
    %cst_53 = arith.constant 3.200000e+01 : f32
    %156 = vector.broadcast %cst_53 : f32 to vector<8x1xf32>
    %157 = arith.divf %155, %156 : vector<8x1xf32>
    %158 = vector.broadcast %157 : vector<8x1xf32> to vector<8x32xf32>
    %159 = arith.subf %151, %158 : vector<8x32xf32>
    %160 = arith.mulf %159, %159 : vector<8x32xf32>
    %cst_54 = arith.constant dense<0.000000e+00> : vector<8xf32>
    %161 = vector.multi_reduction <add>, %160, %cst_54 [1] : vector<8x32xf32> to vector<8xf32>
    %162 = vector.shape_cast %161 : vector<8xf32> to vector<8x1xf32>
    %cst_55 = arith.constant 0.0322580636 : f32
    %163 = vector.broadcast %cst_55 : f32 to vector<8x1xf32>
    %164 = arith.mulf %162, %163 : vector<8x1xf32>
    %165 = math.sqrt %164 : vector<8x1xf32>
    %cst_56 = arith.constant 9.99999997E-7 : f32
    %166 = vector.broadcast %cst_56 : f32 to vector<8x1xf32>
    %167 = arith.addf %165, %166 : vector<8x1xf32>
    %cst_57 = arith.constant 1.000000e+00 : f32
    %168 = vector.broadcast %cst_57 : f32 to vector<8x1xf32>
    %169 = arith.divf %168, %167 : vector<8x1xf32>
    %170 = vector.broadcast %157 : vector<8x1xf32> to vector<8x32xf32>
    %171 = arith.subf %151, %170 : vector<8x32xf32>
    %172 = vector.broadcast %152 : vector<1x32xf32> to vector<8x32xf32>
    %173 = arith.mulf %172, %171 : vector<8x32xf32>
    %174 = vector.broadcast %169 : vector<8x1xf32> to vector<8x32xf32>
    %175 = arith.mulf %173, %174 : vector<8x32xf32>
    %176 = vector.broadcast %153 : vector<1x32xf32> to vector<8x32xf32>
    %177 = arith.addf %175, %176 : vector<8x32xf32>
    %178 = arith.truncf %177 : vector<8x32xf32> to vector<8x32xbf16>
    %c0_58 = arith.constant 0 : index
    %c0_59 = arith.constant 0 : index
    %c0_60 = arith.constant 0 : index
    %179 = vector.load %arg12[%c0_58, %c0_59, %c0_60] : memref<1x32x64xbf16, #tpu.memory_space<vmem>>, vector<1x32x64xbf16>
    %180 = vector.shape_cast %179 : vector<1x32x64xbf16> to vector<32x64xbf16>
    %cst_61 = arith.constant dense<0.000000e+00> : vector<8x64xf32>
    %181 = tpu.matmul %178, %180, %cst_61 {dimension_numbers = #tpu.dot_dimension_numbers<[1], [0], [0], [1], [0, 0, 1, 1], [], []>} : vector<8x32xbf16>, vector<32x64xbf16>, vector<8x64xf32> -> vector<8x64xf32>
    %c0_62 = arith.constant 0 : index
    %c0_63 = arith.constant 0 : index
    %c0_64 = arith.constant 0 : index
    %182 = vector.load %arg13[%c0_62, %c0_63, %c0_64] : memref<1x1x64xf32, #tpu.memory_space<vmem>>, vector<1x1x64xf32>
    %183 = vector.shape_cast %182 : vector<1x1x64xf32> to vector<1x64xf32>
    %184 = vector.broadcast %183 : vector<1x64xf32> to vector<8x64xf32>
    %185 = arith.addf %181, %184 : vector<8x64xf32>
    %cst_65 = arith.constant 0.000000e+00 : f32
    %186 = vector.broadcast %cst_65 : f32 to vector<8x64xf32>
    %187 = arith.maximumf %185, %186 : vector<8x64xf32>
    %188 = arith.truncf %187 : vector<8x64xf32> to vector<8x64xbf16>
    %c0_66 = arith.constant 0 : index
    %c0_67 = arith.constant 0 : index
    %c0_68 = arith.constant 0 : index
    %189 = vector.load %arg14[%c0_66, %c0_67, %c0_68] : memref<1x64x32xbf16, #tpu.memory_space<vmem>>, vector<1x64x32xbf16>
    %190 = vector.shape_cast %189 : vector<1x64x32xbf16> to vector<64x32xbf16>
    %cst_69 = arith.constant dense<0.000000e+00> : vector<8x32xf32>
    %191 = tpu.matmul %188, %190, %cst_69 {dimension_numbers = #tpu.dot_dimension_numbers<[1], [0], [0], [1], [0, 0, 1, 1], [], []>} : vector<8x64xbf16>, vector<64x32xbf16>, vector<8x32xf32> -> vector<8x32xf32>
    %192 = arith.addf %151, %191 : vector<8x32xf32>
    %193 = vector.extract_strided_slice %1 {offsets = [4, 0], sizes = [1, 32], strides = [1, 1]} : vector<5x32xf32> to vector<1x32xf32>
    %194 = vector.broadcast %193 : vector<1x32xf32> to vector<8x32xf32>
    %195 = arith.addf %192, %194 : vector<8x32xf32>
    %cst_70 = arith.constant dense<0.000000e+00> : vector<32xf32>
    %196 = vector.multi_reduction <add>, %195, %cst_70 [0] : vector<8x32xf32> to vector<32xf32>
    %197 = vector.shape_cast %196 : vector<32xf32> to vector<1x32xf32>
    %cst_71 = arith.constant 8.000000e+00 : f32
    %198 = vector.broadcast %cst_71 : f32 to vector<1x32xf32>
    %199 = arith.divf %197, %198 : vector<1x32xf32>
    %c0_i32 = arith.constant 0 : i32
    %200 = arith.cmpi eq, %arg1, %c0_i32 : i32
    %201 = arith.extui %200 : i1 to i32
    %c0_i32_72 = arith.constant 0 : i32
    %202 = arith.cmpi ne, %201, %c0_i32_72 : i32
    scf.if %202 {
      %cst_78 = arith.constant 0.000000e+00 : f32
      %214 = vector.broadcast %cst_78 : f32 to vector<1x32xf32>
      %c0_79 = arith.constant 0 : index
      %c0_80 = arith.constant 0 : index
      %215 = vector.load %arg18[%c0_79, %c0_80] : memref<1x32xf32, #tpu.memory_space<vmem>>, vector<1x32xf32>
      tpu.vector_store %arg18[%c0_79, %c0_80], %214 {strides = array<i32>} : memref<1x32xf32, #tpu.memory_space<vmem>>, vector<1x32xf32>,
    } else {
    }
    %c0_73 = arith.constant 0 : index
    %c0_74 = arith.constant 0 : index
    %203 = vector.load %arg18[%c0_73, %c0_74] : memref<1x32xf32, #tpu.memory_space<vmem>>, vector<1x32xf32>
    %204 = arith.index_cast %arg0 : i32 to index
    %205 = arith.index_cast %arg1 : i32 to index
    %206 = memref.load %arg2[%204, %205] : memref<2x3xf32, #tpu.memory_space<smem>>
    %207 = vector.broadcast %206 : f32 to vector<1x32xf32>
    %208 = arith.mulf %207, %199 : vector<1x32xf32>
    %209 = arith.addf %203, %208 : vector<1x32xf32>
    %c0_75 = arith.constant 0 : index
    %c0_76 = arith.constant 0 : index
    %210 = vector.load %arg18[%c0_75, %c0_76] : memref<1x32xf32, #tpu.memory_space<vmem>>, vector<1x32xf32>
    tpu.vector_store %arg18[%c0_75, %c0_76], %209 {strides = array<i32>} : memref<1x32xf32, #tpu.memory_space<vmem>>, vector<1x32xf32>,
    %c2_i32 = arith.constant 2 : i32
    %211 = arith.cmpi eq, %arg1, %c2_i32 : i32
    %212 = arith.extui %211 : i1 to i32
    %c0_i32_77 = arith.constant 0 : i32
    %213 = arith.cmpi ne, %212, %c0_i32_77 : i32
    scf.if %213 {
      %c0_78 = arith.constant 0 : index
      %c0_79 = arith.constant 0 : index
      %214 = vector.load %arg18[%c0_78, %c0_79] : memref<1x32xf32, #tpu.memory_space<vmem>>, vector<1x32xf32>
      %215 = vector.broadcast %214 : vector<1x32xf32> to vector<10x32xf32>
      %216 = arith.addf %3, %215 : vector<10x32xf32>
      %c0_80 = arith.constant 0 : index
      %c0_81 = arith.constant 0 : index
      %c0_82 = arith.constant 0 : index
      %217 = vector.load %arg16[%c0_80, %c0_81, %c0_82] : memref<1x10x32xf32, #tpu.memory_space<vmem>>, vector<1x10x32xf32>
      %218 = vector.shape_cast %217 : vector<1x10x32xf32> to vector<10x32xf32>
      %219 = vector.shape_cast %216 : vector<10x32xf32> to vector<1x10x32xf32>
      tpu.vector_store %arg16[%c0_80, %c0_81, %c0_82], %219 {strides = array<i32>} : memref<1x10x32xf32, #tpu.memory_space<vmem>>, vector<1x10x32xf32>,
      %c0_83 = arith.constant 0 : index
      %c0_84 = arith.constant 0 : index
      %220 = vector.load %arg6[%c0_83, %c0_84] : memref<1x32xf32, #tpu.memory_space<vmem>>, vector<1x32xf32>
      %c0_85 = arith.constant 0 : index
      %c0_86 = arith.constant 0 : index
      %221 = vector.load %arg7[%c0_85, %c0_86] : memref<1x32xf32, #tpu.memory_space<vmem>>, vector<1x32xf32>
      %cst_87 = arith.constant dense<0.000000e+00> : vector<10xf32>
      %222 = vector.multi_reduction <add>, %216, %cst_87 [1] : vector<10x32xf32> to vector<10xf32>
      %223 = vector.shape_cast %222 : vector<10xf32> to vector<10x1xf32>
      %cst_88 = arith.constant 3.200000e+01 : f32
      %224 = vector.broadcast %cst_88 : f32 to vector<10x1xf32>
      %225 = arith.divf %223, %224 : vector<10x1xf32>
      %226 = vector.broadcast %225 : vector<10x1xf32> to vector<10x32xf32>
      %227 = arith.subf %216, %226 : vector<10x32xf32>
      %228 = arith.mulf %227, %227 : vector<10x32xf32>
      %cst_89 = arith.constant dense<0.000000e+00> : vector<10xf32>
      %229 = vector.multi_reduction <add>, %228, %cst_89 [1] : vector<10x32xf32> to vector<10xf32>
      %230 = vector.shape_cast %229 : vector<10xf32> to vector<10x1xf32>
      %cst_90 = arith.constant 3.200000e+01 : f32
      %231 = vector.broadcast %cst_90 : f32 to vector<10x1xf32>
      %232 = arith.divf %230, %231 : vector<10x1xf32>
      %233 = vector.broadcast %225 : vector<10x1xf32> to vector<10x32xf32>
      %234 = arith.subf %216, %233 : vector<10x32xf32>
      %cst_91 = arith.constant 9.99999974E-6 : f32
      %235 = vector.broadcast %cst_91 : f32 to vector<10x1xf32>
      %236 = arith.addf %232, %235 : vector<10x1xf32>
      %237 = math.rsqrt %236 : vector<10x1xf32>
      %238 = vector.broadcast %237 : vector<10x1xf32> to vector<10x32xf32>
      %239 = arith.mulf %234, %238 : vector<10x32xf32>
      %240 = vector.broadcast %220 : vector<1x32xf32> to vector<10x32xf32>
      %241 = arith.mulf %239, %240 : vector<10x32xf32>
      %242 = vector.broadcast %221 : vector<1x32xf32> to vector<10x32xf32>
      %243 = arith.addf %241, %242 : vector<10x32xf32>
      %c0_92 = arith.constant 0 : index
      %c0_93 = arith.constant 0 : index
      %c0_94 = arith.constant 0 : index
      %244 = vector.load %arg17[%c0_92, %c0_93, %c0_94] : memref<1x10x32xf32, #tpu.memory_space<vmem>>, vector<1x10x32xf32>
      %245 = vector.shape_cast %244 : vector<1x10x32xf32> to vector<10x32xf32>
      %246 = vector.shape_cast %243 : vector<10x32xf32> to vector<1x10x32xf32>
      tpu.vector_store %arg17[%c0_92, %c0_93, %c0_94], %246 {strides = array<i32>} : memref<1x10x32xf32, #tpu.memory_space<vmem>>, vector<1x10x32xf32>,
    } else {
    }
    return
  }
  func.func @transform_0(%arg0: i32, %arg1: i32, %arg2: memref<2x3xf32, #tpu.memory_space<smem>>) -> (i32, i32, i32) {
    %c0_i32 = arith.constant 0 : i32
    %c0_i32_0 = arith.constant 0 : i32
    %c0_i32_1 = arith.constant 0 : i32
    return %arg0, %c0_i32, %c0_i32_0 : i32, i32, i32
  }
  func.func @transform_1(%arg0: i32, %arg1: i32, %arg2: memref<2x3xf32, #tpu.memory_space<smem>>) -> (i32, i32, i32) {
    %c0_i32 = arith.constant 0 : i32
    %c0_i32_0 = arith.constant 0 : i32
    %c0_i32_1 = arith.constant 0 : i32
    return %arg0, %c0_i32, %c0_i32_0 : i32, i32, i32
  }
  func.func @transform_2(%arg0: i32, %arg1: i32, %arg2: memref<2x3xf32, #tpu.memory_space<smem>>) -> (i32, i32, i32) {
    %c0_i32 = arith.constant 0 : i32
    %c0_i32_0 = arith.constant 0 : i32
    %c0_i32_1 = arith.constant 0 : i32
    return %arg0, %c0_i32, %c0_i32_0 : i32, i32, i32
  }
  func.func @transform_3(%arg0: i32, %arg1: i32, %arg2: memref<2x3xf32, #tpu.memory_space<smem>>) -> (i32, i32) {
    %c0_i32 = arith.constant 0 : i32
    %c0_i32_0 = arith.constant 0 : i32
    %c0_i32_1 = arith.constant 0 : i32
    return %c0_i32, %c0_i32_0 : i32, i32
  }
  func.func @transform_4(%arg0: i32, %arg1: i32, %arg2: memref<2x3xf32, #tpu.memory_space<smem>>) -> (i32, i32) {
    %c0_i32 = arith.constant 0 : i32
    %c0_i32_0 = arith.constant 0 : i32
    %c0_i32_1 = arith.constant 0 : i32
    return %c0_i32, %c0_i32_0 : i32, i32
  }
  func.func @transform_5(%arg0: i32, %arg1: i32, %arg2: memref<2x3xf32, #tpu.memory_space<smem>>) -> (i32, i32, i32) {
    %c0_i32 = arith.constant 0 : i32
    %c0_i32_0 = arith.constant 0 : i32
    %c0_i32_1 = arith.constant 0 : i32
    return %arg1, %c0_i32, %c0_i32_0 : i32, i32, i32
  }
  func.func @transform_6(%arg0: i32, %arg1: i32, %arg2: memref<2x3xf32, #tpu.memory_space<smem>>) -> (i32, i32, i32) {
    %c0_i32 = arith.constant 0 : i32
    %c0_i32_0 = arith.constant 0 : i32
    %c0_i32_1 = arith.constant 0 : i32
    return %arg1, %c0_i32, %c0_i32_0 : i32, i32, i32
  }
  func.func @transform_7(%arg0: i32, %arg1: i32, %arg2: memref<2x3xf32, #tpu.memory_space<smem>>) -> (i32, i32, i32) {
    %c0_i32 = arith.constant 0 : i32
    %c0_i32_0 = arith.constant 0 : i32
    %c0_i32_1 = arith.constant 0 : i32
    return %arg1, %c0_i32, %c0_i32_0 : i32, i32, i32
  }
  func.func @transform_8(%arg0: i32, %arg1: i32, %arg2: memref<2x3xf32, #tpu.memory_space<smem>>) -> (i32, i32, i32) {
    %c0_i32 = arith.constant 0 : i32
    %c0_i32_0 = arith.constant 0 : i32
    %c0_i32_1 = arith.constant 0 : i32
    return %arg1, %c0_i32, %c0_i32_0 : i32, i32, i32
  }
  func.func @transform_9(%arg0: i32, %arg1: i32, %arg2: memref<2x3xf32, #tpu.memory_space<smem>>) -> (i32, i32, i32) {
    %c0_i32 = arith.constant 0 : i32
    %c0_i32_0 = arith.constant 0 : i32
    %c0_i32_1 = arith.constant 0 : i32
    return %arg1, %c0_i32, %c0_i32_0 : i32, i32, i32
  }
  func.func @transform_10(%arg0: i32, %arg1: i32, %arg2: memref<2x3xf32, #tpu.memory_space<smem>>) -> (i32, i32, i32) {
    %c0_i32 = arith.constant 0 : i32
    %c0_i32_0 = arith.constant 0 : i32
    %c0_i32_1 = arith.constant 0 : i32
    return %arg1, %c0_i32, %c0_i32_0 : i32, i32, i32
  }
  func.func @transform_11(%arg0: i32, %arg1: i32, %arg2: memref<2x3xf32, #tpu.memory_space<smem>>) -> (i32, i32, i32) {
    %c0_i32 = arith.constant 0 : i32
    %c0_i32_0 = arith.constant 0 : i32
    %c0_i32_1 = arith.constant 0 : i32
    return %arg1, %c0_i32, %c0_i32_0 : i32, i32, i32
  }
  func.func @transform_12(%arg0: i32, %arg1: i32, %arg2: memref<2x3xf32, #tpu.memory_space<smem>>) -> (i32, i32, i32) {
    %c0_i32 = arith.constant 0 : i32
    %c0_i32_0 = arith.constant 0 : i32
    %c0_i32_1 = arith.constant 0 : i32
    return %arg1, %c0_i32, %c0_i32_0 : i32, i32, i32
  }
  func.func @transform_13(%arg0: i32, %arg1: i32, %arg2: memref<2x3xf32, #tpu.memory_space<smem>>) -> (i32, i32, i32) {
    %c0_i32 = arith.constant 0 : i32
    %c0_i32_0 = arith.constant 0 : i32
    %c0_i32_1 = arith.constant 0 : i32
    return %arg0, %c0_i32, %c0_i32_0 : i32, i32, i32
  }
  func.func @transform_14(%arg0: i32, %arg1: i32, %arg2: memref<2x3xf32, #tpu.memory_space<smem>>) -> (i32, i32, i32) {
    %c0_i32 = arith.constant 0 : i32
    %c0_i32_0 = arith.constant 0 : i32
    %c0_i32_1 = arith.constant 0 : i32
    return %arg0, %c0_i32, %c0_i32_0 : i32, i32, i32
  }
}

module attributes {stable_mosaic.version = 11 : i64} {
  func.func @_enc_stack_kernel(%arg0: i32, %arg1: i32, %arg2: memref<1x10x32xf32, #tpu.memory_space<vmem>>, %arg3: memref<1x1x10xf32, #tpu.memory_space<vmem>>, %arg4: memref<1x32x96xbf16, #tpu.memory_space<vmem>>, %arg5: memref<1x32x32xbf16, #tpu.memory_space<vmem>>, %arg6: memref<1x96x64xbf16, #tpu.memory_space<vmem>>, %arg7: memref<1x1x64xf32, #tpu.memory_space<vmem>>, %arg8: memref<1x192x32xbf16, #tpu.memory_space<vmem>>, %arg9: memref<1x7x32xf32, #tpu.memory_space<vmem>>, %arg10: memref<1x10x32xf32, #tpu.memory_space<vmem>>, %arg11: memref<10x32xf32, #tpu.memory_space<vmem>>) attributes {dimension_semantics = [#tpu.dimension_semantics<parallel>, #tpu.dimension_semantics<arbitrary>], iteration_bounds = array<i64: 2, 2>, scalar_prefetch = 0 : i64, scratch_operands = 1 : i64, tpu.core_type = #tpu.core_type<tc>, window_params = [{transform_indices = @transform_0, window_bounds = array<i64: 1, 10, 32>}, {transform_indices = @transform_1, window_bounds = array<i64: 1, 1, 10>}, {transform_indices = @transform_2, window_bounds = array<i64: 1, 32, 96>}, {transform_indices = @transform_3, window_bounds = array<i64: 1, 32, 32>}, {transform_indices = @transform_4, window_bounds = array<i64: 1, 96, 64>}, {transform_indices = @transform_5, window_bounds = array<i64: 1, 1, 64>}, {transform_indices = @transform_6, window_bounds = array<i64: 1, 192, 32>}, {transform_indices = @transform_7, window_bounds = array<i64: 1, 7, 32>}, {transform_indices = @transform_8, window_bounds = array<i64: 1, 10, 32>}]} {
    %c0 = arith.constant 0 : index
    %c0_0 = arith.constant 0 : index
    %c0_1 = arith.constant 0 : index
    %0 = vector.load %arg9[%c0, %c0_0, %c0_1] : memref<1x7x32xf32, #tpu.memory_space<vmem>>, vector<1x7x32xf32>
    %1 = vector.shape_cast %0 : vector<1x7x32xf32> to vector<7x32xf32>
    %c0_2 = arith.constant 0 : index
    %c0_3 = arith.constant 0 : index
    %c0_4 = arith.constant 0 : index
    %2 = vector.load %arg3[%c0_2, %c0_3, %c0_4] : memref<1x1x10xf32, #tpu.memory_space<vmem>>, vector<1x1x10xf32>
    %3 = vector.shape_cast %2 : vector<1x1x10xf32> to vector<1x10xf32>
    %c0_i32 = arith.constant 0 : i32
    %4 = arith.cmpi eq, %arg1, %c0_i32 : i32
    %5 = arith.extui %4 : i1 to i32
    %c0_i32_5 = arith.constant 0 : i32
    %6 = arith.cmpi ne, %5, %c0_i32_5 : i32
    scf.if %6 {
      %c0_70 = arith.constant 0 : index
      %c0_71 = arith.constant 0 : index
      %c0_72 = arith.constant 0 : index
      %223 = vector.load %arg2[%c0_70, %c0_71, %c0_72] : memref<1x10x32xf32, #tpu.memory_space<vmem>>, vector<1x10x32xf32>
      %224 = vector.shape_cast %223 : vector<1x10x32xf32> to vector<10x32xf32>
      %c0_73 = arith.constant 0 : index
      %c0_74 = arith.constant 0 : index
      %225 = vector.load %arg11[%c0_73, %c0_74] : memref<10x32xf32, #tpu.memory_space<vmem>>, vector<10x32xf32>
      tpu.vector_store %arg11[%c0_73, %c0_74], %224 {strides = array<i32>} : memref<10x32xf32, #tpu.memory_space<vmem>>, vector<10x32xf32>,
    } else {
    }
    %c0_6 = arith.constant 0 : index
    %c0_7 = arith.constant 0 : index
    %7 = vector.load %arg11[%c0_6, %c0_7] : memref<10x32xf32, #tpu.memory_space<vmem>>, vector<10x32xf32>
    %8 = vector.extract_strided_slice %1 {offsets = [0, 0], sizes = [1, 32], strides = [1, 1]} : vector<7x32xf32> to vector<1x32xf32>
    %9 = vector.extract_strided_slice %1 {offsets = [1, 0], sizes = [1, 32], strides = [1, 1]} : vector<7x32xf32> to vector<1x32xf32>
    %cst = arith.constant dense<0.000000e+00> : vector<10xf32>
    %10 = vector.multi_reduction <add>, %7, %cst [1] : vector<10x32xf32> to vector<10xf32>
    %11 = vector.shape_cast %10 : vector<10xf32> to vector<10x1xf32>
    %cst_8 = arith.constant 3.200000e+01 : f32
    %12 = vector.broadcast %cst_8 : f32 to vector<10x1xf32>
    %13 = arith.divf %11, %12 : vector<10x1xf32>
    %14 = vector.broadcast %13 : vector<10x1xf32> to vector<10x32xf32>
    %15 = arith.subf %7, %14 : vector<10x32xf32>
    %16 = arith.mulf %15, %15 : vector<10x32xf32>
    %cst_9 = arith.constant dense<0.000000e+00> : vector<10xf32>
    %17 = vector.multi_reduction <add>, %16, %cst_9 [1] : vector<10x32xf32> to vector<10xf32>
    %18 = vector.shape_cast %17 : vector<10xf32> to vector<10x1xf32>
    %cst_10 = arith.constant 0.0322580636 : f32
    %19 = vector.broadcast %cst_10 : f32 to vector<10x1xf32>
    %20 = arith.mulf %18, %19 : vector<10x1xf32>
    %21 = math.sqrt %20 : vector<10x1xf32>
    %cst_11 = arith.constant 9.99999997E-7 : f32
    %22 = vector.broadcast %cst_11 : f32 to vector<10x1xf32>
    %23 = arith.addf %21, %22 : vector<10x1xf32>
    %cst_12 = arith.constant 1.000000e+00 : f32
    %24 = vector.broadcast %cst_12 : f32 to vector<10x1xf32>
    %25 = arith.divf %24, %23 : vector<10x1xf32>
    %26 = vector.broadcast %13 : vector<10x1xf32> to vector<10x32xf32>
    %27 = arith.subf %7, %26 : vector<10x32xf32>
    %28 = vector.broadcast %8 : vector<1x32xf32> to vector<10x32xf32>
    %29 = arith.mulf %28, %27 : vector<10x32xf32>
    %30 = vector.broadcast %25 : vector<10x1xf32> to vector<10x32xf32>
    %31 = arith.mulf %29, %30 : vector<10x32xf32>
    %32 = vector.broadcast %9 : vector<1x32xf32> to vector<10x32xf32>
    %33 = arith.addf %31, %32 : vector<10x32xf32>
    %34 = arith.truncf %33 : vector<10x32xf32> to vector<10x32xbf16>
    %c0_13 = arith.constant 0 : index
    %c0_14 = arith.constant 0 : index
    %c0_15 = arith.constant 0 : index
    %35 = vector.load %arg4[%c0_13, %c0_14, %c0_15] : memref<1x32x96xbf16, #tpu.memory_space<vmem>>, vector<1x32x96xbf16>
    %36 = vector.shape_cast %35 : vector<1x32x96xbf16> to vector<32x96xbf16>
    %cst_16 = arith.constant dense<0.000000e+00> : vector<10x96xf32>
    %37 = tpu.matmul %34, %36, %cst_16 {dimension_numbers = #tpu.dot_dimension_numbers<[1], [0], [0], [1], [0, 0, 1, 1], [], []>} : vector<10x32xbf16>, vector<32x96xbf16>, vector<10x96xf32> -> vector<10x96xf32>
    %38 = vector.extract_strided_slice %37 {offsets = [0, 0], sizes = [10, 32], strides = [1, 1]} : vector<10x96xf32> to vector<10x32xf32>
    %39 = vector.extract_strided_slice %37 {offsets = [0, 32], sizes = [10, 32], strides = [1, 1]} : vector<10x96xf32> to vector<10x32xf32>
    %40 = vector.extract_strided_slice %37 {offsets = [0, 64], sizes = [10, 32], strides = [1, 1]} : vector<10x96xf32> to vector<10x32xf32>
    %c0_17 = arith.constant 0 : index
    %c0_18 = arith.constant 0 : index
    %c0_19 = arith.constant 0 : index
    %41 = vector.load %arg5[%c0_17, %c0_18, %c0_19] : memref<1x32x32xbf16, #tpu.memory_space<vmem>>, vector<1x32x32xbf16>
    %42 = vector.shape_cast %41 : vector<1x32x32xbf16> to vector<32x32xbf16>
    %cst_20 = arith.constant 0.353553385 : f32
    %43 = vector.broadcast %cst_20 : f32 to vector<10x32xf32>
    %44 = arith.mulf %38, %43 : vector<10x32xf32>
    %45 = vector.extract_strided_slice %44 {offsets = [0, 0], sizes = [10, 8], strides = [1, 1]} : vector<10x32xf32> to vector<10x8xf32>
    %46 = arith.truncf %45 : vector<10x8xf32> to vector<10x8xbf16>
    %47 = vector.extract_strided_slice %39 {offsets = [0, 0], sizes = [10, 8], strides = [1, 1]} : vector<10x32xf32> to vector<10x8xf32>
    %48 = arith.truncf %47 : vector<10x8xf32> to vector<10x8xbf16>
    %cst_21 = arith.constant dense<0.000000e+00> : vector<10x10xf32>
    %49 = tpu.matmul %46, %48, %cst_21 {dimension_numbers = #tpu.dot_dimension_numbers<[1], [1], [0], [0], [0, 0, 1, 0], [], []>} : vector<10x8xbf16>, vector<10x8xbf16>, vector<10x10xf32> -> vector<10x10xf32>
    %50 = vector.broadcast %3 : vector<1x10xf32> to vector<10x10xf32>
    %51 = arith.addf %49, %50 : vector<10x10xf32>
    %cst_22 = arith.constant dense<0xFF800000> : vector<10xf32>
    %52 = vector.multi_reduction <maximumf>, %51, %cst_22 [1] : vector<10x10xf32> to vector<10xf32>
    %53 = vector.shape_cast %52 : vector<10xf32> to vector<10x1xf32>
    %54 = vector.broadcast %53 : vector<10x1xf32> to vector<10x10xf32>
    %55 = arith.subf %51, %54 : vector<10x10xf32>
    %56 = math.exp %55 : vector<10x10xf32>
    %cst_23 = arith.constant dense<0.000000e+00> : vector<10xf32>
    %57 = vector.multi_reduction <add>, %56, %cst_23 [1] : vector<10x10xf32> to vector<10xf32>
    %58 = vector.shape_cast %57 : vector<10xf32> to vector<10x1xf32>
    %59 = tpu.reciprocal %58 {approx = true} : vector<10x1xf32> -> vector<10x1xf32>
    %60 = vector.broadcast %59 : vector<10x1xf32> to vector<10x10xf32>
    %61 = arith.mulf %56, %60 : vector<10x10xf32>
    %62 = arith.truncf %61 : vector<10x10xf32> to vector<10x10xbf16>
    %63 = vector.extract_strided_slice %40 {offsets = [0, 0], sizes = [10, 8], strides = [1, 1]} : vector<10x32xf32> to vector<10x8xf32>
    %64 = arith.truncf %63 : vector<10x8xf32> to vector<10x8xbf16>
    %cst_24 = arith.constant dense<0.000000e+00> : vector<10x8xf32>
    %65 = tpu.matmul %62, %64, %cst_24 {dimension_numbers = #tpu.dot_dimension_numbers<[1], [0], [0], [1], [0, 0, 1, 1], [], []>} : vector<10x10xbf16>, vector<10x8xbf16>, vector<10x8xf32> -> vector<10x8xf32>
    %66 = arith.truncf %65 : vector<10x8xf32> to vector<10x8xbf16>
    %67 = vector.extract_strided_slice %42 {offsets = [0, 0], sizes = [8, 32], strides = [1, 1]} : vector<32x32xbf16> to vector<8x32xbf16>
    %cst_25 = arith.constant dense<0.000000e+00> : vector<10x32xf32>
    %68 = tpu.matmul %66, %67, %cst_25 {dimension_numbers = #tpu.dot_dimension_numbers<[1], [0], [0], [1], [0, 0, 1, 1], [], []>} : vector<10x8xbf16>, vector<8x32xbf16>, vector<10x32xf32> -> vector<10x32xf32>
    %69 = vector.extract_strided_slice %44 {offsets = [0, 8], sizes = [10, 8], strides = [1, 1]} : vector<10x32xf32> to vector<10x8xf32>
    %70 = arith.truncf %69 : vector<10x8xf32> to vector<10x8xbf16>
    %71 = vector.extract_strided_slice %39 {offsets = [0, 8], sizes = [10, 8], strides = [1, 1]} : vector<10x32xf32> to vector<10x8xf32>
    %72 = arith.truncf %71 : vector<10x8xf32> to vector<10x8xbf16>
    %cst_26 = arith.constant dense<0.000000e+00> : vector<10x10xf32>
    %73 = tpu.matmul %70, %72, %cst_26 {dimension_numbers = #tpu.dot_dimension_numbers<[1], [1], [0], [0], [0, 0, 1, 0], [], []>} : vector<10x8xbf16>, vector<10x8xbf16>, vector<10x10xf32> -> vector<10x10xf32>
    %74 = vector.broadcast %3 : vector<1x10xf32> to vector<10x10xf32>
    %75 = arith.addf %73, %74 : vector<10x10xf32>
    %cst_27 = arith.constant dense<0xFF800000> : vector<10xf32>
    %76 = vector.multi_reduction <maximumf>, %75, %cst_27 [1] : vector<10x10xf32> to vector<10xf32>
    %77 = vector.shape_cast %76 : vector<10xf32> to vector<10x1xf32>
    %78 = vector.broadcast %77 : vector<10x1xf32> to vector<10x10xf32>
    %79 = arith.subf %75, %78 : vector<10x10xf32>
    %80 = math.exp %79 : vector<10x10xf32>
    %cst_28 = arith.constant dense<0.000000e+00> : vector<10xf32>
    %81 = vector.multi_reduction <add>, %80, %cst_28 [1] : vector<10x10xf32> to vector<10xf32>
    %82 = vector.shape_cast %81 : vector<10xf32> to vector<10x1xf32>
    %83 = tpu.reciprocal %82 {approx = true} : vector<10x1xf32> -> vector<10x1xf32>
    %84 = vector.broadcast %83 : vector<10x1xf32> to vector<10x10xf32>
    %85 = arith.mulf %80, %84 : vector<10x10xf32>
    %86 = arith.truncf %85 : vector<10x10xf32> to vector<10x10xbf16>
    %87 = vector.extract_strided_slice %40 {offsets = [0, 8], sizes = [10, 8], strides = [1, 1]} : vector<10x32xf32> to vector<10x8xf32>
    %88 = arith.truncf %87 : vector<10x8xf32> to vector<10x8xbf16>
    %cst_29 = arith.constant dense<0.000000e+00> : vector<10x8xf32>
    %89 = tpu.matmul %86, %88, %cst_29 {dimension_numbers = #tpu.dot_dimension_numbers<[1], [0], [0], [1], [0, 0, 1, 1], [], []>} : vector<10x10xbf16>, vector<10x8xbf16>, vector<10x8xf32> -> vector<10x8xf32>
    %90 = arith.truncf %89 : vector<10x8xf32> to vector<10x8xbf16>
    %91 = vector.extract_strided_slice %42 {offsets = [8, 0], sizes = [8, 32], strides = [1, 1]} : vector<32x32xbf16> to vector<8x32xbf16>
    %cst_30 = arith.constant dense<0.000000e+00> : vector<10x32xf32>
    %92 = tpu.matmul %90, %91, %cst_30 {dimension_numbers = #tpu.dot_dimension_numbers<[1], [0], [0], [1], [0, 0, 1, 1], [], []>} : vector<10x8xbf16>, vector<8x32xbf16>, vector<10x32xf32> -> vector<10x32xf32>
    %93 = arith.addf %68, %92 : vector<10x32xf32>
    %94 = vector.extract_strided_slice %44 {offsets = [0, 16], sizes = [10, 8], strides = [1, 1]} : vector<10x32xf32> to vector<10x8xf32>
    %95 = arith.truncf %94 : vector<10x8xf32> to vector<10x8xbf16>
    %96 = vector.extract_strided_slice %39 {offsets = [0, 16], sizes = [10, 8], strides = [1, 1]} : vector<10x32xf32> to vector<10x8xf32>
    %97 = arith.truncf %96 : vector<10x8xf32> to vector<10x8xbf16>
    %cst_31 = arith.constant dense<0.000000e+00> : vector<10x10xf32>
    %98 = tpu.matmul %95, %97, %cst_31 {dimension_numbers = #tpu.dot_dimension_numbers<[1], [1], [0], [0], [0, 0, 1, 0], [], []>} : vector<10x8xbf16>, vector<10x8xbf16>, vector<10x10xf32> -> vector<10x10xf32>
    %99 = vector.broadcast %3 : vector<1x10xf32> to vector<10x10xf32>
    %100 = arith.addf %98, %99 : vector<10x10xf32>
    %cst_32 = arith.constant dense<0xFF800000> : vector<10xf32>
    %101 = vector.multi_reduction <maximumf>, %100, %cst_32 [1] : vector<10x10xf32> to vector<10xf32>
    %102 = vector.shape_cast %101 : vector<10xf32> to vector<10x1xf32>
    %103 = vector.broadcast %102 : vector<10x1xf32> to vector<10x10xf32>
    %104 = arith.subf %100, %103 : vector<10x10xf32>
    %105 = math.exp %104 : vector<10x10xf32>
    %cst_33 = arith.constant dense<0.000000e+00> : vector<10xf32>
    %106 = vector.multi_reduction <add>, %105, %cst_33 [1] : vector<10x10xf32> to vector<10xf32>
    %107 = vector.shape_cast %106 : vector<10xf32> to vector<10x1xf32>
    %108 = tpu.reciprocal %107 {approx = true} : vector<10x1xf32> -> vector<10x1xf32>
    %109 = vector.broadcast %108 : vector<10x1xf32> to vector<10x10xf32>
    %110 = arith.mulf %105, %109 : vector<10x10xf32>
    %111 = arith.truncf %110 : vector<10x10xf32> to vector<10x10xbf16>
    %112 = vector.extract_strided_slice %40 {offsets = [0, 16], sizes = [10, 8], strides = [1, 1]} : vector<10x32xf32> to vector<10x8xf32>
    %113 = arith.truncf %112 : vector<10x8xf32> to vector<10x8xbf16>
    %cst_34 = arith.constant dense<0.000000e+00> : vector<10x8xf32>
    %114 = tpu.matmul %111, %113, %cst_34 {dimension_numbers = #tpu.dot_dimension_numbers<[1], [0], [0], [1], [0, 0, 1, 1], [], []>} : vector<10x10xbf16>, vector<10x8xbf16>, vector<10x8xf32> -> vector<10x8xf32>
    %115 = arith.truncf %114 : vector<10x8xf32> to vector<10x8xbf16>
    %116 = vector.extract_strided_slice %42 {offsets = [16, 0], sizes = [8, 32], strides = [1, 1]} : vector<32x32xbf16> to vector<8x32xbf16>
    %cst_35 = arith.constant dense<0.000000e+00> : vector<10x32xf32>
    %117 = tpu.matmul %115, %116, %cst_35 {dimension_numbers = #tpu.dot_dimension_numbers<[1], [0], [0], [1], [0, 0, 1, 1], [], []>} : vector<10x8xbf16>, vector<8x32xbf16>, vector<10x32xf32> -> vector<10x32xf32>
    %118 = arith.addf %93, %117 : vector<10x32xf32>
    %119 = vector.extract_strided_slice %44 {offsets = [0, 24], sizes = [10, 8], strides = [1, 1]} : vector<10x32xf32> to vector<10x8xf32>
    %120 = arith.truncf %119 : vector<10x8xf32> to vector<10x8xbf16>
    %121 = vector.extract_strided_slice %39 {offsets = [0, 24], sizes = [10, 8], strides = [1, 1]} : vector<10x32xf32> to vector<10x8xf32>
    %122 = arith.truncf %121 : vector<10x8xf32> to vector<10x8xbf16>
    %cst_36 = arith.constant dense<0.000000e+00> : vector<10x10xf32>
    %123 = tpu.matmul %120, %122, %cst_36 {dimension_numbers = #tpu.dot_dimension_numbers<[1], [1], [0], [0], [0, 0, 1, 0], [], []>} : vector<10x8xbf16>, vector<10x8xbf16>, vector<10x10xf32> -> vector<10x10xf32>
    %124 = vector.broadcast %3 : vector<1x10xf32> to vector<10x10xf32>
    %125 = arith.addf %123, %124 : vector<10x10xf32>
    %cst_37 = arith.constant dense<0xFF800000> : vector<10xf32>
    %126 = vector.multi_reduction <maximumf>, %125, %cst_37 [1] : vector<10x10xf32> to vector<10xf32>
    %127 = vector.shape_cast %126 : vector<10xf32> to vector<10x1xf32>
    %128 = vector.broadcast %127 : vector<10x1xf32> to vector<10x10xf32>
    %129 = arith.subf %125, %128 : vector<10x10xf32>
    %130 = math.exp %129 : vector<10x10xf32>
    %cst_38 = arith.constant dense<0.000000e+00> : vector<10xf32>
    %131 = vector.multi_reduction <add>, %130, %cst_38 [1] : vector<10x10xf32> to vector<10xf32>
    %132 = vector.shape_cast %131 : vector<10xf32> to vector<10x1xf32>
    %133 = tpu.reciprocal %132 {approx = true} : vector<10x1xf32> -> vector<10x1xf32>
    %134 = vector.broadcast %133 : vector<10x1xf32> to vector<10x10xf32>
    %135 = arith.mulf %130, %134 : vector<10x10xf32>
    %136 = arith.truncf %135 : vector<10x10xf32> to vector<10x10xbf16>
    %137 = vector.extract_strided_slice %40 {offsets = [0, 24], sizes = [10, 8], strides = [1, 1]} : vector<10x32xf32> to vector<10x8xf32>
    %138 = arith.truncf %137 : vector<10x8xf32> to vector<10x8xbf16>
    %cst_39 = arith.constant dense<0.000000e+00> : vector<10x8xf32>
    %139 = tpu.matmul %136, %138, %cst_39 {dimension_numbers = #tpu.dot_dimension_numbers<[1], [0], [0], [1], [0, 0, 1, 1], [], []>} : vector<10x10xbf16>, vector<10x8xbf16>, vector<10x8xf32> -> vector<10x8xf32>
    %140 = arith.truncf %139 : vector<10x8xf32> to vector<10x8xbf16>
    %141 = vector.extract_strided_slice %42 {offsets = [24, 0], sizes = [8, 32], strides = [1, 1]} : vector<32x32xbf16> to vector<8x32xbf16>
    %cst_40 = arith.constant dense<0.000000e+00> : vector<10x32xf32>
    %142 = tpu.matmul %140, %141, %cst_40 {dimension_numbers = #tpu.dot_dimension_numbers<[1], [0], [0], [1], [0, 0, 1, 1], [], []>} : vector<10x8xbf16>, vector<8x32xbf16>, vector<10x32xf32> -> vector<10x32xf32>
    %143 = arith.addf %118, %142 : vector<10x32xf32>
    %144 = arith.addf %7, %143 : vector<10x32xf32>
    %145 = vector.extract_strided_slice %1 {offsets = [2, 0], sizes = [1, 32], strides = [1, 1]} : vector<7x32xf32> to vector<1x32xf32>
    %146 = vector.extract_strided_slice %1 {offsets = [3, 0], sizes = [1, 32], strides = [1, 1]} : vector<7x32xf32> to vector<1x32xf32>
    %cst_41 = arith.constant dense<0.000000e+00> : vector<10xf32>
    %147 = vector.multi_reduction <add>, %144, %cst_41 [1] : vector<10x32xf32> to vector<10xf32>
    %148 = vector.shape_cast %147 : vector<10xf32> to vector<10x1xf32>
    %cst_42 = arith.constant 3.200000e+01 : f32
    %149 = vector.broadcast %cst_42 : f32 to vector<10x1xf32>
    %150 = arith.divf %148, %149 : vector<10x1xf32>
    %151 = vector.broadcast %150 : vector<10x1xf32> to vector<10x32xf32>
    %152 = arith.subf %144, %151 : vector<10x32xf32>
    %153 = arith.mulf %152, %152 : vector<10x32xf32>
    %cst_43 = arith.constant dense<0.000000e+00> : vector<10xf32>
    %154 = vector.multi_reduction <add>, %153, %cst_43 [1] : vector<10x32xf32> to vector<10xf32>
    %155 = vector.shape_cast %154 : vector<10xf32> to vector<10x1xf32>
    %cst_44 = arith.constant 0.0322580636 : f32
    %156 = vector.broadcast %cst_44 : f32 to vector<10x1xf32>
    %157 = arith.mulf %155, %156 : vector<10x1xf32>
    %158 = math.sqrt %157 : vector<10x1xf32>
    %cst_45 = arith.constant 9.99999997E-7 : f32
    %159 = vector.broadcast %cst_45 : f32 to vector<10x1xf32>
    %160 = arith.addf %158, %159 : vector<10x1xf32>
    %cst_46 = arith.constant 1.000000e+00 : f32
    %161 = vector.broadcast %cst_46 : f32 to vector<10x1xf32>
    %162 = arith.divf %161, %160 : vector<10x1xf32>
    %163 = vector.broadcast %150 : vector<10x1xf32> to vector<10x32xf32>
    %164 = arith.subf %144, %163 : vector<10x32xf32>
    %165 = vector.broadcast %145 : vector<1x32xf32> to vector<10x32xf32>
    %166 = arith.mulf %165, %164 : vector<10x32xf32>
    %167 = vector.broadcast %162 : vector<10x1xf32> to vector<10x32xf32>
    %168 = arith.mulf %166, %167 : vector<10x32xf32>
    %169 = vector.broadcast %146 : vector<1x32xf32> to vector<10x32xf32>
    %170 = arith.addf %168, %169 : vector<10x32xf32>
    %c0_47 = arith.constant 0 : index
    %c0_48 = arith.constant 0 : index
    %c0_49 = arith.constant 0 : index
    %171 = vector.load %arg6[%c0_47, %c0_48, %c0_49] : memref<1x96x64xbf16, #tpu.memory_space<vmem>>, vector<1x96x64xbf16>
    %172 = vector.shape_cast %171 : vector<1x96x64xbf16> to vector<96x64xbf16>
    %c0_50 = arith.constant 0 : index
    %c0_51 = arith.constant 0 : index
    %c0_52 = arith.constant 0 : index
    %173 = vector.load %arg7[%c0_50, %c0_51, %c0_52] : memref<1x1x64xf32, #tpu.memory_space<vmem>>, vector<1x1x64xf32>
    %174 = vector.shape_cast %173 : vector<1x1x64xf32> to vector<1x64xf32>
    %cst_53 = arith.constant 0.000000e+00 : f32
    %175 = vector.broadcast %cst_53 : f32 to vector<1x32xf32>
    %176 = vector.extract_strided_slice %170 {offsets = [0, 0], sizes = [9, 32], strides = [1, 1]} : vector<10x32xf32> to vector<9x32xf32>
    %177 = tpu.concatenate %175, %176 in 0 : vector<1x32xf32>, vector<9x32xf32> -> vector<10x32xf32>
    %178 = arith.truncf %177 : vector<10x32xf32> to vector<10x32xbf16>
    %179 = vector.extract_strided_slice %172 {offsets = [0, 0], sizes = [32, 64], strides = [1, 1]} : vector<96x64xbf16> to vector<32x64xbf16>
    %cst_54 = arith.constant dense<0.000000e+00> : vector<10x64xf32>
    %180 = tpu.matmul %178, %179, %cst_54 {dimension_numbers = #tpu.dot_dimension_numbers<[1], [0], [0], [1], [0, 0, 1, 1], [], []>} : vector<10x32xbf16>, vector<32x64xbf16>, vector<10x64xf32> -> vector<10x64xf32>
    %181 = arith.truncf %170 : vector<10x32xf32> to vector<10x32xbf16>
    %182 = vector.extract_strided_slice %172 {offsets = [32, 0], sizes = [32, 64], strides = [1, 1]} : vector<96x64xbf16> to vector<32x64xbf16>
    %cst_55 = arith.constant dense<0.000000e+00> : vector<10x64xf32>
    %183 = tpu.matmul %181, %182, %cst_55 {dimension_numbers = #tpu.dot_dimension_numbers<[1], [0], [0], [1], [0, 0, 1, 1], [], []>} : vector<10x32xbf16>, vector<32x64xbf16>, vector<10x64xf32> -> vector<10x64xf32>
    %184 = arith.addf %180, %183 : vector<10x64xf32>
    %cst_56 = arith.constant 0.000000e+00 : f32
    %185 = vector.broadcast %cst_56 : f32 to vector<1x32xf32>
    %186 = vector.extract_strided_slice %170 {offsets = [1, 0], sizes = [9, 32], strides = [1, 1]} : vector<10x32xf32> to vector<9x32xf32>
    %187 = tpu.concatenate %186, %185 in 0 : vector<9x32xf32>, vector<1x32xf32> -> vector<10x32xf32>
    %188 = arith.truncf %187 : vector<10x32xf32> to vector<10x32xbf16>
    %189 = vector.extract_strided_slice %172 {offsets = [64, 0], sizes = [32, 64], strides = [1, 1]} : vector<96x64xbf16> to vector<32x64xbf16>
    %cst_57 = arith.constant dense<0.000000e+00> : vector<10x64xf32>
    %190 = tpu.matmul %188, %189, %cst_57 {dimension_numbers = #tpu.dot_dimension_numbers<[1], [0], [0], [1], [0, 0, 1, 1], [], []>} : vector<10x32xbf16>, vector<32x64xbf16>, vector<10x64xf32> -> vector<10x64xf32>
    %191 = arith.addf %184, %190 : vector<10x64xf32>
    %192 = vector.broadcast %174 : vector<1x64xf32> to vector<10x64xf32>
    %193 = arith.addf %191, %192 : vector<10x64xf32>
    %cst_58 = arith.constant 0.000000e+00 : f32
    %194 = vector.broadcast %cst_58 : f32 to vector<10x64xf32>
    %195 = arith.maximumf %193, %194 : vector<10x64xf32>
    %c0_59 = arith.constant 0 : index
    %c0_60 = arith.constant 0 : index
    %c0_61 = arith.constant 0 : index
    %196 = vector.load %arg8[%c0_59, %c0_60, %c0_61] : memref<1x192x32xbf16, #tpu.memory_space<vmem>>, vector<1x192x32xbf16>
    %197 = vector.shape_cast %196 : vector<1x192x32xbf16> to vector<192x32xbf16>
    %198 = vector.extract_strided_slice %1 {offsets = [4, 0], sizes = [1, 32], strides = [1, 1]} : vector<7x32xf32> to vector<1x32xf32>
    %cst_62 = arith.constant 0.000000e+00 : f32
    %199 = vector.broadcast %cst_62 : f32 to vector<1x64xf32>
    %200 = vector.extract_strided_slice %195 {offsets = [0, 0], sizes = [9, 64], strides = [1, 1]} : vector<10x64xf32> to vector<9x64xf32>
    %201 = tpu.concatenate %199, %200 in 0 : vector<1x64xf32>, vector<9x64xf32> -> vector<10x64xf32>
    %202 = arith.truncf %201 : vector<10x64xf32> to vector<10x64xbf16>
    %203 = vector.extract_strided_slice %197 {offsets = [0, 0], sizes = [64, 32], strides = [1, 1]} : vector<192x32xbf16> to vector<64x32xbf16>
    %cst_63 = arith.constant dense<0.000000e+00> : vector<10x32xf32>
    %204 = tpu.matmul %202, %203, %cst_63 {dimension_numbers = #tpu.dot_dimension_numbers<[1], [0], [0], [1], [0, 0, 1, 1], [], []>} : vector<10x64xbf16>, vector<64x32xbf16>, vector<10x32xf32> -> vector<10x32xf32>
    %205 = arith.truncf %195 : vector<10x64xf32> to vector<10x64xbf16>
    %206 = vector.extract_strided_slice %197 {offsets = [64, 0], sizes = [64, 32], strides = [1, 1]} : vector<192x32xbf16> to vector<64x32xbf16>
    %cst_64 = arith.constant dense<0.000000e+00> : vector<10x32xf32>
    %207 = tpu.matmul %205, %206, %cst_64 {dimension_numbers = #tpu.dot_dimension_numbers<[1], [0], [0], [1], [0, 0, 1, 1], [], []>} : vector<10x64xbf16>, vector<64x32xbf16>, vector<10x32xf32> -> vector<10x32xf32>
    %208 = arith.addf %204, %207 : vector<10x32xf32>
    %cst_65 = arith.constant 0.000000e+00 : f32
    %209 = vector.broadcast %cst_65 : f32 to vector<1x64xf32>
    %210 = vector.extract_strided_slice %195 {offsets = [1, 0], sizes = [9, 64], strides = [1, 1]} : vector<10x64xf32> to vector<9x64xf32>
    %211 = tpu.concatenate %210, %209 in 0 : vector<9x64xf32>, vector<1x64xf32> -> vector<10x64xf32>
    %212 = arith.truncf %211 : vector<10x64xf32> to vector<10x64xbf16>
    %213 = vector.extract_strided_slice %197 {offsets = [128, 0], sizes = [64, 32], strides = [1, 1]} : vector<192x32xbf16> to vector<64x32xbf16>
    %cst_66 = arith.constant dense<0.000000e+00> : vector<10x32xf32>
    %214 = tpu.matmul %212, %213, %cst_66 {dimension_numbers = #tpu.dot_dimension_numbers<[1], [0], [0], [1], [0, 0, 1, 1], [], []>} : vector<10x64xbf16>, vector<64x32xbf16>, vector<10x32xf32> -> vector<10x32xf32>
    %215 = arith.addf %208, %214 : vector<10x32xf32>
    %216 = vector.broadcast %198 : vector<1x32xf32> to vector<10x32xf32>
    %217 = arith.addf %215, %216 : vector<10x32xf32>
    %218 = arith.addf %144, %217 : vector<10x32xf32>
    %c0_67 = arith.constant 0 : index
    %c0_68 = arith.constant 0 : index
    %219 = vector.load %arg11[%c0_67, %c0_68] : memref<10x32xf32, #tpu.memory_space<vmem>>, vector<10x32xf32>
    tpu.vector_store %arg11[%c0_67, %c0_68], %218 {strides = array<i32>} : memref<10x32xf32, #tpu.memory_space<vmem>>, vector<10x32xf32>,
    %c1_i32 = arith.constant 1 : i32
    %220 = arith.cmpi eq, %arg1, %c1_i32 : i32
    %221 = arith.extui %220 : i1 to i32
    %c0_i32_69 = arith.constant 0 : i32
    %222 = arith.cmpi ne, %221, %c0_i32_69 : i32
    scf.if %222 {
      %223 = vector.extract_strided_slice %1 {offsets = [5, 0], sizes = [1, 32], strides = [1, 1]} : vector<7x32xf32> to vector<1x32xf32>
      %224 = vector.extract_strided_slice %1 {offsets = [6, 0], sizes = [1, 32], strides = [1, 1]} : vector<7x32xf32> to vector<1x32xf32>
      %cst_70 = arith.constant dense<0.000000e+00> : vector<10xf32>
      %225 = vector.multi_reduction <add>, %218, %cst_70 [1] : vector<10x32xf32> to vector<10xf32>
      %226 = vector.shape_cast %225 : vector<10xf32> to vector<10x1xf32>
      %cst_71 = arith.constant 3.200000e+01 : f32
      %227 = vector.broadcast %cst_71 : f32 to vector<10x1xf32>
      %228 = arith.divf %226, %227 : vector<10x1xf32>
      %229 = vector.broadcast %228 : vector<10x1xf32> to vector<10x32xf32>
      %230 = arith.subf %218, %229 : vector<10x32xf32>
      %231 = arith.mulf %230, %230 : vector<10x32xf32>
      %cst_72 = arith.constant dense<0.000000e+00> : vector<10xf32>
      %232 = vector.multi_reduction <add>, %231, %cst_72 [1] : vector<10x32xf32> to vector<10xf32>
      %233 = vector.shape_cast %232 : vector<10xf32> to vector<10x1xf32>
      %cst_73 = arith.constant 3.200000e+01 : f32
      %234 = vector.broadcast %cst_73 : f32 to vector<10x1xf32>
      %235 = arith.divf %233, %234 : vector<10x1xf32>
      %236 = vector.broadcast %228 : vector<10x1xf32> to vector<10x32xf32>
      %237 = arith.subf %218, %236 : vector<10x32xf32>
      %cst_74 = arith.constant 9.99999974E-6 : f32
      %238 = vector.broadcast %cst_74 : f32 to vector<10x1xf32>
      %239 = arith.addf %235, %238 : vector<10x1xf32>
      %240 = math.rsqrt %239 : vector<10x1xf32>
      %241 = vector.broadcast %240 : vector<10x1xf32> to vector<10x32xf32>
      %242 = arith.mulf %237, %241 : vector<10x32xf32>
      %243 = vector.broadcast %223 : vector<1x32xf32> to vector<10x32xf32>
      %244 = arith.mulf %242, %243 : vector<10x32xf32>
      %245 = vector.broadcast %224 : vector<1x32xf32> to vector<10x32xf32>
      %246 = arith.addf %244, %245 : vector<10x32xf32>
      %c0_75 = arith.constant 0 : index
      %c0_76 = arith.constant 0 : index
      %c0_77 = arith.constant 0 : index
      %247 = vector.load %arg10[%c0_75, %c0_76, %c0_77] : memref<1x10x32xf32, #tpu.memory_space<vmem>>, vector<1x10x32xf32>
      %248 = vector.shape_cast %247 : vector<1x10x32xf32> to vector<10x32xf32>
      %249 = vector.shape_cast %246 : vector<10x32xf32> to vector<1x10x32xf32>
      tpu.vector_store %arg10[%c0_75, %c0_76, %c0_77], %249 {strides = array<i32>} : memref<1x10x32xf32, #tpu.memory_space<vmem>>, vector<1x10x32xf32>,
    } else {
    }
    return
  }
  func.func @transform_0(%arg0: i32, %arg1: i32) -> (i32, i32, i32) {
    %c0_i32 = arith.constant 0 : i32
    %c0_i32_0 = arith.constant 0 : i32
    %c0_i32_1 = arith.constant 0 : i32
    return %arg0, %c0_i32, %c0_i32_0 : i32, i32, i32
  }
  func.func @transform_1(%arg0: i32, %arg1: i32) -> (i32, i32, i32) {
    %c0_i32 = arith.constant 0 : i32
    %c0_i32_0 = arith.constant 0 : i32
    %c0_i32_1 = arith.constant 0 : i32
    return %arg0, %c0_i32, %c0_i32_0 : i32, i32, i32
  }
  func.func @transform_2(%arg0: i32, %arg1: i32) -> (i32, i32, i32) {
    %c0_i32 = arith.constant 0 : i32
    %c0_i32_0 = arith.constant 0 : i32
    %c0_i32_1 = arith.constant 0 : i32
    return %arg1, %c0_i32, %c0_i32_0 : i32, i32, i32
  }
  func.func @transform_3(%arg0: i32, %arg1: i32) -> (i32, i32, i32) {
    %c0_i32 = arith.constant 0 : i32
    %c0_i32_0 = arith.constant 0 : i32
    %c0_i32_1 = arith.constant 0 : i32
    return %arg1, %c0_i32, %c0_i32_0 : i32, i32, i32
  }
  func.func @transform_4(%arg0: i32, %arg1: i32) -> (i32, i32, i32) {
    %c0_i32 = arith.constant 0 : i32
    %c0_i32_0 = arith.constant 0 : i32
    %c0_i32_1 = arith.constant 0 : i32
    return %arg1, %c0_i32, %c0_i32_0 : i32, i32, i32
  }
  func.func @transform_5(%arg0: i32, %arg1: i32) -> (i32, i32, i32) {
    %c0_i32 = arith.constant 0 : i32
    %c0_i32_0 = arith.constant 0 : i32
    %c0_i32_1 = arith.constant 0 : i32
    return %arg1, %c0_i32, %c0_i32_0 : i32, i32, i32
  }
  func.func @transform_6(%arg0: i32, %arg1: i32) -> (i32, i32, i32) {
    %c0_i32 = arith.constant 0 : i32
    %c0_i32_0 = arith.constant 0 : i32
    %c0_i32_1 = arith.constant 0 : i32
    return %arg1, %c0_i32, %c0_i32_0 : i32, i32, i32
  }
  func.func @transform_7(%arg0: i32, %arg1: i32) -> (i32, i32, i32) {
    %c0_i32 = arith.constant 0 : i32
    %c0_i32_0 = arith.constant 0 : i32
    %c0_i32_1 = arith.constant 0 : i32
    return %arg1, %c0_i32, %c0_i32_0 : i32, i32, i32
  }
  func.func @transform_8(%arg0: i32, %arg1: i32) -> (i32, i32, i32) {
    %c0_i32 = arith.constant 0 : i32
    %c0_i32_0 = arith.constant 0 : i32
    %c0_i32_1 = arith.constant 0 : i32
    return %arg0, %c0_i32, %c0_i32_0 : i32, i32, i32
  }
}

</mosaic_0001>

<bundles_post_ra>
// kernel: moe_encoder_forward.2
= control target key start
LH: loop header
LB: loop body
LE: loop exit
PB: predicated region body
PF: predicated region fallthrough
CT: control target
= control target key end

     0   :  { %s2811_s0 = inlined_call_operand.vmem [shape: f32[2,3], index: 0, kind: input, shape index: {}]   ;;  %s2812_s1 = inlined_call_operand.vmem [shape: f32[2,8,32], index: 1, kind: input, shape index: {}]   ;;  %s2813_s2 = inlined_call_operand.vmem [shape: f32[2,10,32], index: 2, kind: input, shape index: {}]   ;;  %s2814_s3 = inlined_call_operand.vmem [shape: f32[2,1,10], index: 3, kind: input, shape index: {}]   ;;  %s2815_s4 = inlined_call_operand.vmem [shape: f32[1,32], index: 4, kind: input, shape index: {}]   ;;  %s2816_s5 = inlined_call_operand.vmem [shape: f32[1,32], index: 5, kind: input, shape index: {}]   ;;  %s2817_s6 = inlined_call_operand.vmem [shape: bf16[3,32,32], index: 6, kind: input, shape index: {}]   ;;  %s2818_s7 = inlined_call_operand.vmem [shape: bf16[3,32,32], index: 7, kind: input, shape index: {}]   ;;  %s2819_s8 = inlined_call_operand.vmem [shape: bf16[3,32,64], index: 8, kind: input, shape index: {}]   ;;  %s2820_s9 = inlined_call_operand.vmem [shape: bf16[3,32,32], index: 9, kind: input, shape index: {}]   ;;  %s2821_s10 = inlined_call_operand.vmem [shape: bf16[3,32,64], index: 10, kind: input, shape index: {}]   ;;  %s2822_s11 = inlined_call_operand.vmem [shape: f32[3,1,64], index: 11, kind: input, shape index: {}]   ;;  %s2823_s12 = inlined_call_operand.vmem [shape: bf16[3,64,32], index: 12, kind: input, shape index: {}]   ;;  %s2824_s13 = inlined_call_operand.vmem [shape: f32[3,5,32], index: 13, kind: input, shape index: {}]   ;;  %s2825_s14 = inlined_call_operand.vmem [shape: f32[2,10,32], index: 14, kind: output, shape index: {0}]   ;;  %s2826_s15 = inlined_call_operand.vmem [shape: f32[2,10,32], index: 15, kind: output, shape index: {1}]  }
   0x1   :  { %2829 = sst [smem:[#allocation10_spill]] %s2812_s1  ;;  %s21_s20 = sshll.u32 %s2811_s0, 4  ;;  %s22_s20 = int_to_ptr.vmem [resolvable:$true] %s21_s20 }
   0x2   :  { %2830 = sst [smem:[#allocation11_spill]] %s2817_s6  ;;  %s2355_s21 = scalar_lea.vmem %s22_s20, 32 }
   0x3   :  { %p2356_p0 = scmp.ne.s32.totalorder %s22_s20, %s2355_s21  ;;  %p2360_p1 = scmp.lt.s32.totalorder %s22_s20, %s22_s20 }
   0x4   :  { %p2361_p2 = scmp.lt.s32.totalorder %s2355_s21, %s2355_s21 }
   0x6   :  { %p2362_p3 = por %p2361_p2, %p2360_p1 }
   0x8   :  { %p2363_p4 = pnand %p2362_p3, %p2356_p0 }
   0xa   :  { %2366 = shalt.err (!%p2363_p4)  }
   0xb   :  { %s2409_s22 = smov [#allocation4]  }
   0xc   :  { %24 = dma.vmem_to_smem %s22_s20, 32, %s2409_s22, [#allocation3] }
   0xd   :  { %2387 = dma.done.wait [#allocation3], 32 }
   0xe   :  { %2388 = vsyncadd [#allocation3], 4294967264 }
   0xf   :  { %26 = sfence }
  0x10   :  { %s2503_s23 = smov 0   ;;  %s2505_s24 = smov 0  }
  0x11   :  { %s2507_s25 = smov 0   ;;  %s2509_s0 = smov 0  }
  0x12   :  { %s2511_s26 = smov 0  }
  0x13 LB: > { %2831 = sst [smem:[#allocation6_spill]] %s2399_s25  ;;  %s41_s27 = sadd.s32 1, %s2399_s25  ;;  %s2407_s26 = sphi %s2511_s26, %s32_s26   ;;  %s2403_s0 = sphi %s2509_s0, %s2840_s0   ;;  %s2399_s25 = sphi %s2507_s25, %s2839_s25   ;;  %s2395_s24 = sphi %s2505_s24, %s2838_s24   ;;  %s2391_s23 = sphi %s2503_s23, %s2837_s23  }
  0x14   : > { %2832 = sst [smem:[#allocation7_spill]] %s2403_s0  ;;  %s44_s28 = sadd.s32 1, %s2403_s0 }
  0x15   : > { %p42_p5 = scmp.ge.s32.totalorder %s41_s27, 3  ;;  %p2038_p6 = scmp.ge.s32.totalorder %s2407_s26, 1 }
  0x16   : > { %p528_p7 = scmp.lt.s32.totalorder %s2407_s26, 7 }
  0x17   : > { %s2842_s27 = smov (%p42_p5, %s41_s27), 0  ;;  %s2844_s28 = smov (!%p42_p5, %s44_s28), %s2403_s0 }
  0x18   : > { %2833 = sst [smem:[#allocation8_spill]] %s2842_s27  ;;  %p529_p8 = pnand %p2038_p6, %p528_p7 }
  0x19   : > { %p46_p9 = scmp.ge.s32.totalorder %s2844_s28, 2  ;;  %p635_p10 = scmp.lt.s32.totalorder (!%p529_p8), %s2391_s23, 2 }
  0x1a   : > { %532 = sbr.rel (%p529_p8) target bundleno = 4080 (0xff0), region = 72  ;;  %p623_p11 = scmp.lt.s32.totalorder (!%p529_p8), %s2395_s24, 1 }
  0x1b   : > { %s2846_s28 = smov (%p46_p9, %s2844_s28), 0  ;;  %s2835_s6 = sld [smem:[#allocation11_spill]] (!%p529_p8) }
  0x1c   : > { %2834 = sst [smem:[#allocation9_spill]] %s2846_s28  ;;  %s2418_s21 = smov (!%p529_p8), 72  }
  0x1d   : > { %s2836_s1 = sld [smem:[#allocation10_spill]] (!%p529_p8)  ;;  %p2090_p12 = scmp.ne.s32.totalorder (!%p529_p8), %s2391_s23, 0 }
  0x1f   : > { %v2410_v0 = vmov 0.0   ;;  %vm2411_vm0 = vmmov 0   ;;  %s2543_s29 = scalar_select %p635_p10, %s2391_s23, 2  ;;  %vm705_vm1 = vcmask 261120   ;;  %v770_v27 = vlaneseq }
  0x20   : > { %2148 = vmatprep.subr.bf16.mxu1 %v2410_v0  ;;  %2152 = vmatprep.mubr.msk.bf16.mxu1 %vm2411_vm0, %v2410_v0  ;;  %s2549_s30 = scalar_select %p623_p11, %s2395_s24, 1  ;;  %vm915_vm4 = vcmask 64512   ;;  %vm962_vm5 = vcmask 80896   ;;  %vm981_vm6 = vcmask 1044480   ;;  %vm1141_vm7 = vcmask 1043456  }
  0x21   : > { %2164 = vmatprep.subr.bf16.mxu0 %v2410_v0  ;;  %2168 = vmatprep.mubr.msk.bf16.mxu0 %vm2411_vm0, %v2410_v0  ;;  %s2552_s16 = sshll.u32 %s2543_s29, 4  ;;  %v2609_v31 = vshrl.u32 %v770_v27, 7  ;;  %vm1680_vm10 = vcmask 523264  }
  0x22   : > { %s639_s19 = scalar_lea.vmem %s2835_s6, %s2552_s16  ;;  %s2039_s20 = sshll.u32 %s2549_s30, 3 }
  0x23   : > { %v2315_v1 = vld [vmem:[%s639_s19 + $0x8] sm:$0xff]   ;;  %s626_s28 = scalar_lea.vmem %s2836_s1, %s2039_s20  ;;  %v2316_v2 = vld [vmem:[%s639_s19] sm:$0xff]   ;;  %s649_s18 = scalar_lea.vmem %s2819_s8, %s2552_s16  ;;  %v772_v32 = vsub.s32 0, %v2609_v31  ;;  %v778_v35 = vsub.s32 1, %v2609_v31 }
  0x24   : > { %2149 = vmatpush3.bf16.msra.mxu1 %v2315_v1  ;;  %v687_v3 = vld [vmem:[%s626_s28] sm:$0xff]  ;;  %v2317_v15 = vld [vmem:[%s649_s18 + $0x8] sm:$0xff]   ;;  %s2098_s19 = sshll.u32 %s2549_s30, 4  ;;  %s644_s20 = scalar_lea.vmem %s2818_s7, %s2552_s16 }
  0x25   : > { %2150 = vmatprep.subr.bf16.mxu1 %v2410_v0  ;;  %v688_v4 = vpack.c.bf16 %v687_v3, %v687_v3  ;;  %2165 = vmatpush3.bf16.msra.mxu0 %v2317_v15  ;;  %v2318_v16 = vld [vmem:[%s649_s18] sm:$0xff]   ;;  %s631_s22 = scalar_lea.vmem %s2813_s2, %s2098_s19  ;;  %s2585_s27 = scalar_lea.vmem %s2825_s14, %s2098_s19  ;;  %v2319_v20 = vld [vmem:[%s644_s20 + $0x8] sm:$0xff]  }
  0x26   : > { %2166 = vmatprep.subr.bf16.mxu0 %v2410_v0  ;;  %s2590_s28 = scalar_lea.vmem %s2826_s15, %s2098_s19  ;;  %v2592_v17 = vld [vmem:[%s631_s22] sm:$0xff]  ;;  %v2594_v18 = vld [vmem:[%s631_s22 + $0x8] sm:$0x3]  ;;  %s2054_s1 = sshll.u32 %s2543_s29, 3 }
  0x27   : > { %v841_v19 = vpack.c.bf16 %v2594_v18, %v2592_v17  ;;  %v2320_v21 = vld [vmem:[%s644_s20] sm:$0xff]   ;;  %s671_s0 = scalar_lea.vmem %s2824_s13, %s2054_s1  ;;  %s2412_s19 = smov 120  }
  0x28   : > { %2151 = vmatpush3.bf16.msra.mxu1 %v2316_v2  ;;  %v2615_v33 = vld [vmem:[%s671_s0] sm:$0x1f]  ;;  %s634_s17 = scalar_lea.vmem %s2814_s3, %s2549_s30  ;;  %s2413_s18 = smov 96  }
  0x29   : > { %2156 = vmatprep.subr.bf16.mxu1 %v2410_v0  ;;  %2167 = vmatpush3.bf16.msra.mxu0 %v2318_v16  ;;  %v773_v34 = vrot.slane %v2615_v33, %v772_v32  ;;  %v779_v37 = vrot.slane %v2615_v33, %v778_v35  ;;  %v2645_v57 = vld [vmem:[%s634_s17] ss:$0 sm:$0xff]  ;;  %s2414_s30 = smov 112   ;;  %s2415_s20 = smov 88  }
  0x2a   : > { %2178 = vmatprep.subr.bf16.mxu0 %v2410_v0  ;;  %s2666_s25 = scalar_lea.vmem %s2820_s9, %s2552_s16  ;;  %s2416_s0 = smov 80  }
  0x2b   : > { %2153 = vmatmul.mubr.msk.bf16.vlgmr.msra.gmra.mxu1 %vm705_vm1, %v688_v4 }
  0x2c   : > { %2160 = vmatprep.mubr.msk.bf16.mxu1 %vm2411_vm0, %v2410_v0  ;;  %2169 = vmatmul.mubr.msk.bf16.vlgmr.msra.gmra.mxu0 %vm705_vm1, %v841_v19 }
  0x2d   : > { %2157 = vmatpush3.bf16.msra.mxu1 %v2319_v20  ;;  %2180 = vmatprep.mubr.msk.bf16.mxu0 %vm2411_vm0, %v2410_v0 }
  0x2e   : > { %2158 = vmatprep.subr.bf16.mxu1 %v2410_v0 }
  0x31   : > { %2159 = vmatpush3.bf16.msra.mxu1 %v2320_v21 }
  0x32   : > { %2172 = vmatprep.subr.bf16.mxu1 %v2410_v0 }
  0xeb   : > { %v2567_v5 = vpop.f32.mrf.mxu1 }
  0xec   : > { %v749_v6 = vsel %vm705_vm1, %v2567_v5, 0.0  ;;  %v895_v42 = vpop.f32.mrf.mxu0 }
  0xed   : > { %750 = vadd.xlane.f32.xlu0 %v749_v6  ;;  %v2154_v7 = vpop.f32.mrf.mxu1 }
  0xee   : > { %v2170_v43 = vpop.f32.mrf.mxu0 }
  0xef   : > { %v746_v8 = vpop.f32.mrf.mxu1 }
  0xf0   : > { %v898_v44 = vpop.f32.mrf.mxu0 }
  0xf1   : > { %v2155_v9 = vpop.f32.mrf.mxu1  ;;  %v2623_v45 = vpack.c.bf16 %v898_v44, %v895_v42 }
  0xf2   : > { %v2171_v46 = vpop.f32.mrf.mxu0 }
  0xf3   : > { %1029 = vrot.lane.b32.xlu1 %v2623_v45, %s2412_s19  ;;  %v920_v47 = vsel %vm915_vm4, %v2623_v45, 0 }
 0x165   : > { %v1030_v49 = vpop.permute.xlu1 %1029 }
 0x166   : > { %v1035_v53 = vsel %vm915_vm4, %v1030_v49, 0 }
 0x176   : > { %v751_v10 = vpop.xlane.xlu0 %750 }
 0x177   : > { %v753_v11 = vmul.f32 0.03125, %v751_v10 }
 0x179   : > { %v754_v12 = vsub.f32 %v2567_v5, %v753_v11 }
 0x17b   : > { %v755_v13 = vmul.f32 %v754_v12, %v754_v12  ;;  %v774_v36 = vmul.f32 %v773_v34, %v754_v12  ;;  %v902_v34 = vld [vmem:[%s2666_s25] sm:$0xf] }
 0x17d   : > { %v756_v14 = vsel %vm705_vm1, %v755_v13, 0.0 }
 0x17e   : > { %757 = vadd.xlane.f32.xlu0 %v756_v14 }
 0x207   : > { %v758_v22 = vpop.xlane.xlu0 %757 }
 0x208   : > { %v759_v23 = vmul.f32 0.032258064, %v758_v22 }
 0x20a   : > { %2327 = vrsqrt.f32 %v759_v23  ;;  %vm762_vm2 = vcmp.eq.f32.partialorder %v759_v23, inf  ;;  %v765_v26 = vand.u32 2147483648, %v759_v23  ;;  %vm764_vm3 = vcmp.eq.f32.partialorder %v759_v23, 0.0 }
 0x217   : > { %v2328_v24 = vpop.eup %2327 }
 0x218   : > { %v761_v25 = vmul.f32 %v2328_v24, %v759_v23 }
 0x21a   : > { %v763_v28 = vsel %vm762_vm2, %v759_v23, %v761_v25 }
 0x21b   : > { %v766_v29 = vsel %vm764_vm3, %v765_v26, %v763_v28  ;;  %v903_v26 = vld [vmem:[%s2666_s25 + $0x4] sm:$0xf] }
 0x21c   : > { %v767_v30 = vadd.f32 1e-06, %v766_v29  ;;  %v1143_v27 = vsel %vm1141_vm7, %v903_v26, 0 }
 0x21e   : > { %2329 = vrcp.f32 %v767_v30 }
 0x22b   : > { %v2330_v38 = vpop.eup %2329 }
 0x22c   : > { %v775_v39 = vmul.f32 %v2330_v38, %v774_v36 }
 0x22e   : > { %v780_v40 = vadd.f32 %v779_v37, %v775_v39  ;;  %v1189_v37 = vsel %vm1141_vm7, %v902_v34, 0 }
 0x230   : > { %v781_v41 = vpack.c.bf16 %v780_v40, %v780_v40 }
 0x232   : > { %2161 = vmatmul.mubr.msk.bf16.vlgmr.msra.gmra.mxu1 %vm705_vm1, %v781_v41 }
 0x233   : > { %2174 = vmatprep.mubr.msk.bf16.mxu1 %vm2411_vm0, %v2410_v0  ;;  %2173 = vmatpush3.bf16.xpose.msra.mxu1 %v920_v47 }
 0x234   : > { %2184 = vmatprep.subr.bf16.mxu1 %v2410_v0 }
 0x2f2   : > { %v835_v48 = vpop.f32.mrf.mxu1 }
 0x2f3   : > { %v906_v50 = vmul.f32 0.35355338, %v835_v48 }
 0x2f4   : > { %v2162_v51 = vpop.f32.mrf.mxu1 }
 0x2f5   : > { %v2629_v52 = vpack.c.bf16 %v906_v50, %v906_v50 }
 0x2f6   : > { %v838_v54 = vpop.f32.mrf.mxu1 }
 0x2f7   : > { %1027 = vrot.lane.b32.xlu1 %v2629_v52, %s2412_s19  ;;  %2175 = vmatmul.mubr.msk.bf16.vlgmr.msra.gmra.mxu1 %vm915_vm4, %v2629_v52  ;;  %s2417_s19 = smov 104  }
 0x2f8   : > { %v2163_v55 = vpop.f32.mrf.mxu1  ;;  %2185 = vmatpush3.bf16.xpose.msra.mxu1 %v1035_v53  ;;  %2186 = vmatprep.mubr.msk.bf16.mxu1 %vm2411_vm0, %v2410_v0 }
 0x2f9   : > { %2196 = vmatprep.subr.bf16.mxu1 %v2410_v0 }
 0x369   : > { %v1028_v56 = vpop.permute.xlu1 %1027 }
 0x36a   : > { %2187 = vmatmul.mubr.msk.bf16.vlgmr.msra.gmra.mxu1 %vm915_vm4, %v1028_v56 }
 0x36b   : > { %2198 = vmatprep.mubr.msk.bf16.mxu1 %vm2411_vm0, %v2410_v0  ;;  %2197 = vmatpush3.bf16.msra.mxu1 %v1143_v27 }
 0x36c   : > { %2208 = vmatprep.subr.bf16.mxu1 %v2410_v0 }
 0x3b7   : > { %v956_v58 = vpop.f32.mrf.mxu1 }
 0x3b8   : > { %v957_v59 = vadd.f32 %v2645_v57, %v956_v58 }
 0x3b9   : > { %v2176_v60 = vpop.f32.mrf.mxu1 }
 0x3ba   : > { %v963_v61 = vsel %vm962_vm5, %v957_v59, -inf }
 0x3bb   : > { %964 = vmax.xlane.f32.xlu0 %v963_v61  ;;  %v959_v62 = vpop.f32.mrf.mxu1 }
 0x3bd   : > { %v2177_v63 = vpop.f32.mrf.mxu1 }
 0x3d1   : > { %976 = vrot.lane.b32.xlu0 %v2623_v45, %s2413_s18  ;;  %s659_s18 = scalar_lea.vmem %s2821_s10, %s2552_s16 }
 0x42a   : > { %v1071_v1 = vpop.f32.mrf.mxu1 }
 0x42b   : > { %v1072_v2 = vadd.f32 %v2645_v57, %v1071_v1 }
 0x42c   : > { %v2188_v3 = vpop.f32.mrf.mxu1 }
 0x42d   : > { %v1077_v4 = vsel %vm962_vm5, %v1072_v2, -inf }
 0x42e   : > { %1078 = vmax.xlane.f32.xlu1 %v1077_v4  ;;  %v1074_v6 = vpop.f32.mrf.mxu1 }
 0x430   : > { %v2189_v7 = vpop.f32.mrf.mxu1 }
 0x43f   : > { %1233 = vrot.lane.b32.xlu1 %v2623_v45, %s2414_s30 }
 0x444   : > { %v965_v8 = vpop.xlane.xlu0 %964 }
 0x445   : > { %v966_v9 = vsub.f32 %v957_v59, %v965_v8 }
 0x447   : > { %v967_v10 = vmul.f32 1.442695, %v966_v9 }
 0x448   : > { %v977_v11 = vpop.permute.xlu0 %976 }
 0x449   : > { %2331 = vpow2.f32 %v967_v10  ;;  %v983_v12 = vsel %vm981_vm6, %v977_v11, 0 }
 0x44a   : > { %2179 = vmatpush3.bf16.msra.mxu0 %v983_v12 }
 0x44b   : > { %2190 = vmatprep.subr.bf16.mxu0 %v2410_v0 }
 0x456   : > { %v2332_v13 = vpop.eup %2331 }
 0x457   : > { %v969_v14 = vsel %vm962_vm5, %v2332_v13, 0.0 }
 0x458   : > { %970 = vadd.xlane.f32.xlu0 %v969_v14 }
 0x4b7   : > { %v1079_v15 = vpop.xlane.xlu1 %1078 }
 0x4b8   : > { %v1080_v16 = vsub.f32 %v1072_v2, %v1079_v15 }
 0x4ba   : > { %v1081_v19 = vmul.f32 1.442695, %v1080_v16 }
 0x4bb   : > { %v1234_v43 = vpop.permute.xlu1 %1233 }
 0x4bc   : > { %2333 = vpow2.f32 %v1081_v19  ;;  %v1239_v48 = vsel %vm915_vm4, %v1234_v43, 0 }
 0x4c9   : > { %v2334_v20 = vpop.eup %2333 }
 0x4ca   : > { %v1083_v21 = vsel %vm962_vm5, %v2334_v20, 0.0 }
 0x4cb   : > { %1084 = vadd.xlane.f32.xlu0 %v1083_v21  ;;  %v904_v21 = vld [vmem:[%s2666_s25 + $0x8] sm:$0xf] }
 0x4e1   : > { %v971_v22 = vpop.xlane.xlu0 %970  ;;  %1089 = vrot.lane.b32.xlu0 %v2623_v45, %s2415_s20 }
 0x4e2   : > { %2335 = vrcp.f32 %v971_v22  ;;  %v1346_v22 = vsel %vm1141_vm7, %v904_v21, 0 }
 0x4e5   : > { %1231 = vrot.lane.b32.xlu0 %v2629_v52, %s2414_s30  ;;  %s2104_s30 = sshll.u32 %s2543_s29, 5 }
 0x4e6   : > { %s2749_s6 = scalar_lea.vmem %s2823_s12, %s2104_s30 }
 0x4ef   : > { %v2336_v23 = vpop.eup %2335 }
 0x4f0   : > { %v973_v24 = vmul.f32 %v2336_v23, %v2332_v13 }
 0x4f2   : > { %v974_v25 = vpack.c.bf16 %v973_v24, %v973_v24 }
 0x4f4   : > { %2181 = vmatmul.mubr.msk.bf16.vlgmr.msra.gmra.mxu0 %vm962_vm5, %v974_v25 }
 0x4f5   : > { %2192 = vmatprep.mubr.msk.bf16.mxu0 %vm2411_vm0, %v2410_v0 }
 0x554   : > { %v1085_v28 = vpop.xlane.xlu0 %1084 }
 0x555   : > { %2337 = vrcp.f32 %v1085_v28 }
 0x558   : > { %v1090_v29 = vpop.permute.xlu0 %1089 }
 0x559   : > { %v1095_v30 = vsel %vm981_vm6, %v1090_v29, 0 }
 0x55a   : > { %2191 = vmatpush3.bf16.msra.mxu0 %v1095_v30 }
 0x55b   : > { %2202 = vmatprep.subr.bf16.mxu0 %v2410_v0 }
 0x55c   : > { %v1232_v51 = vpop.permute.xlu0 %1231 }
 0x562   : > { %v2338_v32 = vpop.eup %2337 }
 0x563   : > { %v1087_v35 = vmul.f32 %v2338_v32, %v2334_v20 }
 0x565   : > { %v1088_v36 = vpack.c.bf16 %v1087_v35, %v1087_v35 }
 0x567   : > { %2193 = vmatmul.mubr.msk.bf16.vlgmr.msra.gmra.mxu0 %vm962_vm5, %v1088_v36 }
 0x568   : > { %2203 = vmatpush3.bf16.msra.mxu0 %v1189_v37  ;;  %2204 = vmatprep.mubr.msk.bf16.mxu0 %vm2411_vm0, %v2410_v0 }
 0x569   : > { %2214 = vmatprep.subr.bf16.mxu0 %v2410_v0 }
 0x5b4   : > { %v1019_v38 = vpop.f32.mrf.mxu0 }
 0x5b5   : > { %v1025_v39 = vpack.c.bf16 %v1019_v38, %v1019_v38 }
 0x5b6   : > { %v2182_v40 = vpop.f32.mrf.mxu0 }
 0x5b7   : > { %2205 = vmatmul.mubr.msk.bf16.vlgmr.msra.gmra.mxu0 %vm915_vm4, %v1025_v39 }
 0x5b8   : > { %v1022_v41 = vpop.f32.mrf.mxu0  ;;  %2216 = vmatprep.mubr.msk.bf16.mxu0 %vm2411_vm0, %v2410_v0 }
 0x5ba   : > { %v2183_v42 = vpop.f32.mrf.mxu0 }
 0x627   : > { %v1131_v44 = vpop.f32.mrf.mxu0 }
 0x628   : > { %v1137_v46 = vpack.c.bf16 %v1131_v44, %v1131_v44 }
 0x629   : > { %v2194_v47 = vpop.f32.mrf.mxu0 }
 0x62a   : > { %2199 = vmatmul.mubr.msk.bf16.vlgmr.msra.gmra.mxu1 %vm915_vm4, %v1137_v46  ;;  %v905_v46 = vld [vmem:[%s2666_s25 + $0xc] sm:$0xf] }
 0x62b   : > { %2209 = vmatpush3.bf16.xpose.msra.mxu1 %v1239_v48  ;;  %v1134_v49 = vpop.f32.mrf.mxu0  ;;  %2210 = vmatprep.mubr.msk.bf16.mxu1 %vm2411_vm0, %v2410_v0  ;;  %v1504_v47 = vsel %vm1141_vm7, %v905_v46, 0 }
 0x62c   : > { %2220 = vmatprep.subr.bf16.mxu1 %v2410_v0 }
 0x62d   : > { %v2195_v50 = vpop.f32.mrf.mxu0 }
 0x632   : > { %2211 = vmatmul.mubr.msk.bf16.vlgmr.msra.gmra.mxu1 %vm915_vm4, %v1232_v51 }
 0x633   : > { %2222 = vmatprep.mubr.msk.bf16.mxu1 %vm2411_vm0, %v2410_v0  ;;  %2221 = vmatpush3.bf16.msra.mxu1 %v1346_v22 }
 0x634   : > { %2232 = vmatprep.subr.bf16.mxu1 %v2410_v0 }
 0x677   : > { %v2690_v53 = vpop.f32.mrf.mxu0 }
 0x679   : > { %v2206_v54 = vpop.f32.mrf.mxu0 }
 0x67b   : > { %v1228_v55 = vpop.f32.mrf.mxu0 }
 0x67d   : > { %v2207_v56 = vpop.f32.mrf.mxu0 }
 0x6ea   : > { %v2692_v58 = vpop.f32.mrf.mxu1 }
 0x6eb   : > { %v1226_v42 = vadd.f32 %v2690_v53, %v2692_v58 }
 0x6ec   : > { %v2200_v59 = vpop.f32.mrf.mxu1 }
 0x6ee   : > { %v1182_v60 = vpop.f32.mrf.mxu1 }
 0x6f0   : > { %v2201_v61 = vpop.f32.mrf.mxu1 }
 0x6f2   : > { %v1275_v62 = vpop.f32.mrf.mxu1 }
 0x6f3   : > { %v1276_v63 = vadd.f32 %v2645_v57, %v1275_v62 }
 0x6f4   : > { %v2212_v1 = vpop.f32.mrf.mxu1 }
 0x6f5   : > { %v1281_v2 = vsel %vm962_vm5, %v1276_v63, -inf }
 0x6f6   : > { %1282 = vmax.xlane.f32.xlu0 %v1281_v2  ;;  %v1278_v3 = vpop.f32.mrf.mxu1 }
 0x6f8   : > { %v2213_v4 = vpop.f32.mrf.mxu1 }
 0x70c   : > { %1293 = vrot.lane.b32.xlu0 %v2623_v45, %s2416_s0  ;;  %s662_s0 = scalar_lea.vmem %s2822_s11, %s2543_s29 }
 0x710   : > { %1389 = vrot.lane.b32.xlu0 %v2629_v52, %s2417_s19 }
 0x77f   : > { %v1283_v6 = vpop.xlane.xlu0 %1282 }
 0x780   : > { %v1284_v7 = vsub.f32 %v1276_v63, %v1283_v6 }
 0x782   : > { %v1285_v8 = vmul.f32 1.442695, %v1284_v7 }
 0x783   : > { %v1294_v9 = vpop.permute.xlu0 %1293 }
 0x784   : > { %2339 = vpow2.f32 %v1285_v8  ;;  %v1299_v10 = vsel %vm981_vm6, %v1294_v9, 0 }
 0x785   : > { %2215 = vmatpush3.bf16.msra.mxu0 %v1299_v10 }
 0x786   : > { %2226 = vmatprep.subr.bf16.mxu0 %v2410_v0 }
 0x787   : > { %v1390_v20 = vpop.permute.xlu0 %1389 }
 0x791   : > { %v2340_v11 = vpop.eup %2339 }
 0x792   : > { %v1287_v12 = vsel %vm962_vm5, %v2340_v11, 0.0 }
 0x793   : > { %1288 = vadd.xlane.f32.xlu1 %v1287_v12  ;;  %v2323_v12 = vld [vmem:[%s2749_s6 + $0x18] sm:$0xff]  }
 0x7a4   : > { %1391 = vrot.lane.b32.xlu1 %v2623_v45, %s2417_s19 }
 0x81c   : > { %v1289_v13 = vpop.xlane.xlu1 %1288 }
 0x81d   : > { %2341 = vrcp.f32 %v1289_v13  ;;  %v2324_v13 = vld [vmem:[%s2749_s6 + $0x10] sm:$0xff]  }
 0x820   : > { %v1392_v15 = vpop.permute.xlu1 %1391 }
 0x821   : > { %v1397_v19 = vsel %vm915_vm4, %v1392_v15, 0 }
 0x82a   : > { %v2342_v52 = vpop.eup %2341 }
 0x82b   : > { %v1291_v14 = vmul.f32 %v2342_v52, %v2340_v11  ;;  %v2322_v11 = vld [vmem:[%s659_s18] sm:$0xff]  }
 0x82d   : > { %v1292_v16 = vpack.c.bf16 %v1291_v14, %v1291_v14 }
 0x82f   : > { %2217 = vmatmul.mubr.msk.bf16.vlgmr.msra.gmra.mxu0 %vm962_vm5, %v1292_v16 }
 0x830   : > { %2227 = vmatpush3.bf16.xpose.msra.mxu0 %v1397_v19  ;;  %2228 = vmatprep.mubr.msk.bf16.mxu0 %vm2411_vm0, %v2410_v0 }
 0x831   : > { %2238 = vmatprep.subr.bf16.mxu0 %v2410_v0 }
 0x837   : > { %2229 = vmatmul.mubr.msk.bf16.vlgmr.msra.gmra.mxu0 %vm915_vm4, %v1390_v20 }
 0x838   : > { %2240 = vmatprep.mubr.msk.bf16.mxu0 %vm2411_vm0, %v2410_v0  ;;  %2239 = vmatpush3.bf16.msra.mxu0 %v1504_v47 }
 0x839   : > { %2252 = vmatprep.subr.bf16.mxu0 %v2410_v0 }
 0x8ef   : > { %v1335_v23 = vpop.f32.mrf.mxu0 }
 0x8f0   : > { %v1341_v24 = vpack.c.bf16 %v1335_v23, %v1335_v23  ;;  %v1570_v23 = vsub.s32 2, %v2609_v31 }
 0x8f1   : > { %v2218_v25 = vpop.f32.mrf.mxu0 }
 0x8f2   : > { %2223 = vmatmul.mubr.msk.bf16.vlgmr.msra.gmra.mxu1 %vm915_vm4, %v1341_v24  ;;  %v1571_v24 = vrot.slane %v2615_v33, %v1570_v23  ;;  %v1576_v25 = vsub.s32 3, %v2609_v31 }
 0x8f3   : > { %v1338_v26 = vpop.f32.mrf.mxu0  ;;  %2234 = vmatprep.mubr.msk.bf16.mxu1 %vm2411_vm0, %v2410_v0 }
 0x8f5   : > { %v2219_v27 = vpop.f32.mrf.mxu0 }
 0x8f6   : > { %v1577_v27 = vrot.slane %v2615_v33, %v1576_v25 }
 0x8f7   : > { %v1433_v28 = vpop.f32.mrf.mxu0 }
 0x8f8   : > { %v1434_v29 = vadd.f32 %v2645_v57, %v1433_v28 }
 0x8f9   : > { %v2230_v30 = vpop.f32.mrf.mxu0 }
 0x8fa   : > { %v1439_v32 = vsel %vm962_vm5, %v1434_v29, -inf }
 0x8fb   : > { %1440 = vmax.xlane.f32.xlu0 %v1439_v32  ;;  %v1436_v34 = vpop.f32.mrf.mxu0 }
 0x8fc   : > { %v2325_v34 = vld [vmem:[%s2749_s6 + $0x8] sm:$0xff]  }
 0x8fd   : > { %v2231_v35 = vpop.f32.mrf.mxu0 }
 0x8fe   : > { %v2326_v35 = vld [vmem:[%s2749_s6] sm:$0xff]  }
 0x911   : > { %1451 = vrot.lane.b32.xlu0 %v2623_v45, %s2418_s21 }
 0x984   : > { %v1441_v36 = vpop.xlane.xlu0 %1440 }
 0x985   : > { %v1442_v37 = vsub.f32 %v1434_v29, %v1441_v36  ;;  %v2081_v36 = vld [vmem:[%s662_s0] ss:$0 sm:$0xff] }
 0x987   : > { %v1443_v38 = vmul.f32 1.442695, %v1442_v37 }
 0x988   : > { %v1452_v39 = vpop.permute.xlu0 %1451 }
 0x989   : > { %2343 = vpow2.f32 %v1443_v38  ;;  %v1457_v40 = vsel %vm981_vm6, %v1452_v39, 0 }
 0x98a   : > { %2233 = vmatpush3.bf16.msra.mxu1 %v1457_v40 }
 0x98b   : > { %2244 = vmatprep.subr.bf16.mxu1 %v2410_v0 }
 0x996   : > { %v2344_v57 = vpop.eup %2343 }
 0x997   : > { %v1445_v41 = vsel %vm962_vm5, %v2344_v57, 0.0 }
 0x998   : > { %1446 = vadd.xlane.f32.xlu1 %v1445_v41 }
 0x9b2   : > { %v1382_v43 = vpop.f32.mrf.mxu1 }
 0x9b3   : > { %v1388_v45 = vadd.f32 %v1382_v43, %v1226_v42  ;;  %v1727_v43 = vsub.s32 4, %v2609_v31 }
 0x9b4   : > { %v2224_v44 = vpop.f32.mrf.mxu1 }
 0x9b6   : > { %v1385_v48 = vpop.f32.mrf.mxu1 }
 0x9b8   : > { %v2225_v49 = vpop.f32.mrf.mxu1 }
 0xa21   : > { %v1447_v50 = vpop.xlane.xlu1 %1446 }
 0xa22   : > { %2345 = vrcp.f32 %v1447_v50 }
 0xa2f   : > { %v2346_v51 = vpop.eup %2345 }
 0xa30   : > { %v1449_v54 = vmul.f32 %v2346_v51, %v2344_v57 }
 0xa32   : > { %v1450_v55 = vpack.c.bf16 %v1449_v54, %v1449_v54 }
 0xa34   : > { %2235 = vmatmul.mubr.msk.bf16.vlgmr.msra.gmra.mxu1 %vm962_vm5, %v1450_v55 }
 0xa35   : > { %2248 = vmatprep.mubr.msk.bf16.mxu1 %vm2411_vm0, %v2410_v0 }
 0xaf4   : > { %v1493_v53 = vpop.f32.mrf.mxu1 }
 0xaf5   : > { %v1499_v56 = vpack.c.bf16 %v1493_v53, %v1493_v53 }
 0xaf6   : > { %v2236_v58 = vpop.f32.mrf.mxu1 }
 0xaf7   : > { %2241 = vmatmul.mubr.msk.bf16.vlgmr.msra.gmra.mxu0 %vm915_vm4, %v1499_v56 }
 0xaf8   : > { %v1496_v59 = vpop.f32.mrf.mxu1  ;;  %2260 = vmatprep.mubr.msk.bf16.mxu0 %vm2411_vm0, %v2410_v0  ;;  %2253 = vmatpush3.bf16.msra.mxu0 %v2323_v12 }
 0xaf9   : > { %2254 = vmatprep.subr.bf16.mxu0 %v2410_v0 }
 0xafa   : > { %v2237_v60 = vpop.f32.mrf.mxu1 }
 0xafc   : > { %2255 = vmatpush3.bf16.msra.mxu0 %v2324_v13 }
 0xafd   : > { %2256 = vmatprep.subr.bf16.mxu0 %v2410_v0 }
 0xb00   : > { %2257 = vmatpush3.bf16.msra.mxu0 %v2325_v34 }
 0xb01   : > { %2258 = vmatprep.subr.bf16.mxu0 %v2410_v0 }
 0xb04   : > { %2259 = vmatpush3.bf16.msra.mxu0 %v2326_v35 }
 0xbb7   : > { %v1540_v61 = vpop.f32.mrf.mxu0 }
 0xbb8   : > { %v1546_v62 = vadd.f32 %v1540_v61, %v1388_v45 }
 0xbb9   : > { %v2242_v63 = vpop.f32.mrf.mxu0 }
 0xbba   : > { %v2734_v1 = vadd.f32 %v1546_v62, %v2567_v5  ;;  %v2321_v5 = vld [vmem:[%s659_s18 + $0x8] sm:$0xff]  }
 0xbbb   : > { %v1543_v2 = vpop.f32.mrf.mxu0  ;;  %2245 = vmatpush3.bf16.msra.mxu1 %v2321_v5 }
 0xbbc   : > { %v1548_v3 = vsel %vm705_vm1, %v2734_v1, 0.0  ;;  %2246 = vmatprep.subr.bf16.mxu1 %v2410_v0  ;;  %v1728_v0 = vrot.slane %v2615_v33, %v1727_v43 }
 0xbbd   : > { %1549 = vadd.xlane.f32.xlu1 %v1548_v3  ;;  %v2243_v4 = vpop.f32.mrf.mxu0 }
 0xbbf   : > { %2247 = vmatpush3.bf16.msra.mxu1 %v2322_v11 }
 0xc46   : > { %v1550_v6 = vpop.xlane.xlu1 %1549 }
 0xc47   : > { %v1551_v7 = vmul.f32 0.03125, %v1550_v6 }
 0xc49   : > { %v1552_v8 = vsub.f32 %v2734_v1, %v1551_v7 }
 0xc4b   : > { %v1553_v9 = vmul.f32 %v1552_v8, %v1552_v8  ;;  %v1572_v26 = vmul.f32 %v1571_v24, %v1552_v8 }
 0xc4d   : > { %v1554_v10 = vsel %vm705_vm1, %v1553_v9, 0.0 }
 0xc4e   : > { %1555 = vadd.xlane.f32.xlu1 %v1554_v10 }
 0xcd7   : > { %v1556_v52 = vpop.xlane.xlu1 %1555 }
 0xcd8   : > { %v1557_v14 = vmul.f32 0.032258064, %v1556_v52 }
 0xcda   : > { %2347 = vrsqrt.f32 %v1557_v14  ;;  %vm1560_vm8 = vcmp.eq.f32.partialorder %v1557_v14, inf  ;;  %v1563_v19 = vand.u32 2147483648, %v1557_v14  ;;  %vm1562_vm9 = vcmp.eq.f32.partialorder %v1557_v14, 0.0 }
 0xce7   : > { %v2348_v15 = vpop.eup %2347 }
 0xce8   : > { %v1559_v16 = vmul.f32 %v2348_v15, %v1557_v14 }
 0xcea   : > { %v1561_v20 = vsel %vm1560_vm8, %v1557_v14, %v1559_v16 }
 0xceb   : > { %v1564_v21 = vsel %vm1562_vm9, %v1563_v19, %v1561_v20 }
 0xcec   : > { %v1565_v22 = vadd.f32 1e-06, %v1564_v21 }
 0xcee   : > { %2349 = vrcp.f32 %v1565_v22 }
 0xcfb   : > { %v2350_v28 = vpop.eup %2349 }
 0xcfc   : > { %v1573_v29 = vmul.f32 %v2350_v28, %v1572_v26 }
 0xcfe   : > { %v1578_v30 = vadd.f32 %v1577_v27, %v1573_v29 }
 0xd00   : > { %v1579_v32 = vpack.c.bf16 %v1578_v30, %v1578_v30 }
 0xd02   : > { %2249 = vmatmul.mubr.msk.bf16.vlgmr.msra.gmra.mxu1 %vm705_vm1, %v1579_v32 }
 0xdc2   : > { %v1640_v37 = vpop.f32.mrf.mxu1 }
 0xdc3   : > { %v1641_v38 = vadd.f32 %v2081_v36, %v1640_v37 }
 0xdc4   : > { %v2250_v39 = vpop.f32.mrf.mxu1 }
 0xdc5   : > { %v1646_v40 = vmax.f32 %v1641_v38, 0.0 }
 0xdc6   : > { %v1643_v57 = vpop.f32.mrf.mxu1 }
 0xdc7   : > { %v1647_v41 = vpack.c.bf16 %v1646_v40, %v1646_v40 }
 0xdc8   : > { %v2251_v42 = vpop.f32.mrf.mxu1 }
 0xdc9   : > { %2261 = vmatmul.mubr.msk.bf16.vlgmr.msra.gmra.mxu0 %vm1680_vm10, %v1647_v41 }
 0xe89   : > { %v1718_v45 = vpop.f32.mrf.mxu0 }
 0xe8a   : > { %v1724_v44 = vadd.f32 %v1718_v45, %v2734_v1 }
 0xe8b   : > { %v2262_v46 = vpop.f32.mrf.mxu0 }
 0xe8c   : > { %v1729_v47 = vadd.f32 %v1728_v0, %v1724_v44 }
 0xe8d   : > { %v1721_v48 = vpop.f32.mrf.mxu0 }
 0xe8e   : > { %v1730_v49 = vsel %vm705_vm1, %v1729_v47, 0.0 }
 0xe8f   : > { %v1731_v50 = vrot.slane %v1730_v49, 4  ;;  %v2263_v51 = vpop.f32.mrf.mxu0 }
 0xe91   : > { %v1732_v54 = vadd.f32 %v1731_v50, %v1730_v49 }
 0xe93   : > { %v1733_v55 = vrot.slane %v1732_v54, 2 }
 0xe95   : > { %v1734_v53 = vadd.f32 %v1733_v55, %v1732_v54 }
 0xe97   : > { %v1735_v56 = vrot.slane %v1734_v53, 1  ;;  %1742 = sbr.rel (%p2090_p12) target bundleno = 3742 (0xe9e), region = 76 }
 0xe99   : > { %v1736_v58 = vadd.f32 %v1735_v56, %v1734_v53 }
 0xe9b   : > { %v1738_v59 = vmul.f32 0.125, %v1736_v58 }
 0xe9c   : > { %vm1743_vm11 = vcmask 253952   ;;  %v2419_v31 = vmov 0.0  }
 0xe9d   : > { %1744 = vst.msk [vmem:[#allocation2] sm:$0x1] %vm1743_vm11, %v2419_v31 }
 0xe9e PF: > { %s1746_s29 = sshra.s32 %s2391_s23, 7  ;;  %s1751_s19 = sand.u32 127, %s2391_s23  ;;  %vm1757_vm12 = vcmask 253952  }
 0xe9f   : > { %s1748_s21 = sadd.s32 %s2395_s24, %s1746_s29  ;;  %p2092_p13 = scmp.ne.s32.totalorder %s2391_s23, 2 }
 0xea0   : > { %s2091_s22 = sshll.u32 %s1748_s21, 7 }
 0xea1   : > { %s1752_s17 = sadd.s32 %s2091_s22, %s1751_s19 }
 0xea2   : > { %s1753_s18 = sld [smem:[#allocation4 + %s1752_s17]] }
 0xea4   : > { %v1745_v33 = vld [vmem:[#allocation2] sm:$0x1] }
 0xea8   : > { %v1754_v60 = vstv %s1753_s18 }
 0xea9   : > { %v1755_v61 = vmul.f32 %v1754_v60, %v1738_v59  ;;  %1762 = sbr.rel (%p2092_p13) target bundleno = 4080 (0xff0), region = 80 }
 0xeab   : > { %v1756_v62 = vadd.f32 %v1755_v61, %v1745_v33 }
 0xead   : > { %1758 = vst.msk [vmem:[#allocation2] sm:$0x1] %vm1757_vm12, %v1756_v62 }
 0xeae   : > { %vm1773_vm13 = vcmask 254976   ;;  %v2094_v21 = vld [vmem:[%s2815_s4] ss:$0 sm:$0xff] }
 0xeaf   : > { %v2095_v23 = vld [vmem:[%s2816_s5] ss:$0 sm:$0xff] }
 0xeb4   : > { %v2093_v63 = vld [vmem:[#allocation2] ss:$0 sm:$0xff] }
 0xeb5   : > { %v1770_v1 = vadd.f32 %v2093_v63, %v2592_v17  ;;  %v1771_v2 = vadd.f32 %v2093_v63, %v2594_v18 }
 0xeb7   : > { %v1777_v3 = vsel %vm705_vm1, %v1770_v1, 0.0  ;;  %1772 = vst.msk [vmem:[%s2585_s27] sm:$0xff] %vm705_vm1, %v1770_v1  ;;  %v1780_v4 = vsel %vm1773_vm13, %v1771_v2, 0.0 }
 0xeb8   : > { %1774 = vst.msk [vmem:[%s2585_s27 + $0x8] sm:$0x3] %vm1773_vm13, %v1771_v2  ;;  %1778 = vadd.xlane.f32.xlu0 %v1777_v3 }
 0xebc   : > { %1781 = vadd.xlane.f32.xlu0 %v1780_v4 }
 0xf41   : > { %v1779_v6 = vpop.xlane.xlu0 %1778 }
 0xf42   : > { %v1783_v7 = vmul.f32 0.03125, %v1779_v6 }
 0xf44   : > { %v1785_v8 = vsub.f32 %v1770_v1, %v1783_v7 }
 0xf45   : > { %v1782_v9 = vpop.xlane.xlu0 %1781 }
 0xf46   : > { %v1784_v10 = vmul.f32 0.03125, %v1782_v9  ;;  %v1787_v5 = vmul.f32 %v1785_v8, %v1785_v8 }
 0xf48   : > { %v1786_v17 = vsub.f32 %v1771_v2, %v1784_v10  ;;  %v1789_v18 = vsel %vm705_vm1, %v1787_v5, 0.0 }
 0xf49   : > { %1790 = vadd.xlane.f32.xlu1 %v1789_v18 }
 0xf4a   : > { %v1788_v11 = vmul.f32 %v1786_v17, %v1786_v17 }
 0xf4c   : > { %v1792_v12 = vsel %vm1773_vm13, %v1788_v11, 0.0 }
 0xf4d   : > { %1793 = vadd.xlane.f32.xlu1 %v1792_v12 }
 0xfd2   : > { %v1791_v13 = vpop.xlane.xlu1 %1790 }
 0xfd3   : > { %v1795_v52 = vmul.f32 0.03125, %v1791_v13 }
 0xfd5   : > { %v1797_v14 = vadd.f32 1e-05, %v1795_v52 }
 0xfd6   : > { %v1794_v15 = vpop.xlane.xlu1 %1793 }
 0xfd7   : > { %2351 = vrsqrt.f32 %v1797_v14  ;;  %v1796_v16 = vmul.f32 0.03125, %v1794_v15 }
 0xfd9   : > { %v1798_v19 = vadd.f32 1e-05, %v1796_v16 }
 0xfdb   : > { %2353 = vrsqrt.f32 %v1798_v19 }
 0xfe4   : > { %v2352_v20 = vpop.eup %2351 }
 0xfe5   : > { %v1801_v22 = vmul.f32 %v2352_v20, %v1785_v8 }
 0xfe7   : > { %v1809_v24 = vmul.f32 %v2094_v21, %v1801_v22 }
 0xfe8   : > { %v2354_v25 = vpop.eup %2353 }
 0xfe9   : > { %v1817_v26 = vadd.f32 %v2095_v23, %v1809_v24  ;;  %v1802_v27 = vmul.f32 %v2354_v25, %v1786_v17 }
 0xfeb   : > { %1819 = vst.msk [vmem:[%s2590_s28] sm:$0xff] %vm705_vm1, %v1817_v26  ;;  %v1810_v28 = vmul.f32 %v2094_v21, %v1802_v27 }
 0xfed   : > { %v1818_v29 = vadd.f32 %v2095_v23, %v1810_v28 }
 0xfef   : > { %1820 = vst.msk [vmem:[%s2590_s28 + $0x8] sm:$0x3] %vm1773_vm13, %v1818_v29 }
 0xff0 PF: > { %s32_s26 = sadd.s32 1, %s2407_s26   ;;  %s2837_s23 = sld [smem:[#allocation6_spill]] }
 0xff1   : > { %p29_p0 = scmp.ge.s32.totalorder %s32_s26, 8   ;;  %s2838_s24 = sld [smem:[#allocation7_spill]] }
 0xff2   : > { %s2839_s25 = sld [smem:[#allocation8_spill]] }
 0xff3   : > { %s2840_s0 = sld [smem:[#allocation9_spill]]  ;;  %31 = sbr.rel (!%p29_p0) target bundleno = 19 (0x13), region = 152 }

// kernel: moe_encoder_forward.3
= control target key start
LH: loop header
LB: loop body
LE: loop exit
PB: predicated region body
PF: predicated region fallthrough
CT: control target
= control target key end

     0   :  { %s2478_s27 = smov 0   ;;  %s2480_s28 = smov 0   ;;  %s2815_s0 = inlined_call_operand.vmem [shape: f32[2,10,32], index: 0, kind: input, shape index: {}]   ;;  %s2816_s1 = inlined_call_operand.vmem [shape: f32[2,1,10], index: 1, kind: input, shape index: {}]   ;;  %s2817_s2 = inlined_call_operand.vmem [shape: bf16[2,32,96], index: 2, kind: input, shape index: {}]   ;;  %s2818_s3 = inlined_call_operand.vmem [shape: bf16[2,32,32], index: 3, kind: input, shape index: {}]   ;;  %s2819_s4 = inlined_call_operand.vmem [shape: bf16[2,96,64], index: 4, kind: input, shape index: {}]   ;;  %s2820_s5 = inlined_call_operand.vmem [shape: f32[2,1,64], index: 5, kind: input, shape index: {}]   ;;  %s2821_s6 = inlined_call_operand.vmem [shape: bf16[2,192,32], index: 6, kind: input, shape index: {}]   ;;  %s2822_s7 = inlined_call_operand.vmem [shape: f32[2,7,32], index: 7, kind: input, shape index: {}]   ;;  %s2823_s8 = inlined_call_operand.vmem [shape: f32[2,10,32], index: 8, kind: output, shape index: {}]  }
   0x1   :  { %2824 = sst [smem:[#allocation5_spill]] %s2815_s0  ;;  %s2482_s29 = smov 0  }
   0x2   :  { %2825 = sst [smem:[#allocation6_spill]] %s2816_s1  ;;  %s2484_s30 = smov 0  }
   0x3   :  { %2826 = sst [smem:[#allocation7_spill]] %s2817_s2  ;;  %s2486_s9 = smov 0  }
   0x4   :  { %2827 = sst [smem:[#allocation8_spill]] %s2818_s3 }
   0x5 LB: > { %s27_s10 = sadd.s32 1, %s2410_s29  ;;  %s30_s11 = sadd.s32 1, %s2414_s30  ;;  %s2418_s9 = sphi %s2486_s9, %s18_s9   ;;  %s2414_s30 = sphi %s2484_s30, %s2839_s30   ;;  %s2410_s29 = sphi %s2482_s29, %s2838_s29   ;;  %s2406_s28 = sphi %s2480_s28, %s2837_s28   ;;  %s2402_s27 = sphi %s2478_s27, %s2836_s27  }
   0x6   : > { %p28_p0 = scmp.ge.s32.totalorder %s27_s10, 2  ;;  %p2001_p1 = scmp.ge.s32.totalorder %s2418_s9, 1 }
   0x7   : > { %p339_p2 = scmp.lt.s32.totalorder %s2418_s9, 5 }
   0x8   : > { %s2841_s10 = smov (%p28_p0, %s27_s10), 0  ;;  %s2843_s11 = smov (!%p28_p0, %s30_s11), %s2414_s30 }
   0x9   : > { %2828 = sst [smem:[#allocation3_spill]] %s2841_s10  ;;  %p340_p3 = pnand %p2001_p1, %p339_p2 }
   0xa   : > { %p32_p4 = scmp.ge.s32.totalorder %s2843_s11, 2  ;;  %p403_p5 = scmp.lt.s32.totalorder (!%p340_p3), %s2406_s28, 1 }
   0xb   : > { %343 = sbr.rel (%p340_p3) target bundleno = 3925 (0xf55), region = 52  ;;  %p411_p6 = scmp.lt.s32.totalorder (!%p340_p3), %s2402_s27, 1 }
   0xc   : > { %s2845_s11 = smov (%p32_p4, %s2843_s11), 0  ;;  %s2830_s1 = sld [smem:[#allocation6_spill]] (!%p340_p3) }
   0xd   : > { %2829 = sst [smem:[#allocation4_spill]] %s2845_s11  ;;  %p2013_p7 = scmp.ne.s32.totalorder (!%p340_p3), %s2402_s27, 0 }
   0xe   : > { %s2831_s0 = sld [smem:[#allocation5_spill]] (!%p340_p3) }
   0xf   : > { %s2832_s2 = sld [smem:[#allocation7_spill]] (!%p340_p3) }
  0x10   : > { %s2847_s28 = smov (!%p403_p5, %s2406_s28), 1  ;;  %s2833_s3 = sld [smem:[#allocation8_spill]] }
  0x11   : > { %s2512_s12 = scalar_select %p411_p6, %s2402_s27, 1 }
  0x12   : > { %s2058_s13 = sshll.u32 %s2847_s28, 4  ;;  %s410_s16 = scalar_lea.vmem %s2830_s1, %s2847_s28 }
  0x13   : > { %s2059_s20 = sshll.u32 %s2512_s12, 4  ;;  %v2521_v0 = vld [vmem:[%s410_s16] ss:$0 sm:$0xff]  ;;  %s2253_s11 = smul.u32 48, %s2512_s12 }
  0x14   : > { %s407_s19 = scalar_lea.vmem %s2831_s0, %s2058_s13  ;;  %s428_s15 = scalar_lea.vmem %s2820_s5, %s2512_s12 }
  0x15   : > { %s2526_s23 = scalar_lea.vmem %s2832_s2, %s2059_s20  ;;  %s2254_s17 = smul.u32 96, %s2512_s12 }
  0x16   : > { %s2531_s26 = scalar_lea.vmem %s2833_s3, %s2059_s20  ;;  %s2010_s18 = sshll.u32 %s2512_s12, 3 }
  0x17   : > { %s2543_s1 = scalar_lea.vmem %s2819_s4, %s2253_s11  ;;  %s437_s2 = scalar_lea.vmem %s2822_s7, %s2010_s18 }
  0x18   : > { %s2551_s20 = scalar_lea.vmem %s2821_s6, %s2254_s17  ;;  %s2556_s14 = scalar_lea.vmem %s2823_s8, %s2058_s13  ;;  %v2558_v1 = vld [vmem:[%s437_s2] sm:$0x7f] }
  0x19   : > { %449 = sbr.rel (%p2013_p7) target bundleno = 33 (0x21), region = 56 }
  0x1e   : > { %v450_v2 = vld [vmem:[%s407_s19] sm:$0xff]  ;;  %vm452_vm0 = vcmask 261120   ;;  %v451_v3 = vld [vmem:[%s407_s19 + $0x8] sm:$0x3]  ;;  %vm454_vm1 = vcmask 254976  }
  0x1f   : > { %453 = vst.msk [vmem:[#allocation2] sm:$0xff] %vm452_vm0, %v450_v2 }
  0x20   : > { %455 = vst.msk [vmem:[#allocation2 + $0x8] sm:$0x3] %vm454_vm1, %v451_v3 }
  0x21 PF: > { %vm458_vm2 = vcmask 261120   ;;  %vm462_vm3 = vcmask 254976   ;;  %v2308_v18 = vld [vmem:[%s2526_s23 + $0x8] sm:$0xff]   ;;  %v2420_v19 = vmov 0.0   ;;  %vm2421_vm4 = vmmov 0   ;;  %v2309_v20 = vld [vmem:[%s2526_s23] sm:$0xff]  }
  0x22   : > { %2113 = vmatprep.subr.bf16.mxu1 %v2420_v19  ;;  %2117 = vmatprep.mubr.msk.bf16.mxu1 %vm2421_vm4, %v2420_v19  ;;  %v501_v31 = vlaneseq  ;;  %s2422_s0 = smov 88   ;;  %s2423_s2 = smov 96   ;;  %vm593_vm9 = vcmask 64512   ;;  %vm641_vm10 = vcmask 80896   ;;  %vm645_vm11 = vcmask 74752  }
  0x23   : > { %2114 = vmatpush3.bf16.msra.mxu1 %v2308_v18  ;;  %2127 = vmatprep.subr.bf16.mxu0 %v2420_v19  ;;  %s2424_s3 = smov 120   ;;  %s2425_s10 = smov 64   ;;  %vm671_vm12 = vcmask 1044480   ;;  %vm845_vm13 = vcmask 1043456  }
  0x24   : > { %2115 = vmatprep.subr.bf16.mxu1 %v2420_v19  ;;  %2129 = vmatprep.mubr.msk.bf16.mxu0 %vm2421_vm4, %v2420_v19  ;;  %v2583_v37 = vshrl.u32 %v501_v31, 7  ;;  %s2426_s11 = smov 80   ;;  %s2427_s13 = smov 112  }
  0x25   : > { %s2428_s19 = smov 56   ;;  %s2429_s23 = smov 48  }
  0x26   : > { %v2561_v4 = vld [vmem:[#allocation2] sm:$0xff]  ;;  %v503_v39 = vsub.s32 0, %v2583_v37  ;;  %v511_v41 = vsub.s32 1, %v2583_v37  ;;  %s2430_s28 = smov 104   ;;  %s2431_s17 = smov 72  }
  0x27   : > { %v2563_v5 = vld [vmem:[#allocation2 + $0x8] sm:$0x3]  ;;  %v459_v6 = vsel %vm458_vm2, %v2561_v4, 0.0  ;;  %2116 = vmatpush3.bf16.msra.mxu1 %v2309_v20  ;;  %s2432_s18 = smov 40   ;;  %p2055_p8 = scmp.ne.s32.totalorder %s2402_s27, 1 }
  0x28   : > { %460 = vadd.xlane.f32.xlu0 %v459_v6  ;;  %v463_v7 = vsel %vm462_vm3, %v2563_v5, 0.0  ;;  %2121 = vmatprep.subr.bf16.mxu1 %v2420_v19  ;;  %v504_v40 = vrot.slane %v2558_v1, %v503_v39  ;;  %v512_v46 = vrot.slane %v2558_v1, %v511_v41 }
  0x2c   : > { %464 = vadd.xlane.f32.xlu0 %v463_v7 }
  0xb1   : > { %v461_v8 = vpop.xlane.xlu0 %460 }
  0xb2   : > { %v467_v9 = vmul.f32 0.03125, %v461_v8 }
  0xb4   : > { %v469_v10 = vsub.f32 %v2561_v4, %v467_v9 }
  0xb5   : > { %v465_v11 = vpop.xlane.xlu0 %464 }
  0xb6   : > { %v468_v12 = vmul.f32 0.03125, %v465_v11  ;;  %v471_v13 = vmul.f32 %v469_v10, %v469_v10  ;;  %v505_v43 = vmul.f32 %v504_v40, %v469_v10 }
  0xb8   : > { %v470_v14 = vsub.f32 %v2563_v5, %v468_v12  ;;  %v473_v15 = vsel %vm458_vm2, %v471_v13, 0.0 }
  0xb9   : > { %474 = vadd.xlane.f32.xlu1 %v473_v15 }
  0xba   : > { %v472_v16 = vmul.f32 %v470_v14, %v470_v14  ;;  %v506_v44 = vmul.f32 %v504_v40, %v470_v14 }
  0xbc   : > { %v476_v17 = vsel %vm462_vm3, %v472_v16, 0.0 }
  0xbd   : > { %477 = vadd.xlane.f32.xlu1 %v476_v17 }
 0x142   : > { %v475_v21 = vpop.xlane.xlu1 %474 }
 0x143   : > { %v479_v22 = vmul.f32 0.032258064, %v475_v21 }
 0x145   : > { %2328 = vrsqrt.f32 %v479_v22  ;;  %vm483_vm5 = vcmp.eq.f32.partialorder %v479_v22, inf  ;;  %v486_v27 = vand.u32 2147483648, %v479_v22  ;;  %vm485_vm6 = vcmp.eq.f32.partialorder %v479_v22, 0.0 }
 0x146   : > { %v478_v23 = vpop.xlane.xlu1 %477 }
 0x147   : > { %v480_v24 = vmul.f32 0.032258064, %v478_v23 }
 0x149   : > { %2330 = vrsqrt.f32 %v480_v24  ;;  %vm490_vm7 = vcmp.eq.f32.partialorder %v480_v24, inf  ;;  %v493_v34 = vand.u32 2147483648, %v480_v24  ;;  %vm492_vm8 = vcmp.eq.f32.partialorder %v480_v24, 0.0 }
 0x152   : > { %v2329_v25 = vpop.eup %2328 }
 0x153   : > { %v482_v26 = vmul.f32 %v2329_v25, %v479_v22 }
 0x155   : > { %v484_v28 = vsel %vm483_vm5, %v479_v22, %v482_v26  ;;  %vm1354_vm5 = vcmask 1040384  }
 0x156   : > { %v2331_v29 = vpop.eup %2330  ;;  %v487_v30 = vsel %vm485_vm6, %v486_v27, %v484_v28  ;;  %vm1475_vm6 = vcmask 1046528  }
 0x157   : > { %v495_v32 = vadd.f32 1e-06, %v487_v30  ;;  %v489_v33 = vmul.f32 %v2331_v29, %v480_v24 }
 0x159   : > { %2332 = vrcp.f32 %v495_v32  ;;  %v491_v35 = vsel %vm490_vm7, %v480_v24, %v489_v33  ;;  %vm1609_vm7 = vcmask 523264  }
 0x15a   : > { %v494_v36 = vsel %vm492_vm8, %v493_v34, %v491_v35 }
 0x15b   : > { %v496_v38 = vadd.f32 1e-06, %v494_v36 }
 0x15d   : > { %2334 = vrcp.f32 %v496_v38 }
 0x166   : > { %v2333_v42 = vpop.eup %2332 }
 0x167   : > { %v507_v45 = vmul.f32 %v2333_v42, %v505_v43 }
 0x169   : > { %v513_v49 = vadd.f32 %v512_v46, %v507_v45 }
 0x16a   : > { %v2335_v47 = vpop.eup %2334 }
 0x16b   : > { %v508_v48 = vmul.f32 %v2335_v47, %v506_v44 }
 0x16d   : > { %v514_v50 = vadd.f32 %v512_v46, %v508_v48 }
 0x16f   : > { %v515_v51 = vpack.c.bf16 %v514_v50, %v513_v49 }
 0x171   : > { %2118 = vmatmul.mubr.msk.bf16.vlgmr.msra.gmra.mxu1 %vm458_vm2, %v515_v51 }
 0x172   : > { %2123 = vmatprep.mubr.msk.bf16.mxu1 %vm2421_vm4, %v2420_v19 }
 0x231   : > { %v569_v52 = vpop.f32.mrf.mxu1 }
 0x232   : > { %v580_v58 = vmul.f32 0.35355338, %v569_v52 }
 0x233   : > { %v2119_v53 = vpop.f32.mrf.mxu1 }
 0x235   : > { %v572_v54 = vpop.f32.mrf.mxu1 }
 0x236   : > { %v581_v55 = vmul.f32 0.35355338, %v572_v54  ;;  %v2592_v56 = vpack.c.bf16 %v572_v54, %v569_v52 }
 0x237   : > { %v2120_v57 = vpop.f32.mrf.mxu1 }
 0x238   : > { %720 = vrot.lane.b32.xlu1 %v2592_v56, %s2422_s0  ;;  %591 = vrot.lane.b32.xlu0 %v2592_v56, %s2423_s2  ;;  %v2596_v59 = vpack.c.bf16 %v581_v55, %v580_v58 }
 0x23c   : > { %718 = vrot.lane.b32.xlu1 %v2596_v59, %s2424_s3 }
 0x2aa   : > { %v592_v60 = vpop.permute.xlu0 %591  ;;  %v721_v62 = vpop.permute.xlu1 %720 }
 0x2ab   : > { %v598_v61 = vsel %vm593_vm9, %v592_v60, 0  ;;  %v726_v63 = vsel %vm593_vm9, %v721_v62, 0 }
 0x2ac   : > { %2122 = vmatpush3.bf16.xpose.msra.mxu1 %v598_v61 }
 0x2ad   : > { %2133 = vmatprep.subr.bf16.mxu1 %v2420_v19 }
 0x2ae   : > { %v719_v2 = vpop.permute.xlu1 %718 }
 0x2b3   : > { %2124 = vmatmul.mubr.msk.bf16.vlgmr.msra.gmra.mxu1 %vm593_vm9, %v2596_v59 }
 0x2b4   : > { %2134 = vmatpush3.bf16.xpose.msra.mxu1 %v726_v63  ;;  %2135 = vmatprep.mubr.msk.bf16.mxu1 %vm2421_vm4, %v2420_v19  ;;  %v576_v63 = vld [vmem:[%s2531_s26] sm:$0xf] }
 0x2b5   : > { %2145 = vmatprep.subr.bf16.mxu1 %v2420_v19 }
 0x2bb   : > { %2136 = vmatmul.mubr.msk.bf16.vlgmr.msra.gmra.mxu1 %vm593_vm9, %v719_v2  ;;  %v894_v2 = vsel %vm845_vm13, %v576_v63, 0  ;;  %v578_v63 = vld [vmem:[%s2531_s26 + $0x8] sm:$0xf] }
 0x2bc   : > { %2147 = vmatprep.mubr.msk.bf16.mxu1 %vm2421_vm4, %v2420_v19 }
 0x373   : > { %v634_v3 = vpop.f32.mrf.mxu1 }
 0x374   : > { %v635_v6 = vadd.f32 %v2521_v0, %v634_v3  ;;  %v577_v3 = vld [vmem:[%s2531_s26 + $0x4] sm:$0xf] }
 0x375   : > { %v2125_v7 = vpop.f32.mrf.mxu1 }
 0x376   : > { %v642_v8 = vsel %vm641_vm10, %v635_v6, -inf }
 0x377   : > { %643 = vmax.xlane.f32.xlu1 %v642_v8  ;;  %v637_v9 = vpop.f32.mrf.mxu1 }
 0x378   : > { %v638_v10 = vadd.f32 %v2521_v0, %v637_v9 }
 0x379   : > { %v2126_v11 = vpop.f32.mrf.mxu1 }
 0x37a   : > { %v646_v12 = vsel %vm645_vm11, %v638_v10, -inf }
 0x37b   : > { %647 = vmax.xlane.f32.xlu0 %v646_v12  ;;  %v762_v13 = vpop.f32.mrf.mxu1 }
 0x37c   : > { %v763_v14 = vadd.f32 %v2521_v0, %v762_v13 }
 0x37d   : > { %v2137_v15 = vpop.f32.mrf.mxu1 }
 0x37e   : > { %v769_v16 = vsel %vm641_vm10, %v763_v14, -inf }
 0x37f   : > { %770 = vmax.xlane.f32.xlu0 %v769_v16  ;;  %v765_v17 = vpop.f32.mrf.mxu1 }
 0x380   : > { %v766_v18 = vadd.f32 %v2521_v0, %v765_v17 }
 0x381   : > { %v2138_v20 = vpop.f32.mrf.mxu1 }
 0x382   : > { %v772_v21 = vsel %vm645_vm11, %v766_v18, -inf }
 0x383   : > { %773 = vmax.xlane.f32.xlu0 %v772_v21 }
 0x400   : > { %v644_v22 = vpop.xlane.xlu1 %643 }
 0x401   : > { %v649_v23 = vsub.f32 %v635_v6, %v644_v22  ;;  %v847_v6 = vsel %vm845_vm13, %v577_v3, 0 }
 0x402   : > { %2146 = vmatpush3.bf16.msra.mxu1 %v847_v6 }
 0x403   : > { %v651_v24 = vmul.f32 1.442695, %v649_v23  ;;  %2157 = vmatprep.subr.bf16.mxu1 %v2420_v19 }
 0x404   : > { %v648_v25 = vpop.xlane.xlu0 %647 }
 0x405   : > { %2336 = vpow2.f32 %v651_v24  ;;  %v650_v26 = vsub.f32 %v638_v10, %v648_v25 }
 0x407   : > { %v653_v27 = vmul.f32 1.442695, %v650_v26 }
 0x408   : > { %v771_v28 = vpop.xlane.xlu0 %770 }
 0x409   : > { %2338 = vpow2.f32 %v653_v27  ;;  %v775_v29 = vsub.f32 %v763_v14, %v771_v28 }
 0x40b   : > { %v777_v30 = vmul.f32 1.442695, %v775_v29 }
 0x40c   : > { %v774_v31 = vpop.xlane.xlu0 %773 }
 0x40d   : > { %2340 = vpow2.f32 %v777_v30  ;;  %v776_v32 = vsub.f32 %v766_v18, %v774_v31 }
 0x40f   : > { %v779_v33 = vmul.f32 1.442695, %v776_v32 }
 0x411   : > { %2342 = vpow2.f32 %v779_v33 }
 0x412   : > { %v2337_v34 = vpop.eup %2336 }
 0x413   : > { %v655_v35 = vsel %vm641_vm10, %v2337_v34, 0.0 }
 0x414   : > { %656 = vadd.xlane.f32.xlu1 %v655_v35 }
 0x416   : > { %v2339_v36 = vpop.eup %2338 }
 0x417   : > { %v658_v38 = vsel %vm645_vm11, %v2339_v36, 0.0 }
 0x418   : > { %659 = vadd.xlane.f32.xlu0 %v658_v38 }
 0x41a   : > { %v2341_v39 = vpop.eup %2340 }
 0x41b   : > { %v781_v40 = vsel %vm641_vm10, %v2341_v39, 0.0 }
 0x41c   : > { %782 = vadd.xlane.f32.xlu1 %v781_v40 }
 0x41e   : > { %v2343_v41 = vpop.eup %2342 }
 0x41f   : > { %v784_v42 = vsel %vm645_vm11, %v2343_v41, 0.0 }
 0x420   : > { %785 = vadd.xlane.f32.xlu0 %v784_v42 }
 0x42d   : > { %666 = vrot.lane.b32.xlu1 %v2592_v56, %s2425_s10 }
 0x431   : > { %939 = vrot.lane.b32.xlu1 %v2592_v56, %s2426_s11 }
 0x435   : > { %937 = vrot.lane.b32.xlu1 %v2596_v59, %s2427_s13 }
 0x436   : > { %792 = vrot.lane.b32.xlu0 %v2592_v56, %s2428_s19 }
 0x49d   : > { %v657_v43 = vpop.xlane.xlu1 %656 }
 0x49e   : > { %2344 = vrcp.f32 %v657_v43 }
 0x4a1   : > { %v660_v44 = vpop.xlane.xlu0 %659 }
 0x4a2   : > { %2346 = vrcp.f32 %v660_v44 }
 0x4a5   : > { %v783_v45 = vpop.xlane.xlu1 %782 }
 0x4a6   : > { %2348 = vrcp.f32 %v783_v45 }
 0x4a9   : > { %v667_v46 = vpop.permute.xlu1 %666  ;;  %v786_v47 = vpop.xlane.xlu0 %785 }
 0x4aa   : > { %2350 = vrcp.f32 %v786_v47  ;;  %v673_v48 = vsel %vm671_vm12, %v667_v46, 0 }
 0x4ab   : > { %2128 = vmatpush3.bf16.msra.mxu0 %v673_v48  ;;  %v2345_v49 = vpop.eup %2344 }
 0x4ac   : > { %2139 = vmatprep.subr.bf16.mxu0 %v2420_v19  ;;  %v663_v51 = vmul.f32 %v2345_v49, %v2337_v34 }
 0x4ad   : > { %v793_v53 = vpop.permute.xlu0 %792  ;;  %v940_v14 = vpop.permute.xlu1 %939 }
 0x4ae   : > { %v798_v55 = vsel %vm671_vm12, %v793_v53, 0  ;;  %v945_v18 = vsel %vm593_vm9, %v940_v14, 0 }
 0x4af   : > { %v2347_v50 = vpop.eup %2346 }
 0x4b0   : > { %v664_v52 = vmul.f32 %v2347_v50, %v2339_v36 }
 0x4b1   : > { %v938_v20 = vpop.permute.xlu1 %937 }
 0x4b2   : > { %v665_v54 = vpack.c.bf16 %v664_v52, %v663_v51 }
 0x4b3   : > { %v2349_v57 = vpop.eup %2348 }
 0x4b4   : > { %2130 = vmatmul.mubr.msk.bf16.vlgmr.msra.gmra.mxu0 %vm641_vm10, %v665_v54  ;;  %v789_v60 = vmul.f32 %v2349_v57, %v2341_v39 }
 0x4b5   : > { %2140 = vmatpush3.bf16.msra.mxu0 %v798_v55  ;;  %2141 = vmatprep.mubr.msk.bf16.mxu0 %vm2421_vm4, %v2420_v19 }
 0x4b6   : > { %2151 = vmatprep.subr.bf16.mxu0 %v2420_v19 }
 0x4b7   : > { %v2351_v58 = vpop.eup %2350 }
 0x4b8   : > { %v790_v61 = vmul.f32 %v2351_v58, %v2343_v41 }
 0x4ba   : > { %v791_v62 = vpack.c.bf16 %v790_v61, %v789_v60 }
 0x4bc   : > { %2142 = vmatmul.mubr.msk.bf16.vlgmr.msra.gmra.mxu0 %vm641_vm10, %v791_v62 }
 0x4bd   : > { %2153 = vmatprep.mubr.msk.bf16.mxu0 %vm2421_vm4, %v2420_v19  ;;  %2152 = vmatpush3.bf16.msra.mxu0 %v894_v2  ;;  %v1065_v2 = vsel %vm845_vm13, %v578_v63, 0 }
 0x4be   : > { %2163 = vmatprep.subr.bf16.mxu0 %v2420_v19 }
 0x574   : > { %v709_v7 = vpop.f32.mrf.mxu0 }
 0x576   : > { %v2131_v8 = vpop.f32.mrf.mxu0 }
 0x578   : > { %v712_v9 = vpop.f32.mrf.mxu0 }
 0x579   : > { %v716_v10 = vpack.c.bf16 %v712_v9, %v709_v7 }
 0x57a   : > { %v2132_v11 = vpop.f32.mrf.mxu0 }
 0x57b   : > { %2154 = vmatmul.mubr.msk.bf16.vlgmr.msra.gmra.mxu0 %vm593_vm9, %v716_v10 }
 0x57c   : > { %v834_v12 = vpop.f32.mrf.mxu0  ;;  %2165 = vmatprep.mubr.msk.bf16.mxu0 %vm2421_vm4, %v2420_v19 }
 0x57e   : > { %v2143_v13 = vpop.f32.mrf.mxu0 }
 0x580   : > { %v837_v15 = vpop.f32.mrf.mxu0 }
 0x581   : > { %v841_v16 = vpack.c.bf16 %v837_v15, %v834_v12 }
 0x582   : > { %v2144_v17 = vpop.f32.mrf.mxu0 }
 0x583   : > { %2148 = vmatmul.mubr.msk.bf16.vlgmr.msra.gmra.mxu1 %vm593_vm9, %v841_v16 }
 0x584   : > { %2158 = vmatpush3.bf16.xpose.msra.mxu1 %v945_v18  ;;  %2159 = vmatprep.mubr.msk.bf16.mxu1 %vm2421_vm4, %v2420_v19 }
 0x585   : > { %2169 = vmatprep.subr.bf16.mxu1 %v2420_v19 }
 0x58b   : > { %2160 = vmatmul.mubr.msk.bf16.vlgmr.msra.gmra.mxu1 %vm593_vm9, %v938_v20 }
 0x58c   : > { %2171 = vmatprep.mubr.msk.bf16.mxu1 %vm2421_vm4, %v2420_v19  ;;  %2170 = vmatpush3.bf16.msra.mxu1 %v1065_v2 }
 0x58d   : > { %2181 = vmatprep.subr.bf16.mxu1 %v2420_v19 }
 0x63b   : > { %v930_v21 = vpop.f32.mrf.mxu0 }
 0x63d   : > { %v2155_v22 = vpop.f32.mrf.mxu0 }
 0x63f   : > { %v933_v23 = vpop.f32.mrf.mxu0 }
 0x641   : > { %v2156_v24 = vpop.f32.mrf.mxu0 }
 0x643   : > { %v883_v25 = vpop.f32.mrf.mxu1 }
 0x644   : > { %v2653_v26 = vadd.f32 %v930_v21, %v883_v25 }
 0x645   : > { %v2149_v27 = vpop.f32.mrf.mxu1 }
 0x647   : > { %v886_v28 = vpop.f32.mrf.mxu1 }
 0x648   : > { %v2655_v29 = vadd.f32 %v933_v23, %v886_v28 }
 0x649   : > { %v2150_v30 = vpop.f32.mrf.mxu1 }
 0x64b   : > { %v981_v31 = vpop.f32.mrf.mxu1 }
 0x64c   : > { %v982_v32 = vadd.f32 %v2521_v0, %v981_v31 }
 0x64d   : > { %v2161_v33 = vpop.f32.mrf.mxu1 }
 0x64e   : > { %v988_v34 = vsel %vm641_vm10, %v982_v32, -inf }
 0x64f   : > { %989 = vmax.xlane.f32.xlu1 %v988_v34  ;;  %v984_v35 = vpop.f32.mrf.mxu1 }
 0x650   : > { %v985_v36 = vadd.f32 %v2521_v0, %v984_v35 }
 0x651   : > { %v2162_v38 = vpop.f32.mrf.mxu1 }
 0x652   : > { %v991_v39 = vsel %vm645_vm11, %v985_v36, -inf }
 0x653   : > { %992 = vmax.xlane.f32.xlu0 %v991_v39 }
 0x660   : > { %1011 = vrot.lane.b32.xlu1 %v2592_v56, %s2429_s23 }
 0x664   : > { %1110 = vrot.lane.b32.xlu1 %v2596_v59, %s2430_s28 }
 0x6d8   : > { %v990_v40 = vpop.xlane.xlu1 %989 }
 0x6d9   : > { %v994_v41 = vsub.f32 %v982_v32, %v990_v40 }
 0x6db   : > { %v996_v42 = vmul.f32 1.442695, %v994_v41 }
 0x6dc   : > { %v1012_v43 = vpop.permute.xlu1 %1011  ;;  %v993_v44 = vpop.xlane.xlu0 %992 }
 0x6dd   : > { %2352 = vpow2.f32 %v996_v42  ;;  %v1017_v45 = vsel %vm671_vm12, %v1012_v43, 0  ;;  %v995_v46 = vsub.f32 %v985_v36, %v993_v44 }
 0x6de   : > { %2164 = vmatpush3.bf16.msra.mxu0 %v1017_v45 }
 0x6df   : > { %v998_v47 = vmul.f32 1.442695, %v995_v46  ;;  %2175 = vmatprep.subr.bf16.mxu0 %v2420_v19 }
 0x6e0   : > { %v1111_v62 = vpop.permute.xlu1 %1110 }
 0x6e1   : > { %2354 = vpow2.f32 %v998_v47 }
 0x6ea   : > { %v2353_v48 = vpop.eup %2352 }
 0x6eb   : > { %v1000_v49 = vsel %vm641_vm10, %v2353_v48, 0.0 }
 0x6ec   : > { %1001 = vadd.xlane.f32.xlu0 %v1000_v49 }
 0x6ee   : > { %v2355_v50 = vpop.eup %2354 }
 0x6ef   : > { %v1003_v59 = vsel %vm645_vm11, %v2355_v50, 0.0 }
 0x6f0   : > { %1004 = vadd.xlane.f32.xlu0 %v1003_v59 }
 0x706   : > { %1112 = vrot.lane.b32.xlu0 %v2592_v56, %s2431_s17 }
 0x775   : > { %v1002_v51 = vpop.xlane.xlu0 %1001 }
 0x776   : > { %2356 = vrcp.f32 %v1002_v51 }
 0x779   : > { %v1005_v52 = vpop.xlane.xlu0 %1004 }
 0x77a   : > { %2358 = vrcp.f32 %v1005_v52 }
 0x77d   : > { %v1113_v58 = vpop.permute.xlu0 %1112 }
 0x77e   : > { %v1118_v61 = vsel %vm593_vm9, %v1113_v58, 0 }
 0x783   : > { %v2357_v53 = vpop.eup %2356 }
 0x784   : > { %v1008_v55 = vmul.f32 %v2357_v53, %v2353_v48 }
 0x787   : > { %v2359_v54 = vpop.eup %2358 }
 0x788   : > { %v1009_v57 = vmul.f32 %v2359_v54, %v2355_v50 }
 0x78a   : > { %v1010_v60 = vpack.c.bf16 %v1009_v57, %v1008_v55 }
 0x78c   : > { %2166 = vmatmul.mubr.msk.bf16.vlgmr.msra.gmra.mxu0 %vm641_vm10, %v1010_v60 }
 0x78d   : > { %2176 = vmatpush3.bf16.xpose.msra.mxu0 %v1118_v61  ;;  %2177 = vmatprep.mubr.msk.bf16.mxu0 %vm2421_vm4, %v2420_v19 }
 0x78e   : > { %2187 = vmatprep.subr.bf16.mxu0 %v2420_v19 }
 0x794   : > { %2178 = vmatmul.mubr.msk.bf16.vlgmr.msra.gmra.mxu0 %vm593_vm9, %v1111_v62 }
 0x795   : > { %2189 = vmatprep.mubr.msk.bf16.mxu0 %vm2421_vm4, %v2420_v19 }
 0x84c   : > { %v1053_v3 = vpop.f32.mrf.mxu0 }
 0x84e   : > { %v2167_v6 = vpop.f32.mrf.mxu0 }
 0x850   : > { %v1056_v7 = vpop.f32.mrf.mxu0 }
 0x851   : > { %v1060_v8 = vpack.c.bf16 %v1056_v7, %v1053_v3 }
 0x852   : > { %v2168_v9 = vpop.f32.mrf.mxu0 }
 0x853   : > { %2172 = vmatmul.mubr.msk.bf16.vlgmr.msra.gmra.mxu1 %vm593_vm9, %v1060_v8  ;;  %v2310_v9 = vld [vmem:[%s2543_s1 + $0x18] sm:$0xff]  }
 0x854   : > { %v1154_v10 = vpop.f32.mrf.mxu0  ;;  %2183 = vmatprep.mubr.msk.bf16.mxu1 %vm2421_vm4, %v2420_v19 }
 0x855   : > { %v1155_v11 = vadd.f32 %v2521_v0, %v1154_v10  ;;  %v2311_v10 = vld [vmem:[%s2543_s1 + $0x8] sm:$0xff]  }
 0x856   : > { %v2179_v12 = vpop.f32.mrf.mxu0 }
 0x857   : > { %v1161_v13 = vsel %vm641_vm10, %v1155_v11, -inf  ;;  %v2313_v12 = vld [vmem:[%s2543_s1] sm:$0xff]  }
 0x858   : > { %1162 = vmax.xlane.f32.xlu1 %v1161_v13  ;;  %v1157_v14 = vpop.f32.mrf.mxu0 }
 0x859   : > { %v1158_v15 = vadd.f32 %v2521_v0, %v1157_v14 }
 0x85a   : > { %v2180_v16 = vpop.f32.mrf.mxu0 }
 0x85b   : > { %v1164_v17 = vsel %vm645_vm11, %v1158_v15, -inf }
 0x85c   : > { %1165 = vmax.xlane.f32.xlu0 %v1164_v17 }
 0x8e1   : > { %v1163_v18 = vpop.xlane.xlu1 %1162 }
 0x8e2   : > { %v1167_v20 = vsub.f32 %v1155_v11, %v1163_v18  ;;  %v2312_v11 = vld [vmem:[%s2543_s1 + $0x10] sm:$0xff]  }
 0x8e4   : > { %v1169_v21 = vmul.f32 1.442695, %v1167_v20 }
 0x8e5   : > { %v1166_v22 = vpop.xlane.xlu0 %1165 }
 0x8e6   : > { %2360 = vpow2.f32 %v1169_v21  ;;  %v1168_v23 = vsub.f32 %v1158_v15, %v1166_v22 }
 0x8e8   : > { %v1171_v24 = vmul.f32 1.442695, %v1168_v23 }
 0x8ea   : > { %2362 = vpow2.f32 %v1171_v24 }
 0x8f3   : > { %v2361_v25 = vpop.eup %2360 }
 0x8f4   : > { %v1173_v27 = vsel %vm641_vm10, %v2361_v25, 0.0 }
 0x8f5   : > { %1174 = vadd.xlane.f32.xlu0 %v1173_v27 }
 0x8f7   : > { %v2363_v28 = vpop.eup %2362 }
 0x8f8   : > { %v1176_v30 = vsel %vm645_vm11, %v2363_v28, 0.0 }
 0x8f9   : > { %1177 = vadd.xlane.f32.xlu1 %v1176_v30 }
 0x90b   : > { %1184 = vrot.lane.b32.xlu0 %v2592_v56, %s2432_s18 }
 0x913   : > { %v1101_v0 = vpop.f32.mrf.mxu1 }
 0x914   : > { %v1108_v31 = vadd.f32 %v1101_v0, %v2653_v26 }
 0x915   : > { %v2173_v32 = vpop.f32.mrf.mxu1 }
 0x917   : > { %v1104_v33 = vpop.f32.mrf.mxu1 }
 0x918   : > { %v1109_v34 = vadd.f32 %v1104_v33, %v2655_v29  ;;  %v579_v29 = vld [vmem:[%s2531_s26 + $0xc] sm:$0xf]  ;;  %v1335_v33 = vsub.s32 3, %v2583_v37 }
 0x919   : > { %v2174_v35 = vpop.f32.mrf.mxu1  ;;  %v1238_v44 = vsel %vm845_vm13, %v579_v29, 0 }
 0x91a   : > { %2188 = vmatpush3.bf16.msra.mxu0 %v1238_v44  ;;  %v1336_v35 = vrot.slane %v2558_v1, %v1335_v33  ;;  %v2325_v33 = vld [vmem:[%s2551_s20 + $0x50] sm:$0xff]  }
 0x91b   : > { %2201 = vmatprep.subr.bf16.mxu0 %v2420_v19 }
 0x97e   : > { %v1175_v36 = vpop.xlane.xlu0 %1174 }
 0x97f   : > { %2364 = vrcp.f32 %v1175_v36 }
 0x982   : > { %v1178_v38 = vpop.xlane.xlu1 %1177  ;;  %v1185_v39 = vpop.permute.xlu0 %1184 }
 0x983   : > { %2366 = vrcp.f32 %v1178_v38  ;;  %v1190_v40 = vsel %vm671_vm12, %v1185_v39, 0 }
 0x984   : > { %2182 = vmatpush3.bf16.msra.mxu1 %v1190_v40 }
 0x985   : > { %2193 = vmatprep.subr.bf16.mxu1 %v2420_v19 }
 0x98c   : > { %v2365_v56 = vpop.eup %2364 }
 0x98d   : > { %v1181_v42 = vmul.f32 %v2365_v56, %v2361_v25 }
 0x990   : > { %v2367_v41 = vpop.eup %2366 }
 0x991   : > { %v1182_v26 = vmul.f32 %v2367_v41, %v2363_v28 }
 0x993   : > { %v1183_v43 = vpack.c.bf16 %v1182_v26, %v1181_v42 }
 0x995   : > { %2184 = vmatmul.mubr.msk.bf16.vlgmr.msra.gmra.mxu1 %vm641_vm10, %v1183_v43  ;;  %v2314_v43 = vld [vmem:[%s2543_s1 + $0x28] sm:$0xff]  }
 0x996   : > { %2197 = vmatprep.mubr.msk.bf16.mxu1 %vm2421_vm4, %v2420_v19  ;;  %2194 = vmatpush3.bf16.msra.mxu1 %v2310_v9 }
 0x997   : > { %2195 = vmatprep.subr.bf16.mxu1 %v2420_v19 }
 0x99a   : > { %2196 = vmatpush3.bf16.msra.mxu1 %v2312_v11  ;;  %v2039_v11 = vld [vmem:[%s428_s15] ss:$0 sm:$0xff] }
 0x99b   : > { %2209 = vmatprep.subr.bf16.mxu1 %v2420_v19 }
 0xa55   : > { %v1226_v45 = vpop.f32.mrf.mxu1 }
 0xa57   : > { %v2185_v46 = vpop.f32.mrf.mxu1 }
 0xa59   : > { %v1229_v47 = vpop.f32.mrf.mxu1 }
 0xa5a   : > { %v1233_v48 = vpack.c.bf16 %v1229_v47, %v1226_v45 }
 0xa5b   : > { %v2186_v49 = vpop.f32.mrf.mxu1 }
 0xa5c   : > { %2190 = vmatmul.mubr.msk.bf16.vlgmr.msra.gmra.mxu0 %vm593_vm9, %v1233_v48 }
 0xa5d   : > { %2205 = vmatprep.mubr.msk.bf16.mxu0 %vm2421_vm4, %v2420_v19  ;;  %2202 = vmatpush3.bf16.msra.mxu0 %v2311_v10 }
 0xa5e   : > { %2203 = vmatprep.subr.bf16.mxu0 %v2420_v19 }
 0xa61   : > { %2204 = vmatpush3.bf16.msra.mxu0 %v2313_v12 }
 0xa62   : > { %2217 = vmatprep.subr.bf16.mxu0 %v2420_v19 }
 0xb1c   : > { %v1274_v50 = vpop.f32.mrf.mxu0 }
 0xb1d   : > { %v1281_v59 = vadd.f32 %v1274_v50, %v1108_v31  ;;  %v1327_v31 = vsub.s32 2, %v2583_v37 }
 0xb1e   : > { %v2191_v51 = vpop.f32.mrf.mxu0 }
 0xb1f   : > { %v2703_v52 = vadd.f32 %v1281_v59, %v2561_v4  ;;  %v1328_v32 = vrot.slane %v2558_v1, %v1327_v31  ;;  %v2315_v51 = vld [vmem:[%s2543_s1 + $0x20] sm:$0xff]  }
 0xb20   : > { %v1277_v53 = vpop.f32.mrf.mxu0 }
 0xb21   : > { %v1282_v54 = vadd.f32 %v1277_v53, %v1109_v34  ;;  %v1285_v55 = vsel %vm458_vm2, %v2703_v52, 0.0 }
 0xb22   : > { %1286 = vadd.xlane.f32.xlu1 %v1285_v55  ;;  %v2192_v57 = vpop.f32.mrf.mxu0  ;;  %v2317_v55 = vld [vmem:[%s2551_s20 + $0x30] sm:$0xff]  }
 0xb23   : > { %v2708_v58 = vadd.f32 %v1282_v54, %v2563_v5  ;;  %v2316_v54 = vld [vmem:[%s2551_s20 + $0x38] sm:$0xff]  }
 0xb24   : > { %v2318_v57 = vld [vmem:[%s2551_s20 + $0x18] sm:$0xff]  }
 0xb25   : > { %v1288_v60 = vsel %vm462_vm3, %v2708_v58, 0.0 }
 0xb26   : > { %1289 = vadd.xlane.f32.xlu1 %v1288_v60  ;;  %v2319_v60 = vld [vmem:[%s2551_s20 + $0x28] sm:$0xff]  }
 0xbab   : > { %v1287_v61 = vpop.xlane.xlu1 %1286 }
 0xbac   : > { %v1291_v4 = vmul.f32 0.03125, %v1287_v61  ;;  %v2320_v61 = vld [vmem:[%s2551_s20 + $0x10] sm:$0xff]  }
 0xbae   : > { %v1293_v62 = vsub.f32 %v2703_v52, %v1291_v4  ;;  %v2321_v4 = vld [vmem:[%s2551_s20 + $0x20] sm:$0xff]  }
 0xbaf   : > { %v1290_v63 = vpop.xlane.xlu1 %1289 }
 0xbb0   : > { %v1292_v2 = vmul.f32 0.03125, %v1290_v63  ;;  %v1295_v3 = vmul.f32 %v1293_v62, %v1293_v62  ;;  %v1329_v34 = vmul.f32 %v1328_v32, %v1293_v62  ;;  %v2322_v62 = vld [vmem:[%s2551_s20 + $0x8] sm:$0xff]   ;;  %v2323_v63 = vld [vmem:[%s2551_s20] sm:$0xff]  }
 0xbb2   : > { %v1294_v6 = vsub.f32 %v2708_v58, %v1292_v2  ;;  %v1297_v7 = vsel %vm458_vm2, %v1295_v3, 0.0 }
 0xbb3   : > { %1298 = vadd.xlane.f32.xlu1 %v1297_v7 }
 0xbb4   : > { %v1296_v5 = vmul.f32 %v1294_v6, %v1294_v6  ;;  %v1330_v39 = vmul.f32 %v1328_v32, %v1294_v6 }
 0xbb6   : > { %v1300_v8 = vsel %vm462_vm3, %v1296_v5, 0.0 }
 0xbb7   : > { %1301 = vadd.xlane.f32.xlu1 %v1300_v8 }
 0xc3c   : > { %v1299_v13 = vpop.xlane.xlu1 %1298 }
 0xc3d   : > { %v1303_v14 = vmul.f32 0.032258064, %v1299_v13 }
 0xc3f   : > { %2368 = vrsqrt.f32 %v1303_v14  ;;  %vm1307_vm14 = vcmp.eq.f32.partialorder %v1303_v14, inf  ;;  %v1310_v20 = vand.u32 2147483648, %v1303_v14  ;;  %vm1309_vm15 = vcmp.eq.f32.partialorder %v1303_v14, 0.0 }
 0xc40   : > { %v1302_v15 = vpop.xlane.xlu1 %1301 }
 0xc41   : > { %v1304_v16 = vmul.f32 0.032258064, %v1302_v15 }
 0xc43   : > { %2370 = vrsqrt.f32 %v1304_v16  ;;  %vm1314_vm0 = vcmp.eq.f32.partialorder %v1304_v16, inf  ;;  %v1317_v27 = vand.u32 2147483648, %v1304_v16  ;;  %vm1316_vm1 = vcmp.eq.f32.partialorder %v1304_v16, 0.0 }
 0xc4c   : > { %v2369_v17 = vpop.eup %2368 }
 0xc4d   : > { %v1306_v18 = vmul.f32 %v2369_v17, %v1303_v14 }
 0xc4f   : > { %v1308_v21 = vsel %vm1307_vm14, %v1303_v14, %v1306_v18 }
 0xc50   : > { %v2371_v22 = vpop.eup %2370  ;;  %v1311_v23 = vsel %vm1309_vm15, %v1310_v20, %v1308_v21 }
 0xc51   : > { %v1319_v24 = vadd.f32 1e-06, %v1311_v23  ;;  %v1313_v25 = vmul.f32 %v2371_v22, %v1304_v16 }
 0xc53   : > { %2372 = vrcp.f32 %v1319_v24  ;;  %v1315_v28 = vsel %vm1314_vm0, %v1304_v16, %v1313_v25 }
 0xc54   : > { %v1318_v30 = vsel %vm1316_vm1, %v1317_v27, %v1315_v28  ;;  %v2324_v27 = vld [vmem:[%s2551_s20 + $0x58] sm:$0xff]  }
 0xc55   : > { %v1320_v0 = vadd.f32 1e-06, %v1318_v30 }
 0xc57   : > { %2374 = vrcp.f32 %v1320_v0 }
 0xc60   : > { %v2373_v36 = vpop.eup %2372 }
 0xc61   : > { %v1331_v38 = vmul.f32 %v2373_v36, %v1329_v34  ;;  %v2326_v34 = vld [vmem:[%s2551_s20 + $0x48] sm:$0xff]  }
 0xc63   : > { %v1337_v40 = vadd.f32 %v1336_v35, %v1331_v38  ;;  %v2327_v38 = vld [vmem:[%s2551_s20 + $0x40] sm:$0xff]  }
 0xc64   : > { %v2375_v56 = vpop.eup %2374 }
 0xc65   : > { %v1332_v41 = vmul.f32 %v2375_v56, %v1330_v39  ;;  %v1355_v26 = vrot.slane %v1337_v40, 7  ;;  %v1476_v45 = vrot.slane %v1337_v40, 1 }
 0xc67   : > { %v1338_v42 = vadd.f32 %v1336_v35, %v1332_v41  ;;  %v1360_v48 = vsel %vm1354_vm5, 0.0, %v1355_v26 }
 0xc69   : > { %v1362_v29 = vpack.c.bf16 %v1338_v42, %v1337_v40  ;;  %v1356_v44 = vrot.slane %v1338_v42, 7  ;;  %v1477_v46 = vrot.slane %v1338_v42, 1 }
 0xc6b   : > { %2198 = vmatmul.mubr.msk.bf16.vlgmr.msra.gmra.mxu1 %vm458_vm2, %v1362_v29  ;;  %v1357_v47 = vsel %vm1354_vm5, %v1355_v26, %v1356_v44  ;;  %v1478_v49 = vsel %vm1475_vm6, %v1476_v45, %v1477_v46  ;;  %v1481_v50 = vsel %vm1354_vm5, %v1477_v46, 0.0 }
 0xc6c   : > { %2210 = vmatpush3.bf16.msra.mxu1 %v2314_v43  ;;  %v1361_v59 = vpack.c.bf16 %v1357_v47, %v1360_v48  ;;  %2213 = vmatprep.mubr.msk.bf16.mxu1 %vm2421_vm4, %v2420_v19  ;;  %v1482_v53 = vpack.c.bf16 %v1481_v50, %v1478_v49  ;;  %v1801_v47 = vsub.s32 4, %v2583_v37 }
 0xc6d   : > { %2211 = vmatprep.subr.bf16.mxu1 %v2420_v19 }
 0xc6e   : > { %2206 = vmatmul.mubr.msk.bf16.vlgmr.msra.gmra.mxu0 %vm458_vm2, %v1361_v59 }
 0xc6f   : > { %2225 = vmatprep.mubr.msk.bf16.mxu0 %vm2421_vm4, %v2420_v19  ;;  %2218 = vmatpush3.bf16.msra.mxu0 %v2316_v54 }
 0xc70   : > { %2212 = vmatpush3.bf16.msra.mxu1 %v2315_v51  ;;  %2219 = vmatprep.subr.bf16.mxu0 %v2420_v19 }
 0xc71   : > { %2229 = vmatprep.subr.bf16.mxu1 %v2420_v19 }
 0xc73   : > { %2214 = vmatmul.mubr.msk.bf16.vlgmr.msra.gmra.mxu1 %vm458_vm2, %v1482_v53  ;;  %2220 = vmatpush3.bf16.msra.mxu0 %v2317_v55 }
 0xc74   : > { %2237 = vmatprep.mubr.msk.bf16.mxu1 %vm2421_vm4, %v2420_v19  ;;  %2230 = vmatpush3.bf16.msra.mxu1 %v2318_v57 }
 0xc75   : > { %2221 = vmatprep.subr.bf16.mxu0 %v2420_v19  ;;  %2231 = vmatprep.subr.bf16.mxu1 %v2420_v19 }
 0xc77   : > { %2222 = vmatpush3.bf16.msra.mxu0 %v2319_v60 }
 0xc78   : > { %2232 = vmatpush3.bf16.msra.mxu1 %v2320_v61  ;;  %2223 = vmatprep.subr.bf16.mxu0 %v2420_v19 }
 0xc79   : > { %2233 = vmatprep.subr.bf16.mxu1 %v2420_v19 }
 0xc7b   : > { %2224 = vmatpush3.bf16.msra.mxu0 %v2321_v4 }
 0xc7c   : > { %2234 = vmatpush3.bf16.msra.mxu1 %v2322_v62  ;;  %2241 = vmatprep.subr.bf16.mxu0 %v2420_v19 }
 0xc7d   : > { %2235 = vmatprep.subr.bf16.mxu1 %v2420_v19 }
 0xc80   : > { %2236 = vmatpush3.bf16.msra.mxu1 %v2323_v63 }
 0xd2b   : > { %v1412_v2 = vpop.f32.mrf.mxu1 }
 0xd2d   : > { %v2199_v3 = vpop.f32.mrf.mxu1 }
 0xd2e   : > { %v1468_v6 = vpop.f32.mrf.mxu0 }
 0xd2f   : > { %v1415_v7 = vpop.f32.mrf.mxu1  ;;  %v1469_v9 = vadd.f32 %v1468_v6, %v1412_v2 }
 0xd30   : > { %v2207_v5 = vpop.f32.mrf.mxu0 }
 0xd31   : > { %v2200_v8 = vpop.f32.mrf.mxu1 }
 0xd32   : > { %v1471_v10 = vpop.f32.mrf.mxu0 }
 0xd33   : > { %v1532_v12 = vpop.f32.mrf.mxu1  ;;  %v1472_v16 = vadd.f32 %v1471_v10, %v1415_v7 }
 0xd34   : > { %v1539_v13 = vadd.f32 %v1532_v12, %v1469_v9  ;;  %v2208_v14 = vpop.f32.mrf.mxu0 }
 0xd35   : > { %v2215_v15 = vpop.f32.mrf.mxu1 }
 0xd36   : > { %v1547_v17 = vadd.f32 %v2039_v11, %v1539_v13 }
 0xd37   : > { %v1535_v18 = vpop.f32.mrf.mxu1 }
 0xd38   : > { %v1549_v20 = vmax.f32 %v1547_v17, 0.0  ;;  %v1540_v21 = vadd.f32 %v1535_v18, %v1472_v16 }
 0xd39   : > { %v2216_v22 = vpop.f32.mrf.mxu1 }
 0xd3a   : > { %v1548_v23 = vadd.f32 %v2039_v11, %v1540_v21  ;;  %v1577_v24 = vrot.slane %v1549_v20, 7  ;;  %v1722_v36 = vrot.slane %v1549_v20, 1 }
 0xd3c   : > { %v1550_v25 = vmax.f32 %v1548_v23, 0.0  ;;  %v1582_v0 = vsel %vm1354_vm5, 0.0, %v1577_v24 }
 0xd3e   : > { %v1578_v28 = vrot.slane %v1550_v25, 7  ;;  %v1584_v30 = vpack.c.bf16 %v1550_v25, %v1549_v20  ;;  %v1723_v35 = vrot.slane %v1550_v25, 1 }
 0xd40   : > { %v1579_v31 = vsel %vm1354_vm5, %v1577_v24, %v1578_v28  ;;  %2226 = vmatmul.mubr.msk.bf16.vlgmr.msra.gmra.mxu0 %vm1609_vm7, %v1584_v30  ;;  %v1724_v39 = vsel %vm1475_vm6, %v1722_v36, %v1723_v35  ;;  %v1727_v40 = vsel %vm1354_vm5, %v1723_v35, 0.0 }
 0xd41   : > { %2242 = vmatpush3.bf16.msra.mxu0 %v2324_v27  ;;  %v1583_v32 = vpack.c.bf16 %v1579_v31, %v1582_v0  ;;  %2249 = vmatprep.mubr.msk.bf16.mxu0 %vm2421_vm4, %v2420_v19  ;;  %v1728_v56 = vpack.c.bf16 %v1727_v40, %v1724_v39 }
 0xd42   : > { %2243 = vmatprep.subr.bf16.mxu0 %v2420_v19 }
 0xd43   : > { %2238 = vmatmul.mubr.msk.bf16.vlgmr.msra.gmra.mxu1 %vm1609_vm7, %v1583_v32 }
 0xd45   : > { %2244 = vmatpush3.bf16.msra.mxu0 %v2325_v33 }
 0xd46   : > { %2245 = vmatprep.subr.bf16.mxu0 %v2420_v19 }
 0xd49   : > { %2246 = vmatpush3.bf16.msra.mxu0 %v2326_v34 }
 0xd4a   : > { %2247 = vmatprep.subr.bf16.mxu0 %v2420_v19  ;;  %v1802_v19 = vrot.slane %v2558_v1, %v1801_v47 }
 0xd4d   : > { %2248 = vmatpush3.bf16.msra.mxu0 %v2327_v38 }
 0xd50   : > { %2250 = vmatmul.mubr.msk.bf16.vlgmr.msra.gmra.mxu0 %vm1609_vm7, %v1728_v56 }
 0xe00   : > { %v1647_v41 = vpop.f32.mrf.mxu0 }
 0xe02   : > { %v2227_v42 = vpop.f32.mrf.mxu0 }
 0xe03   : > { %v1715_v26 = vpop.f32.mrf.mxu1 }
 0xe04   : > { %v1650_v43 = vpop.f32.mrf.mxu0  ;;  %v1716_v48 = vadd.f32 %v1715_v26, %v1647_v41 }
 0xe05   : > { %v2239_v29 = vpop.f32.mrf.mxu1 }
 0xe06   : > { %v2228_v44 = vpop.f32.mrf.mxu0 }
 0xe07   : > { %v1718_v45 = vpop.f32.mrf.mxu1 }
 0xe08   : > { %v1719_v51 = vadd.f32 %v1718_v45, %v1650_v43 }
 0xe09   : > { %v2240_v46 = vpop.f32.mrf.mxu1 }
 0xe10   : > { %v1790_v49 = vpop.f32.mrf.mxu0 }
 0xe11   : > { %v1797_v50 = vadd.f32 %v1790_v49, %v1716_v48 }
 0xe12   : > { %v2251_v59 = vpop.f32.mrf.mxu0 }
 0xe13   : > { %v1803_v53 = vadd.f32 %v1802_v19, %v1797_v50 }
 0xe14   : > { %v1793_v54 = vpop.f32.mrf.mxu0 }
 0xe15   : > { %v1805_v55 = vadd.f32 %v1803_v53, %v2703_v52  ;;  %v1798_v57 = vadd.f32 %v1793_v54, %v1719_v51 }
 0xe16   : > { %v2252_v60 = vpop.f32.mrf.mxu0 }
 0xe17   : > { %1807 = vst.msk [vmem:[#allocation2] sm:$0xff] %vm458_vm2, %v1805_v55  ;;  %v1804_v61 = vadd.f32 %v1802_v19, %v1798_v57  ;;  %1812 = sbr.rel (%p2055_p8) target bundleno = 3925 (0xf55), region = 60 }
 0xe19   : > { %v1806_v4 = vadd.f32 %v1804_v61, %v2708_v58 }
 0xe1b   : > { %1808 = vst.msk [vmem:[#allocation2 + $0x8] sm:$0x3] %vm462_vm3, %v1806_v4 }
 0xe1c   : > { %v1813_v62 = vsel %vm458_vm2, %v1805_v55, 0.0  ;;  %v1816_v63 = vsel %vm462_vm3, %v1806_v4, 0.0  ;;  %v1841_v17 = vsub.s32 5, %v2583_v37  ;;  %v1847_v18 = vsub.s32 6, %v2583_v37 }
 0xe1d   : > { %1814 = vadd.xlane.f32.xlu0 %v1813_v62 }
 0xe1e   : > { %v1842_v20 = vrot.slane %v2558_v1, %v1841_v17  ;;  %v1848_v22 = vrot.slane %v2558_v1, %v1847_v18 }
 0xe21   : > { %1817 = vadd.xlane.f32.xlu0 %v1816_v63 }
 0xea6   : > { %v1815_v2 = vpop.xlane.xlu0 %1814 }
 0xea7   : > { %v1819_v52 = vmul.f32 0.03125, %v1815_v2 }
 0xea9   : > { %v1821_v3 = vsub.f32 %v1805_v55, %v1819_v52 }
 0xeaa   : > { %v1818_v6 = vpop.xlane.xlu0 %1817 }
 0xeab   : > { %v1820_v7 = vmul.f32 0.03125, %v1818_v6  ;;  %v1823_v5 = vmul.f32 %v1821_v3, %v1821_v3 }
 0xead   : > { %v1822_v8 = vsub.f32 %v1806_v4, %v1820_v7  ;;  %v1825_v58 = vsel %vm458_vm2, %v1823_v5, 0.0 }
 0xeae   : > { %1826 = vadd.xlane.f32.xlu1 %v1825_v58 }
 0xeaf   : > { %v1824_v9 = vmul.f32 %v1822_v8, %v1822_v8 }
 0xeb1   : > { %v1828_v10 = vsel %vm462_vm3, %v1824_v9, 0.0 }
 0xeb2   : > { %1829 = vadd.xlane.f32.xlu1 %v1828_v10 }
 0xf37   : > { %v1827_v11 = vpop.xlane.xlu1 %1826 }
 0xf38   : > { %v1831_v12 = vmul.f32 0.03125, %v1827_v11 }
 0xf3a   : > { %v1833_v13 = vadd.f32 1e-05, %v1831_v12 }
 0xf3b   : > { %v1830_v14 = vpop.xlane.xlu1 %1829 }
 0xf3c   : > { %2376 = vrsqrt.f32 %v1833_v13  ;;  %v1832_v15 = vmul.f32 0.03125, %v1830_v14 }
 0xf3e   : > { %v1834_v16 = vadd.f32 1e-05, %v1832_v15 }
 0xf40   : > { %2378 = vrsqrt.f32 %v1834_v16 }
 0xf49   : > { %v2377_v21 = vpop.eup %2376 }
 0xf4a   : > { %v1837_v23 = vmul.f32 %v2377_v21, %v1821_v3 }
 0xf4c   : > { %v1843_v24 = vmul.f32 %v1842_v20, %v1837_v23 }
 0xf4d   : > { %v2379_v25 = vpop.eup %2378 }
 0xf4e   : > { %v1849_v27 = vadd.f32 %v1848_v22, %v1843_v24  ;;  %v1838_v28 = vmul.f32 %v2379_v25, %v1822_v8 }
 0xf50   : > { %1851 = vst.msk [vmem:[%s2556_s14] sm:$0xff] %vm458_vm2, %v1849_v27  ;;  %v1844_v30 = vmul.f32 %v1842_v20, %v1838_v28 }
 0xf52   : > { %v1850_v0 = vadd.f32 %v1848_v22, %v1844_v30 }
 0xf54   : > { %1852 = vst.msk [vmem:[%s2556_s14 + $0x8] sm:$0x3] %vm462_vm3, %v1850_v0 }
 0xf55 PF: > { %s18_s9 = sadd.s32 1, %s2418_s9   ;;  %s2834_s12 = sld [smem:[#allocation3_spill]] }
 0xf56   : > { %p15_p9 = scmp.ge.s32.totalorder %s18_s9, 6   ;;  %s2835_s15 = sld [smem:[#allocation4_spill]] }
 0xf57   : > { %s2836_s27 = smov %s2410_s29  ;;  %s2837_s28 = smov %s2414_s30 }
 0xf58   :  { %17 = sbr.rel (!%p15_p9) target bundleno = 5 (0x5), region = 111 }
 0xf5b   : > { %s2838_s29 = smov %s2834_s12 }
 0xf5c   : > { %s2839_s30 = smov %s2835_s15 }

</bundles_post_ra>
